<compile_context>
chip_gen: v7x
topology: tpu7x:2x2x1
jax: 0.10.0
libtpu: 0.0.40
codegen_flags: <defaults>
</compile_context>

<pallas_src>
import functools
import math

import jax
import jax.numpy as jnp
from jax.experimental import pallas as pl
from jax.experimental.pallas import tpu as pltpu


# ----------------------------------------------------------------------------- kernels


def _resnet_kernel(x_ref, temb_ref, colmask_ref, gmat_ref, gmat_t_ref,
                   n1g_ref, n1b_ref, w1_ref, b1_ref, tw_ref, tb_ref,
                   n2g_ref, n2b_ref, w2_ref, b2_ref,
                   o_ref, pad_ref, *, H, W, groups, eps, pad_rows):
    """Whole pre-norm ResnetBlock2D for one batch element (grid=(B,)).

    GN1+SiLU -> conv3x3 -> + time_emb_proj(SiLU(temb)) -> GN2+SiLU -> conv3x3 -> + x.
    The 3x3 conv uses 9 statically shifted views of a zero-padded token scratch in
    VMEM (no im2col materialisation in HBM); out-of-row taps land in zero pad rows,
    column wrap-around is removed with precomputed (N,1) masks.
    """
    N = H * W
    C = x_ref.shape[-1]
    cg = C // groups
    inv_count = 1.0 / float(N * cg)

    x = x_ref[0].astype(jnp.float32)                       # (N, C)
    gmat = gmat_ref[...]                                   # (C, G) group one-hot
    gmat_t = gmat_t_ref[...]                               # (G, C)
    mask_l = colmask_ref[:, 0:1]                           # 0.0 where w == 0
    mask_r = colmask_ref[:, 1:2]                           # 0.0 where w == W-1

    def group_norm_silu(v, g, b):
        # two-pass (centered) group statistics pooled via tiny (C,G)/(G,C) matmuls
        s = jnp.sum(v, axis=0, keepdims=True)              # (1, C)
        mean = jnp.dot(jnp.dot(s, gmat, preferred_element_type=jnp.float32) * inv_count,
                       gmat_t, preferred_element_type=jnp.float32)
        vc = v - mean
        ss = jnp.sum(vc * vc, axis=0, keepdims=True)
        var = jnp.dot(jnp.dot(ss, gmat, preferred_element_type=jnp.float32) * inv_count,
                      gmat_t, preferred_element_type=jnp.float32)
        y = vc * jax.lax.rsqrt(var + eps)
        y = y * g + b
        return y * jax.nn.sigmoid(y)                       # swish

    # Zero the padded scratch once; pad rows stay zero for both convs because the
    # interior is fully overwritten each time.
    pad_ref[...] = jnp.zeros_like(pad_ref)

    def conv3x3(y, w_ref, b):
        pad_ref[pl.ds(pad_rows, N), :] = y                 # aligned interior write
        acc = jnp.zeros((N, C), jnp.float32)
        for dy in range(3):
            for dx in range(3):
                s = (dy - 1) * W + (dx - 1)
                xt = pad_ref[pl.ds(pad_rows + s, N), :]    # shifted token view
                if dx == 0:
                    xt = xt * mask_l
                elif dx == 2:
                    xt = xt * mask_r
                acc = acc + jnp.dot(xt.astype(jnp.bfloat16), w_ref[dy * 3 + dx],
                                    preferred_element_type=jnp.float32)
        return acc + b

    # norm1 + swish + conv1
    h = conv3x3(group_norm_silu(x, n1g_ref[...], n1b_ref[...]), w1_ref, b1_ref[...])

    # time embedding: SiLU(temb) @ W + b, broadcast over tokens
    tv = temb_ref[0].astype(jnp.float32)                   # (1, TEMB)
    tv = tv * jax.nn.sigmoid(tv)
    h = h + (jnp.dot(tv.astype(jnp.bfloat16), tw_ref[...],
                     preferred_element_type=jnp.float32) + tb_ref[...])

    # norm2 + swish + (dropout p=0.0 is identity) + conv2
    h = conv3x3(group_norm_silu(h, n2g_ref[...], n2b_ref[...]), w2_ref, b2_ref[...])

    # residual; output_scale_factor == 1.0
    o_ref[...] = (x + h)[None].astype(o_ref.dtype)


def _transformer_kernel(x_ref, enc_ref, gmat_ref, gmat_t_ref,
                        gn_g_ref, gn_b_ref, pin_w_ref, pin_b_ref,
                        ln1_g_ref, ln1_b_ref,
                        wq1_ref, wk1_ref, wv1_ref, wo1_ref, bo1_ref,
                        ln2_g_ref, ln2_b_ref,
                        wq2_ref, wk2_ref, wv2_ref, wo2_ref, bo2_ref,
                        ln3_g_ref, ln3_b_ref,
                        ff1_w_ref, ff1_b_ref, ff2_w_ref, ff2_b_ref,
                        pout_w_ref, pout_b_ref,
                        o_ref, attn_scratch,
                        *, heads, dim_head, groups, gn_eps, ln_eps):
    """Whole Transformer2DModel (use_linear_projection=False, num_layers=1) for one batch."""
    x = x_ref[0].astype(jnp.float32)                       # (N, C)
    enc = enc_ref[0].astype(jnp.float32)                   # (M, Dc)
    N, C = x.shape
    cg = C // groups
    inv_count = 1.0 / float(N * cg)
    gmat = gmat_ref[...]
    gmat_t = gmat_t_ref[...]

    def group_norm(v, g, b):
        s = jnp.sum(v, axis=0, keepdims=True)
        mean = jnp.dot(jnp.dot(s, gmat, preferred_element_type=jnp.float32) * inv_count,
                       gmat_t, preferred_element_type=jnp.float32)
        vc = v - mean
        ss = jnp.sum(vc * vc, axis=0, keepdims=True)
        var = jnp.dot(jnp.dot(ss, gmat, preferred_element_type=jnp.float32) * inv_count,
                      gmat_t, preferred_element_type=jnp.float32)
        return vc * jax.lax.rsqrt(var + gn_eps) * g + b

    def layer_norm(v, g, b):
        mean = jnp.mean(v, axis=-1, keepdims=True)
        vc = v - mean
        var = jnp.mean(vc * vc, axis=-1, keepdims=True)
        return vc * jax.lax.rsqrt(var + ln_eps) * g + b

    def linear(v, w_ref, b_ref=None):
        y = jnp.dot(v.astype(jnp.bfloat16), w_ref[...],
                    preferred_element_type=jnp.float32)
        if b_ref is not None:
            y = y + b_ref[...]
        return y

    scale = 1.0 / math.sqrt(dim_head)

    def mha(xq, ctx, wq_ref, wk_ref, wv_ref, wo_ref, bo_ref):
        q = linear(xq, wq_ref)                             # (N, C)
        k = linear(ctx, wk_ref)                            # (M, C)
        v = linear(ctx, wv_ref)                            # (M, C)
        # Per-head outputs written straight into a VMEM scratch (no concatenate).
        # TODO(synk): at production head counts batch heads in one dot_general and
        # pad M up to a multiple of 128 for lane-dense scores.
        for hh in range(heads):
            lo = hh * dim_head
            qh = q[:, lo:lo + dim_head] * scale
            kh = k[:, lo:lo + dim_head]
            vh = v[:, lo:lo + dim_head]
            s = jax.lax.dot_general(qh, kh, (((1,), (1,)), ((), ())),
                                    preferred_element_type=jnp.float32)  # (N, M)
            s = s - jnp.max(s, axis=-1, keepdims=True)
            p = jnp.exp(s)
            p = p * pl.reciprocal(jnp.sum(p, axis=-1, keepdims=True), approx=True)
            attn_scratch[:, lo:lo + dim_head] = jnp.dot(
                p, vh, preferred_element_type=jnp.float32)
        return linear(attn_scratch[...], wo_ref, bo_ref)

    # GroupNorm (eps=1e-6) + proj_in (1x1 conv == per-token linear)
    h = group_norm(x, gn_g_ref[...], gn_b_ref[...])
    h = linear(h, pin_w_ref, pin_b_ref)

    # BasicTransformerBlock: self-attn, cross-attn, GEGLU FF (pre-LN, residuals)
    n1 = layer_norm(h, ln1_g_ref[...], ln1_b_ref[...])
    h = h + mha(n1, n1, wq1_ref, wk1_ref, wv1_ref, wo1_ref, bo1_ref)

    n2 = layer_norm(h, ln2_g_ref[...], ln2_b_ref[...])
    h = h + mha(n2, enc, wq2_ref, wk2_ref, wv2_ref, wo2_ref, bo2_ref)

    n3 = layer_norm(h, ln3_g_ref[...], ln3_b_ref[...])
    ff_h = linear(n3, ff1_w_ref, ff1_b_ref)                # (N, 8C)
    half = ff_h.shape[-1] // 2
    a = ff_h[:, :half]
    g = ff_h[:, half:]
    # TODO(synk): tanh-approx GELU; torch F.gelu default is the exact erf form.
    gelu = 0.5 * g * (1.0 + jnp.tanh(0.7978845608028654 * (g + 0.044715 * g * g * g)))
    h = h + linear(a * gelu, ff2_w_ref, ff2_b_ref)

    h = linear(h, pout_w_ref, pout_b_ref)                  # proj_out (1x1 conv)
    o_ref[...] = (h + x)[None].astype(o_ref.dtype)         # outer residual


# ----------------------------------------------------------------------------- wrappers


def _aux_arrays(C, groups, N, W):
    """Tiny constant helpers: group-pooling matrices and conv column masks."""
    cg = C // groups
    gidx = jnp.arange(C) // cg
    gmat = (gidx[:, None] == jnp.arange(groups)[None, :]).astype(jnp.float32)  # (C, G)
    gmat_t = jnp.transpose(gmat)                                               # (G, C)
    wcol = jnp.arange(N) % W
    colmask = jnp.stack([(wcol != 0).astype(jnp.float32),
                         (wcol != W - 1).astype(jnp.float32)], axis=1)         # (N, 2)
    return gmat, gmat_t, colmask


def resnet_forward(x, temb, p, gmat, gmat_t, colmask, *, H, W, groups, eps):
    B, N, C = x.shape
    TE = temb.shape[1]
    G = groups
    pad_rows = ((W + 1 + 7) // 8) * 8           # >= W+1, sublane-aligned interior write
    rows = 2 * pad_rows + N
    vecC = pl.BlockSpec((1, C), lambda b: (0, 0))
    kern = functools.partial(_resnet_kernel, H=H, W=W, groups=groups, eps=eps,
                             pad_rows=pad_rows)
    return pl.pallas_call(
        kern,
        out_shape=jax.ShapeDtypeStruct((B, N, C), x.dtype),
        grid=(B,),
        in_specs=[
            pl.BlockSpec((1, N, C), lambda b: (b, 0, 0)),        # x tokens
            pl.BlockSpec((1, 1, TE), lambda b: (b, 0, 0)),       # temb
            pl.BlockSpec((N, 2), lambda b: (0, 0)),              # column masks
            pl.BlockSpec((C, G), lambda b: (0, 0)),              # group pooling
            pl.BlockSpec((G, C), lambda b: (0, 0)),              # group pooling^T
            vecC, vecC,                                          # norm1 gamma/beta
            pl.BlockSpec((9, C, C), lambda b: (0, 0, 0)),        # conv1 w (bf16)
            vecC,                                                # conv1 b
            pl.BlockSpec((TE, C), lambda b: (0, 0)),             # time_emb_proj w (bf16)
            vecC,                                                # time_emb_proj b
            vecC, vecC,                                          # norm2 gamma/beta
            pl.BlockSpec((9, C, C), lambda b: (0, 0, 0)),        # conv2 w (bf16)
            vecC,                                                # conv2 b
        ],
        out_specs=pl.BlockSpec((1, N, C), lambda b: (b, 0, 0)),
        scratch_shapes=[pltpu.VMEM((rows, C), jnp.float32)],
        compiler_params=pltpu.CompilerParams(dimension_semantics=("parallel",)),
    )(x, temb[:, None, :], colmask, gmat, gmat_t,
      p["norm1_g"][None], p["norm1_b"][None], p["conv1_w"], p["conv1_b"][None],
      p["temb_w"], p["temb_b"][None],
      p["norm2_g"][None], p["norm2_b"][None], p["conv2_w"], p["conv2_b"][None])


def transformer_forward(x, enc, p, gmat, gmat_t, *, groups, heads, dim_head):
    B, N, C = x.shape
    M, Dc = enc.shape[1], enc.shape[2]
    D8 = p["ff_w1"].shape[-1]
    D4 = p["ff_w2"].shape[0]
    G = groups
    vecC = pl.BlockSpec((1, C), lambda b: (0, 0))
    matCC = pl.BlockSpec((C, C), lambda b: (0, 0))
    kern = functools.partial(_transformer_kernel, heads=heads, dim_head=dim_head,
                             groups=groups, gn_eps=1e-6, ln_eps=1e-5)
    return pl.pallas_call(
        kern,
        out_shape=jax.ShapeDtypeStruct((B, N, C), x.dtype),
        grid=(B,),
        in_specs=[
            pl.BlockSpec((1, N, C), lambda b: (b, 0, 0)),        # x tokens
            pl.BlockSpec((1, M, Dc), lambda b: (b, 0, 0)),       # encoder states
            pl.BlockSpec((C, G), lambda b: (0, 0)),              # group pooling
            pl.BlockSpec((G, C), lambda b: (0, 0)),              # group pooling^T
            vecC, vecC,                                          # GN gamma/beta
            matCC, vecC,                                         # proj_in w/b
            vecC, vecC,                                          # ln1 gamma/beta
            matCC, matCC, matCC, matCC, vecC,                    # attn1 wq/wk/wv/wo/bo
            vecC, vecC,                                          # ln2 gamma/beta
            matCC,                                               # attn2 wq
            pl.BlockSpec((Dc, C), lambda b: (0, 0)),             # attn2 wk
            pl.BlockSpec((Dc, C), lambda b: (0, 0)),             # attn2 wv
            matCC, vecC,                                         # attn2 wo/bo
            vecC, vecC,                                          # ln3 gamma/beta
            pl.BlockSpec((C, D8), lambda b: (0, 0)),             # ff w1 (bf16)
            pl.BlockSpec((1, D8), lambda b: (0, 0)),             # ff b1
            pl.BlockSpec((D4, C), lambda b: (0, 0)),             # ff w2 (bf16)
            vecC,                                                # ff b2
            matCC, vecC,                                         # proj_out w/b
        ],
        out_specs=pl.BlockSpec((1, N, C), lambda b: (b, 0, 0)),
        scratch_shapes=[pltpu.VMEM((N, C), jnp.float32)],
        compiler_params=pltpu.CompilerParams(dimension_semantics=("parallel",)),
    )(x, enc, gmat, gmat_t,
      p["norm_g"][None], p["norm_b"][None],
      p["proj_in_w"], p["proj_in_b"][None],
      p["ln1_g"][None], p["ln1_b"][None],
      p["attn1"]["wq"], p["attn1"]["wk"], p["attn1"]["wv"], p["attn1"]["wo"],
      p["attn1"]["bo"][None],
      p["ln2_g"][None], p["ln2_b"][None],
      p["attn2"]["wq"], p["attn2"]["wk"], p["attn2"]["wv"], p["attn2"]["wo"],
      p["attn2"]["bo"][None],
      p["ln3_g"][None], p["ln3_b"][None],
      p["ff_w1"], p["ff_b1"][None], p["ff_w2"], p["ff_b2"][None],
      p["proj_out_w"], p["proj_out_b"][None])


# ----------------------------------------------------------------------------- module


def unet_mid_block_forward(params, x_nchw, temb, enc, *, H, W, groups, heads,
                           dim_head, resnet_eps=1e-6, compute_attention_debug=False):
    B, C = x_nchw.shape[0], x_nchw.shape[1]
    N = H * W
    # layout: NCHW -> channels-last tokens (B, H*W, C) once at the boundary.
    x = jnp.transpose(x_nchw, (0, 2, 3, 1)).reshape(B, N, C)
    gmat, gmat_t, colmask = _aux_arrays(C, groups, N, W)

    h = resnet_forward(x, temb, params["resnet0"], gmat, gmat_t, colmask,
                       H=H, W=W, groups=groups, eps=resnet_eps)

    # The reference evaluates attentions[0](h, enc) but (with refer_hs=None) that
    # result never feeds the returned hidden state, so it is skipped by default
    # (pure perf win) and kept behind a debug flag for testing.
    attn_dbg = None
    if compute_attention_debug:
        attn_dbg = transformer_forward(h, enc, params["attn0"], gmat, gmat_t,
                                       groups=groups, heads=heads, dim_head=dim_head)

    h = resnet_forward(h, temb, params["resnet1"], gmat, gmat_t, colmask,
                       H=H, W=W, groups=groups, eps=resnet_eps)

    out_nchw = jnp.transpose(h.reshape(B, H, W, C), (0, 3, 1, 2))
    output_refer_states = None   # refer_hs=None path of the reference
    return out_nchw, output_refer_states, attn_dbg


# ----------------------------------------------------------------------------- params


def _rand(key, shape, scale=0.05, dtype=jnp.float32):
    return (scale * jax.random.normal(key, shape, jnp.float32)).astype(dtype)


def _norm_params(key, c):
    k1, k2 = jax.random.split(key)
    return 1.0 + _rand(k1, (c,)), _rand(k2, (c,))


def make_resnet_params(key, c, tc):
    ks = jax.random.split(key, 8)
    bf16 = jnp.bfloat16
    n1g, n1b = _norm_params(ks[0], c)
    n2g, n2b = _norm_params(ks[1], c)
    # conv weights: (9, Cin, Cout), tap order t = ky*3 + kx (pad=1)
    return dict(norm1_g=n1g, norm1_b=n1b,
                conv1_w=_rand(ks[2], (9, c, c), dtype=bf16), conv1_b=_rand(ks[3], (c,)),
                temb_w=_rand(ks[4], (tc, c), dtype=bf16), temb_b=_rand(ks[5], (c,)),
                norm2_g=n2g, norm2_b=n2b,
                conv2_w=_rand(ks[6], (9, c, c), dtype=bf16), conv2_b=_rand(ks[7], (c,)))


def make_attn_params(key, qdim, kvdim):
    ks = jax.random.split(key, 5)
    bf16 = jnp.bfloat16
    return dict(wq=_rand(ks[0], (qdim, qdim), dtype=bf16),
                wk=_rand(ks[1], (kvdim, qdim), dtype=bf16),
                wv=_rand(ks[2], (kvdim, qdim), dtype=bf16),
                wo=_rand(ks[3], (qdim, qdim), dtype=bf16),
                bo=_rand(ks[4], (qdim,)))


def make_transformer_params(key, c, dc):
    ks = jax.random.split(key, 14)
    bf16 = jnp.bfloat16
    ng, nb = _norm_params(ks[0], c)
    l1g, l1b = _norm_params(ks[1], c)
    l2g, l2b = _norm_params(ks[2], c)
    l3g, l3b = _norm_params(ks[3], c)
    return dict(norm_g=ng, norm_b=nb,
                proj_in_w=_rand(ks[4], (c, c), dtype=bf16), proj_in_b=_rand(ks[5], (c,)),
                ln1_g=l1g, ln1_b=l1b, ln2_g=l2g, ln2_b=l2b, ln3_g=l3g, ln3_b=l3b,
                attn1=make_attn_params(ks[6], c, c),
                attn2=make_attn_params(ks[7], c, dc),
                ff_w1=_rand(ks[8], (c, 8 * c), dtype=bf16), ff_b1=_rand(ks[9], (8 * c,)),
                ff_w2=_rand(ks[10], (4 * c, c), dtype=bf16), ff_b2=_rand(ks[11], (c,)),
                proj_out_w=_rand(ks[12], (c, c), dtype=bf16),
                proj_out_b=_rand(ks[13], (c,)))


# ----------------------------------------------------------------------------- main


if __name__ == "__main__":
    B, C, H, W = 2, 32, 8, 8           # in_channels = 32
    TEMB = 32                          # temb_channels
    GROUPS = 8                         # resnet_groups
    HEADS = 4                          # attn_num_head_channels
    DIM_HEAD = C // HEADS
    M, DC = 8, 32                      # encoder seq len, cross_attention_dim

    root = jax.random.PRNGKey(0)
    kx, kt, ke, kp0, kp1, kp2 = jax.random.split(root, 6)

    params = dict(resnet0=make_resnet_params(kp0, C, TEMB),
                  attn0=make_transformer_params(kp1, C, DC),
                  resnet1=make_resnet_params(kp2, C, TEMB))

    x_nchw = jax.random.normal(kx, (B, C, H, W), jnp.float32)
    temb = jax.random.normal(kt, (B, TEMB), jnp.float32)
    enc = jax.random.normal(ke, (B, M, DC), jnp.float32)

    common = dict(H=H, W=W, groups=GROUPS, heads=HEADS, dim_head=DIM_HEAD,
                  resnet_eps=1e-6)
    fwd = jax.jit(functools.partial(unet_mid_block_forward,
                                    compute_attention_debug=False, **common))
    fwd_dbg = jax.jit(functools.partial(unet_mid_block_forward,
                                        compute_attention_debug=True, **common))

    out_nchw, refer_states, _ = fwd(params, x_nchw, temb, enc)
    out_dbg, _, attn_dbg = fwd_dbg(params, x_nchw, temb, enc)
    jax.block_until_ready((out_nchw, out_dbg, attn_dbg))

    assert out_nchw.shape == (B, C, H, W)
    assert refer_states is None                      # refer_hs=None -> None
    assert attn_dbg.shape == (B, H * W, C)
    assert bool(jnp.all(jnp.isfinite(out_nchw)))
    assert bool(jnp.all(jnp.isfinite(attn_dbg)))
    # The reference discards the attention output, so skipping it must not change
    # the returned hidden state.
    assert bool(jnp.allclose(out_nchw, out_dbg))
    print("KERNEL_OK")
</pallas_src>

<mosaic_0001>
module attributes {stable_mosaic.version = 11 : i64} {
  func.func @_resnet_kernel(%arg0: i32, %arg1: memref<1x64x32xf32, #tpu.memory_space<vmem>>, %arg2: memref<1x1x32xf32, #tpu.memory_space<vmem>>, %arg3: memref<64x2xf32, #tpu.memory_space<vmem>>, %arg4: memref<32x8xf32, #tpu.memory_space<vmem>>, %arg5: memref<8x32xf32, #tpu.memory_space<vmem>>, %arg6: memref<1x32xf32, #tpu.memory_space<vmem>>, %arg7: memref<1x32xf32, #tpu.memory_space<vmem>>, %arg8: memref<9x32x32xbf16, #tpu.memory_space<vmem>>, %arg9: memref<1x32xf32, #tpu.memory_space<vmem>>, %arg10: memref<32x32xbf16, #tpu.memory_space<vmem>>, %arg11: memref<1x32xf32, #tpu.memory_space<vmem>>, %arg12: memref<1x32xf32, #tpu.memory_space<vmem>>, %arg13: memref<1x32xf32, #tpu.memory_space<vmem>>, %arg14: memref<9x32x32xbf16, #tpu.memory_space<vmem>>, %arg15: memref<1x32xf32, #tpu.memory_space<vmem>>, %arg16: memref<1x64x32xf32, #tpu.memory_space<vmem>>, %arg17: memref<96x32xf32, #tpu.memory_space<vmem>>) attributes {dimension_semantics = [#tpu.dimension_semantics<parallel>], iteration_bounds = array<i64: 2>, scalar_prefetch = 0 : i64, scratch_operands = 1 : i64, tpu.core_type = #tpu.core_type<tc>, window_params = [{transform_indices = @transform_0, window_bounds = array<i64: 1, 64, 32>}, {transform_indices = @transform_1, window_bounds = array<i64: 1, 1, 32>}, {pipeline_mode = #tpu.pipeline_mode<synchronous>, transform_indices = @transform_2, window_bounds = array<i64: 64, 2>}, {pipeline_mode = #tpu.pipeline_mode<synchronous>, transform_indices = @transform_3, window_bounds = array<i64: 32, 8>}, {pipeline_mode = #tpu.pipeline_mode<synchronous>, transform_indices = @transform_4, window_bounds = array<i64: 8, 32>}, {pipeline_mode = #tpu.pipeline_mode<synchronous>, transform_indices = @transform_5, window_bounds = array<i64: 1, 32>}, {pipeline_mode = #tpu.pipeline_mode<synchronous>, transform_indices = @transform_6, window_bounds = array<i64: 1, 32>}, {pipeline_mode = #tpu.pipeline_mode<synchronous>, transform_indices = @transform_7, window_bounds = array<i64: 9, 32, 32>}, {pipeline_mode = #tpu.pipeline_mode<synchronous>, transform_indices = @transform_8, window_bounds = array<i64: 1, 32>}, {pipeline_mode = #tpu.pipeline_mode<synchronous>, transform_indices = @transform_9, window_bounds = array<i64: 32, 32>}, {pipeline_mode = #tpu.pipeline_mode<synchronous>, transform_indices = @transform_10, window_bounds = array<i64: 1, 32>}, {pipeline_mode = #tpu.pipeline_mode<synchronous>, transform_indices = @transform_11, window_bounds = array<i64: 1, 32>}, {pipeline_mode = #tpu.pipeline_mode<synchronous>, transform_indices = @transform_12, window_bounds = array<i64: 1, 32>}, {pipeline_mode = #tpu.pipeline_mode<synchronous>, transform_indices = @transform_13, window_bounds = array<i64: 9, 32, 32>}, {pipeline_mode = #tpu.pipeline_mode<synchronous>, transform_indices = @transform_14, window_bounds = array<i64: 1, 32>}, {transform_indices = @transform_15, window_bounds = array<i64: 1, 64, 32>}]} {
    %c0 = arith.constant 0 : index
    %c0_0 = arith.constant 0 : index
    %c0_1 = arith.constant 0 : index
    %0 = vector.load %arg1[%c0, %c0_0, %c0_1] : memref<1x64x32xf32, #tpu.memory_space<vmem>>, vector<1x64x32xf32>
    %1 = vector.shape_cast %0 : vector<1x64x32xf32> to vector<64x32xf32>
    %c0_2 = arith.constant 0 : index
    %c0_3 = arith.constant 0 : index
    %2 = vector.load %arg4[%c0_2, %c0_3] : memref<32x8xf32, #tpu.memory_space<vmem>>, vector<32x8xf32>
    %c0_4 = arith.constant 0 : index
    %c0_5 = arith.constant 0 : index
    %3 = vector.load %arg5[%c0_4, %c0_5] : memref<8x32xf32, #tpu.memory_space<vmem>>, vector<8x32xf32>
    %c0_6 = arith.constant 0 : index
    %c0_7 = arith.constant 0 : index
    %4 = vector.load %arg3[%c0_6, %c0_7] : memref<64x2xf32, #tpu.memory_space<vmem>>, vector<64x1xf32>
    %c0_8 = arith.constant 0 : index
    %c1 = arith.constant 1 : index
    %5 = vector.load %arg3[%c0_8, %c1] : memref<64x2xf32, #tpu.memory_space<vmem>>, vector<64x1xf32>
    %cst = arith.constant 0.000000e+00 : f32
    %6 = vector.broadcast %cst : f32 to vector<96x32xf32>
    %c0_9 = arith.constant 0 : index
    %c0_10 = arith.constant 0 : index
    %7 = vector.load %arg17[%c0_9, %c0_10] : memref<96x32xf32, #tpu.memory_space<vmem>>, vector<96x32xf32>
    tpu.vector_store %arg17[%c0_9, %c0_10], %6 {strides = array<i32>} : memref<96x32xf32, #tpu.memory_space<vmem>>, vector<96x32xf32>,
    %c0_11 = arith.constant 0 : index
    %c0_12 = arith.constant 0 : index
    %8 = vector.load %arg6[%c0_11, %c0_12] : memref<1x32xf32, #tpu.memory_space<vmem>>, vector<1x32xf32>
    %c0_13 = arith.constant 0 : index
    %c0_14 = arith.constant 0 : index
    %9 = vector.load %arg7[%c0_13, %c0_14] : memref<1x32xf32, #tpu.memory_space<vmem>>, vector<1x32xf32>
    %cst_15 = arith.constant dense<0.000000e+00> : vector<32xf32>
    %10 = vector.multi_reduction <add>, %1, %cst_15 [0] : vector<64x32xf32> to vector<32xf32>
    %11 = vector.shape_cast %10 : vector<32xf32> to vector<1x32xf32>
    %cst_16 = arith.constant dense<0.000000e+00> : vector<1x8xf32>
    %12 = tpu.matmul %11, %2, %cst_16 {dimension_numbers = #tpu.dot_dimension_numbers<[1], [0], [0], [1], [0, 0, 1, 1], [], []>} : vector<1x32xf32>, vector<32x8xf32>, vector<1x8xf32> -> vector<1x8xf32>
    %cst_17 = arith.constant 3.906250e-03 : f32
    %13 = vector.broadcast %cst_17 : f32 to vector<1x8xf32>
    %14 = arith.mulf %12, %13 : vector<1x8xf32>
    %cst_18 = arith.constant dense<0.000000e+00> : vector<1x32xf32>
    %15 = tpu.matmul %14, %3, %cst_18 {dimension_numbers = #tpu.dot_dimension_numbers<[1], [0], [0], [1], [0, 0, 1, 1], [], []>} : vector<1x8xf32>, vector<8x32xf32>, vector<1x32xf32> -> vector<1x32xf32>
    %16 = vector.broadcast %15 : vector<1x32xf32> to vector<64x32xf32>
    %17 = arith.subf %1, %16 : vector<64x32xf32>
    %18 = arith.mulf %17, %17 : vector<64x32xf32>
    %cst_19 = arith.constant dense<0.000000e+00> : vector<32xf32>
    %19 = vector.multi_reduction <add>, %18, %cst_19 [0] : vector<64x32xf32> to vector<32xf32>
    %20 = vector.shape_cast %19 : vector<32xf32> to vector<1x32xf32>
    %cst_20 = arith.constant dense<0.000000e+00> : vector<1x8xf32>
    %21 = tpu.matmul %20, %2, %cst_20 {dimension_numbers = #tpu.dot_dimension_numbers<[1], [0], [0], [1], [0, 0, 1, 1], [], []>} : vector<1x32xf32>, vector<32x8xf32>, vector<1x8xf32> -> vector<1x8xf32>
    %cst_21 = arith.constant 3.906250e-03 : f32
    %22 = vector.broadcast %cst_21 : f32 to vector<1x8xf32>
    %23 = arith.mulf %21, %22 : vector<1x8xf32>
    %cst_22 = arith.constant dense<0.000000e+00> : vector<1x32xf32>
    %24 = tpu.matmul %23, %3, %cst_22 {dimension_numbers = #tpu.dot_dimension_numbers<[1], [0], [0], [1], [0, 0, 1, 1], [], []>} : vector<1x8xf32>, vector<8x32xf32>, vector<1x32xf32> -> vector<1x32xf32>
    %cst_23 = arith.constant 9.99999997E-7 : f32
    %25 = vector.broadcast %cst_23 : f32 to vector<1x32xf32>
    %26 = arith.addf %24, %25 : vector<1x32xf32>
    %27 = math.rsqrt %26 : vector<1x32xf32>
    %28 = vector.broadcast %27 : vector<1x32xf32> to vector<64x32xf32>
    %29 = arith.mulf %17, %28 : vector<64x32xf32>
    %30 = vector.broadcast %8 : vector<1x32xf32> to vector<64x32xf32>
    %31 = arith.mulf %29, %30 : vector<64x32xf32>
    %32 = vector.broadcast %9 : vector<1x32xf32> to vector<64x32xf32>
    %33 = arith.addf %31, %32 : vector<64x32xf32>
    %34 = arith.negf %33 : vector<64x32xf32>
    %35 = math.exp %34 : vector<64x32xf32>
    %cst_24 = arith.constant 1.000000e+00 : f32
    %36 = vector.broadcast %cst_24 : f32 to vector<64x32xf32>
    %37 = arith.addf %36, %35 : vector<64x32xf32>
    %38 = arith.divf %36, %37 : vector<64x32xf32>
    %39 = arith.mulf %33, %38 : vector<64x32xf32>
    %c0_25 = arith.constant 0 : index
    %c0_26 = arith.constant 0 : index
    %40 = vector.load %arg9[%c0_25, %c0_26] : memref<1x32xf32, #tpu.memory_space<vmem>>, vector<1x32xf32>
    %c16 = arith.constant 16 : index
    %c0_27 = arith.constant 0 : index
    %41 = vector.load %arg17[%c16, %c0_27] : memref<96x32xf32, #tpu.memory_space<vmem>>, vector<64x32xf32>
    tpu.vector_store %arg17[%c16, %c0_27], %39 {strides = array<i32>} : memref<96x32xf32, #tpu.memory_space<vmem>>, vector<64x32xf32>,
    %cst_28 = arith.constant 0.000000e+00 : f32
    %42 = vector.broadcast %cst_28 : f32 to vector<64x32xf32>
    %c7 = arith.constant 7 : index
    %c0_29 = arith.constant 0 : index
    %43 = vector.load %arg17[%c7, %c0_29] : memref<96x32xf32, #tpu.memory_space<vmem>>, vector<64x32xf32>
    %44 = vector.broadcast %4 : vector<64x1xf32> to vector<64x32xf32>
    %45 = arith.mulf %43, %44 : vector<64x32xf32>
    %46 = arith.truncf %45 : vector<64x32xf32> to vector<64x32xbf16>
    %c0_30 = arith.constant 0 : index
    %c0_31 = arith.constant 0 : index
    %c0_32 = arith.constant 0 : index
    %47 = vector.load %arg8[%c0_30, %c0_31, %c0_32] : memref<9x32x32xbf16, #tpu.memory_space<vmem>>, vector<1x32x32xbf16>
    %48 = vector.shape_cast %47 : vector<1x32x32xbf16> to vector<32x32xbf16>
    %cst_33 = arith.constant dense<0.000000e+00> : vector<64x32xf32>
    %49 = tpu.matmul %46, %48, %cst_33 {dimension_numbers = #tpu.dot_dimension_numbers<[1], [0], [0], [1], [0, 0, 1, 1], [], []>} : vector<64x32xbf16>, vector<32x32xbf16>, vector<64x32xf32> -> vector<64x32xf32>
    %50 = arith.addf %42, %49 : vector<64x32xf32>
    %c8 = arith.constant 8 : index
    %c0_34 = arith.constant 0 : index
    %51 = vector.load %arg17[%c8, %c0_34] : memref<96x32xf32, #tpu.memory_space<vmem>>, vector<64x32xf32>
    %52 = arith.truncf %51 : vector<64x32xf32> to vector<64x32xbf16>
    %c1_35 = arith.constant 1 : index
    %c0_36 = arith.constant 0 : index
    %c0_37 = arith.constant 0 : index
    %53 = vector.load %arg8[%c1_35, %c0_36, %c0_37] : memref<9x32x32xbf16, #tpu.memory_space<vmem>>, vector<1x32x32xbf16>
    %54 = vector.shape_cast %53 : vector<1x32x32xbf16> to vector<32x32xbf16>
    %cst_38 = arith.constant dense<0.000000e+00> : vector<64x32xf32>
    %55 = tpu.matmul %52, %54, %cst_38 {dimension_numbers = #tpu.dot_dimension_numbers<[1], [0], [0], [1], [0, 0, 1, 1], [], []>} : vector<64x32xbf16>, vector<32x32xbf16>, vector<64x32xf32> -> vector<64x32xf32>
    %56 = arith.addf %50, %55 : vector<64x32xf32>
    %c9 = arith.constant 9 : index
    %c0_39 = arith.constant 0 : index
    %57 = vector.load %arg17[%c9, %c0_39] : memref<96x32xf32, #tpu.memory_space<vmem>>, vector<64x32xf32>
    %58 = vector.broadcast %5 : vector<64x1xf32> to vector<64x32xf32>
    %59 = arith.mulf %57, %58 : vector<64x32xf32>
    %60 = arith.truncf %59 : vector<64x32xf32> to vector<64x32xbf16>
    %c2 = arith.constant 2 : index
    %c0_40 = arith.constant 0 : index
    %c0_41 = arith.constant 0 : index
    %61 = vector.load %arg8[%c2, %c0_40, %c0_41] : memref<9x32x32xbf16, #tpu.memory_space<vmem>>, vector<1x32x32xbf16>
    %62 = vector.shape_cast %61 : vector<1x32x32xbf16> to vector<32x32xbf16>
    %cst_42 = arith.constant dense<0.000000e+00> : vector<64x32xf32>
    %63 = tpu.matmul %60, %62, %cst_42 {dimension_numbers = #tpu.dot_dimension_numbers<[1], [0], [0], [1], [0, 0, 1, 1], [], []>} : vector<64x32xbf16>, vector<32x32xbf16>, vector<64x32xf32> -> vector<64x32xf32>
    %64 = arith.addf %56, %63 : vector<64x32xf32>
    %c15 = arith.constant 15 : index
    %c0_43 = arith.constant 0 : index
    %65 = vector.load %arg17[%c15, %c0_43] : memref<96x32xf32, #tpu.memory_space<vmem>>, vector<64x32xf32>
    %66 = vector.broadcast %4 : vector<64x1xf32> to vector<64x32xf32>
    %67 = arith.mulf %65, %66 : vector<64x32xf32>
    %68 = arith.truncf %67 : vector<64x32xf32> to vector<64x32xbf16>
    %c3 = arith.constant 3 : index
    %c0_44 = arith.constant 0 : index
    %c0_45 = arith.constant 0 : index
    %69 = vector.load %arg8[%c3, %c0_44, %c0_45] : memref<9x32x32xbf16, #tpu.memory_space<vmem>>, vector<1x32x32xbf16>
    %70 = vector.shape_cast %69 : vector<1x32x32xbf16> to vector<32x32xbf16>
    %cst_46 = arith.constant dense<0.000000e+00> : vector<64x32xf32>
    %71 = tpu.matmul %68, %70, %cst_46 {dimension_numbers = #tpu.dot_dimension_numbers<[1], [0], [0], [1], [0, 0, 1, 1], [], []>} : vector<64x32xbf16>, vector<32x32xbf16>, vector<64x32xf32> -> vector<64x32xf32>
    %72 = arith.addf %64, %71 : vector<64x32xf32>
    %c16_47 = arith.constant 16 : index
    %c0_48 = arith.constant 0 : index
    %73 = vector.load %arg17[%c16_47, %c0_48] : memref<96x32xf32, #tpu.memory_space<vmem>>, vector<64x32xf32>
    %74 = arith.truncf %73 : vector<64x32xf32> to vector<64x32xbf16>
    %c4 = arith.constant 4 : index
    %c0_49 = arith.constant 0 : index
    %c0_50 = arith.constant 0 : index
    %75 = vector.load %arg8[%c4, %c0_49, %c0_50] : memref<9x32x32xbf16, #tpu.memory_space<vmem>>, vector<1x32x32xbf16>
    %76 = vector.shape_cast %75 : vector<1x32x32xbf16> to vector<32x32xbf16>
    %cst_51 = arith.constant dense<0.000000e+00> : vector<64x32xf32>
    %77 = tpu.matmul %74, %76, %cst_51 {dimension_numbers = #tpu.dot_dimension_numbers<[1], [0], [0], [1], [0, 0, 1, 1], [], []>} : vector<64x32xbf16>, vector<32x32xbf16>, vector<64x32xf32> -> vector<64x32xf32>
    %78 = arith.addf %72, %77 : vector<64x32xf32>
    %c17 = arith.constant 17 : index
    %c0_52 = arith.constant 0 : index
    %79 = vector.load %arg17[%c17, %c0_52] : memref<96x32xf32, #tpu.memory_space<vmem>>, vector<64x32xf32>
    %80 = vector.broadcast %5 : vector<64x1xf32> to vector<64x32xf32>
    %81 = arith.mulf %79, %80 : vector<64x32xf32>
    %82 = arith.truncf %81 : vector<64x32xf32> to vector<64x32xbf16>
    %c5 = arith.constant 5 : index
    %c0_53 = arith.constant 0 : index
    %c0_54 = arith.constant 0 : index
    %83 = vector.load %arg8[%c5, %c0_53, %c0_54] : memref<9x32x32xbf16, #tpu.memory_space<vmem>>, vector<1x32x32xbf16>
    %84 = vector.shape_cast %83 : vector<1x32x32xbf16> to vector<32x32xbf16>
    %cst_55 = arith.constant dense<0.000000e+00> : vector<64x32xf32>
    %85 = tpu.matmul %82, %84, %cst_55 {dimension_numbers = #tpu.dot_dimension_numbers<[1], [0], [0], [1], [0, 0, 1, 1], [], []>} : vector<64x32xbf16>, vector<32x32xbf16>, vector<64x32xf32> -> vector<64x32xf32>
    %86 = arith.addf %78, %85 : vector<64x32xf32>
    %c23 = arith.constant 23 : index
    %c0_56 = arith.constant 0 : index
    %87 = vector.load %arg17[%c23, %c0_56] : memref<96x32xf32, #tpu.memory_space<vmem>>, vector<64x32xf32>
    %88 = vector.broadcast %4 : vector<64x1xf32> to vector<64x32xf32>
    %89 = arith.mulf %87, %88 : vector<64x32xf32>
    %90 = arith.truncf %89 : vector<64x32xf32> to vector<64x32xbf16>
    %c6 = arith.constant 6 : index
    %c0_57 = arith.constant 0 : index
    %c0_58 = arith.constant 0 : index
    %91 = vector.load %arg8[%c6, %c0_57, %c0_58] : memref<9x32x32xbf16, #tpu.memory_space<vmem>>, vector<1x32x32xbf16>
    %92 = vector.shape_cast %91 : vector<1x32x32xbf16> to vector<32x32xbf16>
    %cst_59 = arith.constant dense<0.000000e+00> : vector<64x32xf32>
    %93 = tpu.matmul %90, %92, %cst_59 {dimension_numbers = #tpu.dot_dimension_numbers<[1], [0], [0], [1], [0, 0, 1, 1], [], []>} : vector<64x32xbf16>, vector<32x32xbf16>, vector<64x32xf32> -> vector<64x32xf32>
    %94 = arith.addf %86, %93 : vector<64x32xf32>
    %c24 = arith.constant 24 : index
    %c0_60 = arith.constant 0 : index
    %95 = vector.load %arg17[%c24, %c0_60] : memref<96x32xf32, #tpu.memory_space<vmem>>, vector<64x32xf32>
    %96 = arith.truncf %95 : vector<64x32xf32> to vector<64x32xbf16>
    %c7_61 = arith.constant 7 : index
    %c0_62 = arith.constant 0 : index
    %c0_63 = arith.constant 0 : index
    %97 = vector.load %arg8[%c7_61, %c0_62, %c0_63] : memref<9x32x32xbf16, #tpu.memory_space<vmem>>, vector<1x32x32xbf16>
    %98 = vector.shape_cast %97 : vector<1x32x32xbf16> to vector<32x32xbf16>
    %cst_64 = arith.constant dense<0.000000e+00> : vector<64x32xf32>
    %99 = tpu.matmul %96, %98, %cst_64 {dimension_numbers = #tpu.dot_dimension_numbers<[1], [0], [0], [1], [0, 0, 1, 1], [], []>} : vector<64x32xbf16>, vector<32x32xbf16>, vector<64x32xf32> -> vector<64x32xf32>
    %100 = arith.addf %94, %99 : vector<64x32xf32>
    %c25 = arith.constant 25 : index
    %c0_65 = arith.constant 0 : index
    %101 = vector.load %arg17[%c25, %c0_65] : memref<96x32xf32, #tpu.memory_space<vmem>>, vector<64x32xf32>
    %102 = vector.broadcast %5 : vector<64x1xf32> to vector<64x32xf32>
    %103 = arith.mulf %101, %102 : vector<64x32xf32>
    %104 = arith.truncf %103 : vector<64x32xf32> to vector<64x32xbf16>
    %c8_66 = arith.constant 8 : index
    %c0_67 = arith.constant 0 : index
    %c0_68 = arith.constant 0 : index
    %105 = vector.load %arg8[%c8_66, %c0_67, %c0_68] : memref<9x32x32xbf16, #tpu.memory_space<vmem>>, vector<1x32x32xbf16>
    %106 = vector.shape_cast %105 : vector<1x32x32xbf16> to vector<32x32xbf16>
    %cst_69 = arith.constant dense<0.000000e+00> : vector<64x32xf32>
    %107 = tpu.matmul %104, %106, %cst_69 {dimension_numbers = #tpu.dot_dimension_numbers<[1], [0], [0], [1], [0, 0, 1, 1], [], []>} : vector<64x32xbf16>, vector<32x32xbf16>, vector<64x32xf32> -> vector<64x32xf32>
    %108 = arith.addf %100, %107 : vector<64x32xf32>
    %109 = vector.broadcast %40 : vector<1x32xf32> to vector<64x32xf32>
    %110 = arith.addf %108, %109 : vector<64x32xf32>
    %c0_70 = arith.constant 0 : index
    %c0_71 = arith.constant 0 : index
    %c0_72 = arith.constant 0 : index
    %111 = vector.load %arg2[%c0_70, %c0_71, %c0_72] : memref<1x1x32xf32, #tpu.memory_space<vmem>>, vector<1x1x32xf32>
    %112 = vector.shape_cast %111 : vector<1x1x32xf32> to vector<1x32xf32>
    %113 = arith.negf %112 : vector<1x32xf32>
    %114 = math.exp %113 : vector<1x32xf32>
    %cst_73 = arith.constant 1.000000e+00 : f32
    %115 = vector.broadcast %cst_73 : f32 to vector<1x32xf32>
    %116 = arith.addf %115, %114 : vector<1x32xf32>
    %117 = arith.divf %115, %116 : vector<1x32xf32>
    %118 = arith.mulf %112, %117 : vector<1x32xf32>
    %119 = arith.truncf %118 : vector<1x32xf32> to vector<1x32xbf16>
    %c0_74 = arith.constant 0 : index
    %c0_75 = arith.constant 0 : index
    %120 = vector.load %arg10[%c0_74, %c0_75] : memref<32x32xbf16, #tpu.memory_space<vmem>>, vector<32x32xbf16>
    %cst_76 = arith.constant dense<0.000000e+00> : vector<1x32xf32>
    %121 = tpu.matmul %119, %120, %cst_76 {dimension_numbers = #tpu.dot_dimension_numbers<[1], [0], [0], [1], [0, 0, 1, 1], [], []>} : vector<1x32xbf16>, vector<32x32xbf16>, vector<1x32xf32> -> vector<1x32xf32>
    %c0_77 = arith.constant 0 : index
    %c0_78 = arith.constant 0 : index
    %122 = vector.load %arg11[%c0_77, %c0_78] : memref<1x32xf32, #tpu.memory_space<vmem>>, vector<1x32xf32>
    %123 = arith.addf %121, %122 : vector<1x32xf32>
    %124 = vector.broadcast %123 : vector<1x32xf32> to vector<64x32xf32>
    %125 = arith.addf %110, %124 : vector<64x32xf32>
    %c0_79 = arith.constant 0 : index
    %c0_80 = arith.constant 0 : index
    %126 = vector.load %arg12[%c0_79, %c0_80] : memref<1x32xf32, #tpu.memory_space<vmem>>, vector<1x32xf32>
    %c0_81 = arith.constant 0 : index
    %c0_82 = arith.constant 0 : index
    %127 = vector.load %arg13[%c0_81, %c0_82] : memref<1x32xf32, #tpu.memory_space<vmem>>, vector<1x32xf32>
    %cst_83 = arith.constant dense<0.000000e+00> : vector<32xf32>
    %128 = vector.multi_reduction <add>, %125, %cst_83 [0] : vector<64x32xf32> to vector<32xf32>
    %129 = vector.shape_cast %128 : vector<32xf32> to vector<1x32xf32>
    %cst_84 = arith.constant dense<0.000000e+00> : vector<1x8xf32>
    %130 = tpu.matmul %129, %2, %cst_84 {dimension_numbers = #tpu.dot_dimension_numbers<[1], [0], [0], [1], [0, 0, 1, 1], [], []>} : vector<1x32xf32>, vector<32x8xf32>, vector<1x8xf32> -> vector<1x8xf32>
    %cst_85 = arith.constant 3.906250e-03 : f32
    %131 = vector.broadcast %cst_85 : f32 to vector<1x8xf32>
    %132 = arith.mulf %130, %131 : vector<1x8xf32>
    %cst_86 = arith.constant dense<0.000000e+00> : vector<1x32xf32>
    %133 = tpu.matmul %132, %3, %cst_86 {dimension_numbers = #tpu.dot_dimension_numbers<[1], [0], [0], [1], [0, 0, 1, 1], [], []>} : vector<1x8xf32>, vector<8x32xf32>, vector<1x32xf32> -> vector<1x32xf32>
    %134 = vector.broadcast %133 : vector<1x32xf32> to vector<64x32xf32>
    %135 = arith.subf %125, %134 : vector<64x32xf32>
    %136 = arith.mulf %135, %135 : vector<64x32xf32>
    %cst_87 = arith.constant dense<0.000000e+00> : vector<32xf32>
    %137 = vector.multi_reduction <add>, %136, %cst_87 [0] : vector<64x32xf32> to vector<32xf32>
    %138 = vector.shape_cast %137 : vector<32xf32> to vector<1x32xf32>
    %cst_88 = arith.constant dense<0.000000e+00> : vector<1x8xf32>
    %139 = tpu.matmul %138, %2, %cst_88 {dimension_numbers = #tpu.dot_dimension_numbers<[1], [0], [0], [1], [0, 0, 1, 1], [], []>} : vector<1x32xf32>, vector<32x8xf32>, vector<1x8xf32> -> vector<1x8xf32>
    %cst_89 = arith.constant 3.906250e-03 : f32
    %140 = vector.broadcast %cst_89 : f32 to vector<1x8xf32>
    %141 = arith.mulf %139, %140 : vector<1x8xf32>
    %cst_90 = arith.constant dense<0.000000e+00> : vector<1x32xf32>
    %142 = tpu.matmul %141, %3, %cst_90 {dimension_numbers = #tpu.dot_dimension_numbers<[1], [0], [0], [1], [0, 0, 1, 1], [], []>} : vector<1x8xf32>, vector<8x32xf32>, vector<1x32xf32> -> vector<1x32xf32>
    %cst_91 = arith.constant 9.99999997E-7 : f32
    %143 = vector.broadcast %cst_91 : f32 to vector<1x32xf32>
    %144 = arith.addf %142, %143 : vector<1x32xf32>
    %145 = math.rsqrt %144 : vector<1x32xf32>
    %146 = vector.broadcast %145 : vector<1x32xf32> to vector<64x32xf32>
    %147 = arith.mulf %135, %146 : vector<64x32xf32>
    %148 = vector.broadcast %126 : vector<1x32xf32> to vector<64x32xf32>
    %149 = arith.mulf %147, %148 : vector<64x32xf32>
    %150 = vector.broadcast %127 : vector<1x32xf32> to vector<64x32xf32>
    %151 = arith.addf %149, %150 : vector<64x32xf32>
    %152 = arith.negf %151 : vector<64x32xf32>
    %153 = math.exp %152 : vector<64x32xf32>
    %cst_92 = arith.constant 1.000000e+00 : f32
    %154 = vector.broadcast %cst_92 : f32 to vector<64x32xf32>
    %155 = arith.addf %154, %153 : vector<64x32xf32>
    %156 = arith.divf %154, %155 : vector<64x32xf32>
    %157 = arith.mulf %151, %156 : vector<64x32xf32>
    %c0_93 = arith.constant 0 : index
    %c0_94 = arith.constant 0 : index
    %158 = vector.load %arg15[%c0_93, %c0_94] : memref<1x32xf32, #tpu.memory_space<vmem>>, vector<1x32xf32>
    %c16_95 = arith.constant 16 : index
    %c0_96 = arith.constant 0 : index
    %159 = vector.load %arg17[%c16_95, %c0_96] : memref<96x32xf32, #tpu.memory_space<vmem>>, vector<64x32xf32>
    tpu.vector_store %arg17[%c16_95, %c0_96], %157 {strides = array<i32>} : memref<96x32xf32, #tpu.memory_space<vmem>>, vector<64x32xf32>,
    %cst_97 = arith.constant 0.000000e+00 : f32
    %160 = vector.broadcast %cst_97 : f32 to vector<64x32xf32>
    %c7_98 = arith.constant 7 : index
    %c0_99 = arith.constant 0 : index
    %161 = vector.load %arg17[%c7_98, %c0_99] : memref<96x32xf32, #tpu.memory_space<vmem>>, vector<64x32xf32>
    %162 = vector.broadcast %4 : vector<64x1xf32> to vector<64x32xf32>
    %163 = arith.mulf %161, %162 : vector<64x32xf32>
    %164 = arith.truncf %163 : vector<64x32xf32> to vector<64x32xbf16>
    %c0_100 = arith.constant 0 : index
    %c0_101 = arith.constant 0 : index
    %c0_102 = arith.constant 0 : index
    %165 = vector.load %arg14[%c0_100, %c0_101, %c0_102] : memref<9x32x32xbf16, #tpu.memory_space<vmem>>, vector<1x32x32xbf16>
    %166 = vector.shape_cast %165 : vector<1x32x32xbf16> to vector<32x32xbf16>
    %cst_103 = arith.constant dense<0.000000e+00> : vector<64x32xf32>
    %167 = tpu.matmul %164, %166, %cst_103 {dimension_numbers = #tpu.dot_dimension_numbers<[1], [0], [0], [1], [0, 0, 1, 1], [], []>} : vector<64x32xbf16>, vector<32x32xbf16>, vector<64x32xf32> -> vector<64x32xf32>
    %168 = arith.addf %160, %167 : vector<64x32xf32>
    %c8_104 = arith.constant 8 : index
    %c0_105 = arith.constant 0 : index
    %169 = vector.load %arg17[%c8_104, %c0_105] : memref<96x32xf32, #tpu.memory_space<vmem>>, vector<64x32xf32>
    %170 = arith.truncf %169 : vector<64x32xf32> to vector<64x32xbf16>
    %c1_106 = arith.constant 1 : index
    %c0_107 = arith.constant 0 : index
    %c0_108 = arith.constant 0 : index
    %171 = vector.load %arg14[%c1_106, %c0_107, %c0_108] : memref<9x32x32xbf16, #tpu.memory_space<vmem>>, vector<1x32x32xbf16>
    %172 = vector.shape_cast %171 : vector<1x32x32xbf16> to vector<32x32xbf16>
    %cst_109 = arith.constant dense<0.000000e+00> : vector<64x32xf32>
    %173 = tpu.matmul %170, %172, %cst_109 {dimension_numbers = #tpu.dot_dimension_numbers<[1], [0], [0], [1], [0, 0, 1, 1], [], []>} : vector<64x32xbf16>, vector<32x32xbf16>, vector<64x32xf32> -> vector<64x32xf32>
    %174 = arith.addf %168, %173 : vector<64x32xf32>
    %c9_110 = arith.constant 9 : index
    %c0_111 = arith.constant 0 : index
    %175 = vector.load %arg17[%c9_110, %c0_111] : memref<96x32xf32, #tpu.memory_space<vmem>>, vector<64x32xf32>
    %176 = vector.broadcast %5 : vector<64x1xf32> to vector<64x32xf32>
    %177 = arith.mulf %175, %176 : vector<64x32xf32>
    %178 = arith.truncf %177 : vector<64x32xf32> to vector<64x32xbf16>
    %c2_112 = arith.constant 2 : index
    %c0_113 = arith.constant 0 : index
    %c0_114 = arith.constant 0 : index
    %179 = vector.load %arg14[%c2_112, %c0_113, %c0_114] : memref<9x32x32xbf16, #tpu.memory_space<vmem>>, vector<1x32x32xbf16>
    %180 = vector.shape_cast %179 : vector<1x32x32xbf16> to vector<32x32xbf16>
    %cst_115 = arith.constant dense<0.000000e+00> : vector<64x32xf32>
    %181 = tpu.matmul %178, %180, %cst_115 {dimension_numbers = #tpu.dot_dimension_numbers<[1], [0], [0], [1], [0, 0, 1, 1], [], []>} : vector<64x32xbf16>, vector<32x32xbf16>, vector<64x32xf32> -> vector<64x32xf32>
    %182 = arith.addf %174, %181 : vector<64x32xf32>
    %c15_116 = arith.constant 15 : index
    %c0_117 = arith.constant 0 : index
    %183 = vector.load %arg17[%c15_116, %c0_117] : memref<96x32xf32, #tpu.memory_space<vmem>>, vector<64x32xf32>
    %184 = vector.broadcast %4 : vector<64x1xf32> to vector<64x32xf32>
    %185 = arith.mulf %183, %184 : vector<64x32xf32>
    %186 = arith.truncf %185 : vector<64x32xf32> to vector<64x32xbf16>
    %c3_118 = arith.constant 3 : index
    %c0_119 = arith.constant 0 : index
    %c0_120 = arith.constant 0 : index
    %187 = vector.load %arg14[%c3_118, %c0_119, %c0_120] : memref<9x32x32xbf16, #tpu.memory_space<vmem>>, vector<1x32x32xbf16>
    %188 = vector.shape_cast %187 : vector<1x32x32xbf16> to vector<32x32xbf16>
    %cst_121 = arith.constant dense<0.000000e+00> : vector<64x32xf32>
    %189 = tpu.matmul %186, %188, %cst_121 {dimension_numbers = #tpu.dot_dimension_numbers<[1], [0], [0], [1], [0, 0, 1, 1], [], []>} : vector<64x32xbf16>, vector<32x32xbf16>, vector<64x32xf32> -> vector<64x32xf32>
    %190 = arith.addf %182, %189 : vector<64x32xf32>
    %c16_122 = arith.constant 16 : index
    %c0_123 = arith.constant 0 : index
    %191 = vector.load %arg17[%c16_122, %c0_123] : memref<96x32xf32, #tpu.memory_space<vmem>>, vector<64x32xf32>
    %192 = arith.truncf %191 : vector<64x32xf32> to vector<64x32xbf16>
    %c4_124 = arith.constant 4 : index
    %c0_125 = arith.constant 0 : index
    %c0_126 = arith.constant 0 : index
    %193 = vector.load %arg14[%c4_124, %c0_125, %c0_126] : memref<9x32x32xbf16, #tpu.memory_space<vmem>>, vector<1x32x32xbf16>
    %194 = vector.shape_cast %193 : vector<1x32x32xbf16> to vector<32x32xbf16>
    %cst_127 = arith.constant dense<0.000000e+00> : vector<64x32xf32>
    %195 = tpu.matmul %192, %194, %cst_127 {dimension_numbers = #tpu.dot_dimension_numbers<[1], [0], [0], [1], [0, 0, 1, 1], [], []>} : vector<64x32xbf16>, vector<32x32xbf16>, vector<64x32xf32> -> vector<64x32xf32>
    %196 = arith.addf %190, %195 : vector<64x32xf32>
    %c17_128 = arith.constant 17 : index
    %c0_129 = arith.constant 0 : index
    %197 = vector.load %arg17[%c17_128, %c0_129] : memref<96x32xf32, #tpu.memory_space<vmem>>, vector<64x32xf32>
    %198 = vector.broadcast %5 : vector<64x1xf32> to vector<64x32xf32>
    %199 = arith.mulf %197, %198 : vector<64x32xf32>
    %200 = arith.truncf %199 : vector<64x32xf32> to vector<64x32xbf16>
    %c5_130 = arith.constant 5 : index
    %c0_131 = arith.constant 0 : index
    %c0_132 = arith.constant 0 : index
    %201 = vector.load %arg14[%c5_130, %c0_131, %c0_132] : memref<9x32x32xbf16, #tpu.memory_space<vmem>>, vector<1x32x32xbf16>
    %202 = vector.shape_cast %201 : vector<1x32x32xbf16> to vector<32x32xbf16>
    %cst_133 = arith.constant dense<0.000000e+00> : vector<64x32xf32>
    %203 = tpu.matmul %200, %202, %cst_133 {dimension_numbers = #tpu.dot_dimension_numbers<[1], [0], [0], [1], [0, 0, 1, 1], [], []>} : vector<64x32xbf16>, vector<32x32xbf16>, vector<64x32xf32> -> vector<64x32xf32>
    %204 = arith.addf %196, %203 : vector<64x32xf32>
    %c23_134 = arith.constant 23 : index
    %c0_135 = arith.constant 0 : index
    %205 = vector.load %arg17[%c23_134, %c0_135] : memref<96x32xf32, #tpu.memory_space<vmem>>, vector<64x32xf32>
    %206 = vector.broadcast %4 : vector<64x1xf32> to vector<64x32xf32>
    %207 = arith.mulf %205, %206 : vector<64x32xf32>
    %208 = arith.truncf %207 : vector<64x32xf32> to vector<64x32xbf16>
    %c6_136 = arith.constant 6 : index
    %c0_137 = arith.constant 0 : index
    %c0_138 = arith.constant 0 : index
    %209 = vector.load %arg14[%c6_136, %c0_137, %c0_138] : memref<9x32x32xbf16, #tpu.memory_space<vmem>>, vector<1x32x32xbf16>
    %210 = vector.shape_cast %209 : vector<1x32x32xbf16> to vector<32x32xbf16>
    %cst_139 = arith.constant dense<0.000000e+00> : vector<64x32xf32>
    %211 = tpu.matmul %208, %210, %cst_139 {dimension_numbers = #tpu.dot_dimension_numbers<[1], [0], [0], [1], [0, 0, 1, 1], [], []>} : vector<64x32xbf16>, vector<32x32xbf16>, vector<64x32xf32> -> vector<64x32xf32>
    %212 = arith.addf %204, %211 : vector<64x32xf32>
    %c24_140 = arith.constant 24 : index
    %c0_141 = arith.constant 0 : index
    %213 = vector.load %arg17[%c24_140, %c0_141] : memref<96x32xf32, #tpu.memory_space<vmem>>, vector<64x32xf32>
    %214 = arith.truncf %213 : vector<64x32xf32> to vector<64x32xbf16>
    %c7_142 = arith.constant 7 : index
    %c0_143 = arith.constant 0 : index
    %c0_144 = arith.constant 0 : index
    %215 = vector.load %arg14[%c7_142, %c0_143, %c0_144] : memref<9x32x32xbf16, #tpu.memory_space<vmem>>, vector<1x32x32xbf16>
    %216 = vector.shape_cast %215 : vector<1x32x32xbf16> to vector<32x32xbf16>
    %cst_145 = arith.constant dense<0.000000e+00> : vector<64x32xf32>
    %217 = tpu.matmul %214, %216, %cst_145 {dimension_numbers = #tpu.dot_dimension_numbers<[1], [0], [0], [1], [0, 0, 1, 1], [], []>} : vector<64x32xbf16>, vector<32x32xbf16>, vector<64x32xf32> -> vector<64x32xf32>
    %218 = arith.addf %212, %217 : vector<64x32xf32>
    %c25_146 = arith.constant 25 : index
    %c0_147 = arith.constant 0 : index
    %219 = vector.load %arg17[%c25_146, %c0_147] : memref<96x32xf32, #tpu.memory_space<vmem>>, vector<64x32xf32>
    %220 = vector.broadcast %5 : vector<64x1xf32> to vector<64x32xf32>
    %221 = arith.mulf %219, %220 : vector<64x32xf32>
    %222 = arith.truncf %221 : vector<64x32xf32> to vector<64x32xbf16>
    %c8_148 = arith.constant 8 : index
    %c0_149 = arith.constant 0 : index
    %c0_150 = arith.constant 0 : index
    %223 = vector.load %arg14[%c8_148, %c0_149, %c0_150] : memref<9x32x32xbf16, #tpu.memory_space<vmem>>, vector<1x32x32xbf16>
    %224 = vector.shape_cast %223 : vector<1x32x32xbf16> to vector<32x32xbf16>
    %cst_151 = arith.constant dense<0.000000e+00> : vector<64x32xf32>
    %225 = tpu.matmul %222, %224, %cst_151 {dimension_numbers = #tpu.dot_dimension_numbers<[1], [0], [0], [1], [0, 0, 1, 1], [], []>} : vector<64x32xbf16>, vector<32x32xbf16>, vector<64x32xf32> -> vector<64x32xf32>
    %226 = arith.addf %218, %225 : vector<64x32xf32>
    %227 = vector.broadcast %158 : vector<1x32xf32> to vector<64x32xf32>
    %228 = arith.addf %226, %227 : vector<64x32xf32>
    %229 = arith.addf %1, %228 : vector<64x32xf32>
    %230 = vector.shape_cast %229 : vector<64x32xf32> to vector<1x64x32xf32>
    %c0_152 = arith.constant 0 : index
    %c0_153 = arith.constant 0 : index
    %c0_154 = arith.constant 0 : index
    %231 = vector.load %arg16[%c0_152, %c0_153, %c0_154] : memref<1x64x32xf32, #tpu.memory_space<vmem>>, vector<1x64x32xf32>
    tpu.vector_store %arg16[%c0_152, %c0_153, %c0_154], %230 {strides = array<i32>} : memref<1x64x32xf32, #tpu.memory_space<vmem>>, vector<1x64x32xf32>,
    return
  }
  func.func @transform_0(%arg0: i32) -> (i32, i32, i32) {
    %c0_i32 = arith.constant 0 : i32
    %c0_i32_0 = arith.constant 0 : i32
    %c0_i32_1 = arith.constant 0 : i32
    return %arg0, %c0_i32, %c0_i32_0 : i32, i32, i32
  }
  func.func @transform_1(%arg0: i32) -> (i32, i32, i32) {
    %c0_i32 = arith.constant 0 : i32
    %c0_i32_0 = arith.constant 0 : i32
    %c0_i32_1 = arith.constant 0 : i32
    return %arg0, %c0_i32, %c0_i32_0 : i32, i32, i32
  }
  func.func @transform_2(%arg0: i32) -> (i32, i32) {
    %c0_i32 = arith.constant 0 : i32
    %c0_i32_0 = arith.constant 0 : i32
    %c0_i32_1 = arith.constant 0 : i32
    return %c0_i32, %c0_i32_0 : i32, i32
  }
  func.func @transform_3(%arg0: i32) -> (i32, i32) {
    %c0_i32 = arith.constant 0 : i32
    %c0_i32_0 = arith.constant 0 : i32
    %c0_i32_1 = arith.constant 0 : i32
    return %c0_i32, %c0_i32_0 : i32, i32
  }
  func.func @transform_4(%arg0: i32) -> (i32, i32) {
    %c0_i32 = arith.constant 0 : i32
    %c0_i32_0 = arith.constant 0 : i32
    %c0_i32_1 = arith.constant 0 : i32
    return %c0_i32, %c0_i32_0 : i32, i32
  }
  func.func @transform_5(%arg0: i32) -> (i32, i32) {
    %c0_i32 = arith.constant 0 : i32
    %c0_i32_0 = arith.constant 0 : i32
    %c0_i32_1 = arith.constant 0 : i32
    return %c0_i32, %c0_i32_0 : i32, i32
  }
  func.func @transform_6(%arg0: i32) -> (i32, i32) {
    %c0_i32 = arith.constant 0 : i32
    %c0_i32_0 = arith.constant 0 : i32
    %c0_i32_1 = arith.constant 0 : i32
    return %c0_i32, %c0_i32_0 : i32, i32
  }
  func.func @transform_7(%arg0: i32) -> (i32, i32, i32) {
    %c0_i32 = arith.constant 0 : i32
    %c0_i32_0 = arith.constant 0 : i32
    %c0_i32_1 = arith.constant 0 : i32
    %c0_i32_2 = arith.constant 0 : i32
    return %c0_i32, %c0_i32_0, %c0_i32_1 : i32, i32, i32
  }
  func.func @transform_8(%arg0: i32) -> (i32, i32) {
    %c0_i32 = arith.constant 0 : i32
    %c0_i32_0 = arith.constant 0 : i32
    %c0_i32_1 = arith.constant 0 : i32
    return %c0_i32, %c0_i32_0 : i32, i32
  }
  func.func @transform_9(%arg0: i32) -> (i32, i32) {
    %c0_i32 = arith.constant 0 : i32
    %c0_i32_0 = arith.constant 0 : i32
    %c0_i32_1 = arith.constant 0 : i32
    return %c0_i32, %c0_i32_0 : i32, i32
  }
  func.func @transform_10(%arg0: i32) -> (i32, i32) {
    %c0_i32 = arith.constant 0 : i32
    %c0_i32_0 = arith.constant 0 : i32
    %c0_i32_1 = arith.constant 0 : i32
    return %c0_i32, %c0_i32_0 : i32, i32
  }
  func.func @transform_11(%arg0: i32) -> (i32, i32) {
    %c0_i32 = arith.constant 0 : i32
    %c0_i32_0 = arith.constant 0 : i32
    %c0_i32_1 = arith.constant 0 : i32
    return %c0_i32, %c0_i32_0 : i32, i32
  }
  func.func @transform_12(%arg0: i32) -> (i32, i32) {
    %c0_i32 = arith.constant 0 : i32
    %c0_i32_0 = arith.constant 0 : i32
    %c0_i32_1 = arith.constant 0 : i32
    return %c0_i32, %c0_i32_0 : i32, i32
  }
  func.func @transform_13(%arg0: i32) -> (i32, i32, i32) {
    %c0_i32 = arith.constant 0 : i32
    %c0_i32_0 = arith.constant 0 : i32
    %c0_i32_1 = arith.constant 0 : i32
    %c0_i32_2 = arith.constant 0 : i32
    return %c0_i32, %c0_i32_0, %c0_i32_1 : i32, i32, i32
  }
  func.func @transform_14(%arg0: i32) -> (i32, i32) {
    %c0_i32 = arith.constant 0 : i32
    %c0_i32_0 = arith.constant 0 : i32
    %c0_i32_1 = arith.constant 0 : i32
    return %c0_i32, %c0_i32_0 : i32, i32
  }
  func.func @transform_15(%arg0: i32) -> (i32, i32, i32) {
    %c0_i32 = arith.constant 0 : i32
    %c0_i32_0 = arith.constant 0 : i32
    %c0_i32_1 = arith.constant 0 : i32
    return %arg0, %c0_i32, %c0_i32_0 : i32, i32, i32
  }
}

module attributes {stable_mosaic.version = 11 : i64} {
  func.func @_resnet_kernel(%arg0: i32, %arg1: memref<1x64x32xf32, #tpu.memory_space<vmem>>, %arg2: memref<1x1x32xf32, #tpu.memory_space<vmem>>, %arg3: memref<64x2xf32, #tpu.memory_space<vmem>>, %arg4: memref<32x8xf32, #tpu.memory_space<vmem>>, %arg5: memref<8x32xf32, #tpu.memory_space<vmem>>, %arg6: memref<1x32xf32, #tpu.memory_space<vmem>>, %arg7: memref<1x32xf32, #tpu.memory_space<vmem>>, %arg8: memref<9x32x32xbf16, #tpu.memory_space<vmem>>, %arg9: memref<1x32xf32, #tpu.memory_space<vmem>>, %arg10: memref<32x32xbf16, #tpu.memory_space<vmem>>, %arg11: memref<1x32xf32, #tpu.memory_space<vmem>>, %arg12: memref<1x32xf32, #tpu.memory_space<vmem>>, %arg13: memref<1x32xf32, #tpu.memory_space<vmem>>, %arg14: memref<9x32x32xbf16, #tpu.memory_space<vmem>>, %arg15: memref<1x32xf32, #tpu.memory_space<vmem>>, %arg16: memref<1x64x32xf32, #tpu.memory_space<vmem>>, %arg17: memref<96x32xf32, #tpu.memory_space<vmem>>) attributes {dimension_semantics = [#tpu.dimension_semantics<parallel>], iteration_bounds = array<i64: 2>, scalar_prefetch = 0 : i64, scratch_operands = 1 : i64, tpu.core_type = #tpu.core_type<tc>, window_params = [{transform_indices = @transform_0, window_bounds = array<i64: 1, 64, 32>}, {transform_indices = @transform_1, window_bounds = array<i64: 1, 1, 32>}, {pipeline_mode = #tpu.pipeline_mode<synchronous>, transform_indices = @transform_2, window_bounds = array<i64: 64, 2>}, {pipeline_mode = #tpu.pipeline_mode<synchronous>, transform_indices = @transform_3, window_bounds = array<i64: 32, 8>}, {pipeline_mode = #tpu.pipeline_mode<synchronous>, transform_indices = @transform_4, window_bounds = array<i64: 8, 32>}, {pipeline_mode = #tpu.pipeline_mode<synchronous>, transform_indices = @transform_5, window_bounds = array<i64: 1, 32>}, {pipeline_mode = #tpu.pipeline_mode<synchronous>, transform_indices = @transform_6, window_bounds = array<i64: 1, 32>}, {pipeline_mode = #tpu.pipeline_mode<synchronous>, transform_indices = @transform_7, window_bounds = array<i64: 9, 32, 32>}, {pipeline_mode = #tpu.pipeline_mode<synchronous>, transform_indices = @transform_8, window_bounds = array<i64: 1, 32>}, {pipeline_mode = #tpu.pipeline_mode<synchronous>, transform_indices = @transform_9, window_bounds = array<i64: 32, 32>}, {pipeline_mode = #tpu.pipeline_mode<synchronous>, transform_indices = @transform_10, window_bounds = array<i64: 1, 32>}, {pipeline_mode = #tpu.pipeline_mode<synchronous>, transform_indices = @transform_11, window_bounds = array<i64: 1, 32>}, {pipeline_mode = #tpu.pipeline_mode<synchronous>, transform_indices = @transform_12, window_bounds = array<i64: 1, 32>}, {pipeline_mode = #tpu.pipeline_mode<synchronous>, transform_indices = @transform_13, window_bounds = array<i64: 9, 32, 32>}, {pipeline_mode = #tpu.pipeline_mode<synchronous>, transform_indices = @transform_14, window_bounds = array<i64: 1, 32>}, {transform_indices = @transform_15, window_bounds = array<i64: 1, 64, 32>}]} {
    %c0 = arith.constant 0 : index
    %c0_0 = arith.constant 0 : index
    %c0_1 = arith.constant 0 : index
    %0 = vector.load %arg1[%c0, %c0_0, %c0_1] : memref<1x64x32xf32, #tpu.memory_space<vmem>>, vector<1x64x32xf32>
    %1 = vector.shape_cast %0 : vector<1x64x32xf32> to vector<64x32xf32>
    %c0_2 = arith.constant 0 : index
    %c0_3 = arith.constant 0 : index
    %2 = vector.load %arg4[%c0_2, %c0_3] : memref<32x8xf32, #tpu.memory_space<vmem>>, vector<32x8xf32>
    %c0_4 = arith.constant 0 : index
    %c0_5 = arith.constant 0 : index
    %3 = vector.load %arg5[%c0_4, %c0_5] : memref<8x32xf32, #tpu.memory_space<vmem>>, vector<8x32xf32>
    %c0_6 = arith.constant 0 : index
    %c0_7 = arith.constant 0 : index
    %4 = vector.load %arg3[%c0_6, %c0_7] : memref<64x2xf32, #tpu.memory_space<vmem>>, vector<64x1xf32>
    %c0_8 = arith.constant 0 : index
    %c1 = arith.constant 1 : index
    %5 = vector.load %arg3[%c0_8, %c1] : memref<64x2xf32, #tpu.memory_space<vmem>>, vector<64x1xf32>
    %cst = arith.constant 0.000000e+00 : f32
    %6 = vector.broadcast %cst : f32 to vector<96x32xf32>
    %c0_9 = arith.constant 0 : index
    %c0_10 = arith.constant 0 : index
    %7 = vector.load %arg17[%c0_9, %c0_10] : memref<96x32xf32, #tpu.memory_space<vmem>>, vector<96x32xf32>
    tpu.vector_store %arg17[%c0_9, %c0_10], %6 {strides = array<i32>} : memref<96x32xf32, #tpu.memory_space<vmem>>, vector<96x32xf32>,
    %c0_11 = arith.constant 0 : index
    %c0_12 = arith.constant 0 : index
    %8 = vector.load %arg6[%c0_11, %c0_12] : memref<1x32xf32, #tpu.memory_space<vmem>>, vector<1x32xf32>
    %c0_13 = arith.constant 0 : index
    %c0_14 = arith.constant 0 : index
    %9 = vector.load %arg7[%c0_13, %c0_14] : memref<1x32xf32, #tpu.memory_space<vmem>>, vector<1x32xf32>
    %cst_15 = arith.constant dense<0.000000e+00> : vector<32xf32>
    %10 = vector.multi_reduction <add>, %1, %cst_15 [0] : vector<64x32xf32> to vector<32xf32>
    %11 = vector.shape_cast %10 : vector<32xf32> to vector<1x32xf32>
    %cst_16 = arith.constant dense<0.000000e+00> : vector<1x8xf32>
    %12 = tpu.matmul %11, %2, %cst_16 {dimension_numbers = #tpu.dot_dimension_numbers<[1], [0], [0], [1], [0, 0, 1, 1], [], []>} : vector<1x32xf32>, vector<32x8xf32>, vector<1x8xf32> -> vector<1x8xf32>
    %cst_17 = arith.constant 3.906250e-03 : f32
    %13 = vector.broadcast %cst_17 : f32 to vector<1x8xf32>
    %14 = arith.mulf %12, %13 : vector<1x8xf32>
    %cst_18 = arith.constant dense<0.000000e+00> : vector<1x32xf32>
    %15 = tpu.matmul %14, %3, %cst_18 {dimension_numbers = #tpu.dot_dimension_numbers<[1], [0], [0], [1], [0, 0, 1, 1], [], []>} : vector<1x8xf32>, vector<8x32xf32>, vector<1x32xf32> -> vector<1x32xf32>
    %16 = vector.broadcast %15 : vector<1x32xf32> to vector<64x32xf32>
    %17 = arith.subf %1, %16 : vector<64x32xf32>
    %18 = arith.mulf %17, %17 : vector<64x32xf32>
    %cst_19 = arith.constant dense<0.000000e+00> : vector<32xf32>
    %19 = vector.multi_reduction <add>, %18, %cst_19 [0] : vector<64x32xf32> to vector<32xf32>
    %20 = vector.shape_cast %19 : vector<32xf32> to vector<1x32xf32>
    %cst_20 = arith.constant dense<0.000000e+00> : vector<1x8xf32>
    %21 = tpu.matmul %20, %2, %cst_20 {dimension_numbers = #tpu.dot_dimension_numbers<[1], [0], [0], [1], [0, 0, 1, 1], [], []>} : vector<1x32xf32>, vector<32x8xf32>, vector<1x8xf32> -> vector<1x8xf32>
    %cst_21 = arith.constant 3.906250e-03 : f32
    %22 = vector.broadcast %cst_21 : f32 to vector<1x8xf32>
    %23 = arith.mulf %21, %22 : vector<1x8xf32>
    %cst_22 = arith.constant dense<0.000000e+00> : vector<1x32xf32>
    %24 = tpu.matmul %23, %3, %cst_22 {dimension_numbers = #tpu.dot_dimension_numbers<[1], [0], [0], [1], [0, 0, 1, 1], [], []>} : vector<1x8xf32>, vector<8x32xf32>, vector<1x32xf32> -> vector<1x32xf32>
    %cst_23 = arith.constant 9.99999997E-7 : f32
    %25 = vector.broadcast %cst_23 : f32 to vector<1x32xf32>
    %26 = arith.addf %24, %25 : vector<1x32xf32>
    %27 = math.rsqrt %26 : vector<1x32xf32>
    %28 = vector.broadcast %27 : vector<1x32xf32> to vector<64x32xf32>
    %29 = arith.mulf %17, %28 : vector<64x32xf32>
    %30 = vector.broadcast %8 : vector<1x32xf32> to vector<64x32xf32>
    %31 = arith.mulf %29, %30 : vector<64x32xf32>
    %32 = vector.broadcast %9 : vector<1x32xf32> to vector<64x32xf32>
    %33 = arith.addf %31, %32 : vector<64x32xf32>
    %34 = arith.negf %33 : vector<64x32xf32>
    %35 = math.exp %34 : vector<64x32xf32>
    %cst_24 = arith.constant 1.000000e+00 : f32
    %36 = vector.broadcast %cst_24 : f32 to vector<64x32xf32>
    %37 = arith.addf %36, %35 : vector<64x32xf32>
    %38 = arith.divf %36, %37 : vector<64x32xf32>
    %39 = arith.mulf %33, %38 : vector<64x32xf32>
    %c0_25 = arith.constant 0 : index
    %c0_26 = arith.constant 0 : index
    %40 = vector.load %arg9[%c0_25, %c0_26] : memref<1x32xf32, #tpu.memory_space<vmem>>, vector<1x32xf32>
    %c16 = arith.constant 16 : index
    %c0_27 = arith.constant 0 : index
    %41 = vector.load %arg17[%c16, %c0_27] : memref<96x32xf32, #tpu.memory_space<vmem>>, vector<64x32xf32>
    tpu.vector_store %arg17[%c16, %c0_27], %39 {strides = array<i32>} : memref<96x32xf32, #tpu.memory_space<vmem>>, vector<64x32xf32>,
    %cst_28 = arith.constant 0.000000e+00 : f32
    %42 = vector.broadcast %cst_28 : f32 to vector<64x32xf32>
    %c7 = arith.constant 7 : index
    %c0_29 = arith.constant 0 : index
    %43 = vector.load %arg17[%c7, %c0_29] : memref<96x32xf32, #tpu.memory_space<vmem>>, vector<64x32xf32>
    %44 = vector.broadcast %4 : vector<64x1xf32> to vector<64x32xf32>
    %45 = arith.mulf %43, %44 : vector<64x32xf32>
    %46 = arith.truncf %45 : vector<64x32xf32> to vector<64x32xbf16>
    %c0_30 = arith.constant 0 : index
    %c0_31 = arith.constant 0 : index
    %c0_32 = arith.constant 0 : index
    %47 = vector.load %arg8[%c0_30, %c0_31, %c0_32] : memref<9x32x32xbf16, #tpu.memory_space<vmem>>, vector<1x32x32xbf16>
    %48 = vector.shape_cast %47 : vector<1x32x32xbf16> to vector<32x32xbf16>
    %cst_33 = arith.constant dense<0.000000e+00> : vector<64x32xf32>
    %49 = tpu.matmul %46, %48, %cst_33 {dimension_numbers = #tpu.dot_dimension_numbers<[1], [0], [0], [1], [0, 0, 1, 1], [], []>} : vector<64x32xbf16>, vector<32x32xbf16>, vector<64x32xf32> -> vector<64x32xf32>
    %50 = arith.addf %42, %49 : vector<64x32xf32>
    %c8 = arith.constant 8 : index
    %c0_34 = arith.constant 0 : index
    %51 = vector.load %arg17[%c8, %c0_34] : memref<96x32xf32, #tpu.memory_space<vmem>>, vector<64x32xf32>
    %52 = arith.truncf %51 : vector<64x32xf32> to vector<64x32xbf16>
    %c1_35 = arith.constant 1 : index
    %c0_36 = arith.constant 0 : index
    %c0_37 = arith.constant 0 : index
    %53 = vector.load %arg8[%c1_35, %c0_36, %c0_37] : memref<9x32x32xbf16, #tpu.memory_space<vmem>>, vector<1x32x32xbf16>
    %54 = vector.shape_cast %53 : vector<1x32x32xbf16> to vector<32x32xbf16>
    %cst_38 = arith.constant dense<0.000000e+00> : vector<64x32xf32>
    %55 = tpu.matmul %52, %54, %cst_38 {dimension_numbers = #tpu.dot_dimension_numbers<[1], [0], [0], [1], [0, 0, 1, 1], [], []>} : vector<64x32xbf16>, vector<32x32xbf16>, vector<64x32xf32> -> vector<64x32xf32>
    %56 = arith.addf %50, %55 : vector<64x32xf32>
    %c9 = arith.constant 9 : index
    %c0_39 = arith.constant 0 : index
    %57 = vector.load %arg17[%c9, %c0_39] : memref<96x32xf32, #tpu.memory_space<vmem>>, vector<64x32xf32>
    %58 = vector.broadcast %5 : vector<64x1xf32> to vector<64x32xf32>
    %59 = arith.mulf %57, %58 : vector<64x32xf32>
    %60 = arith.truncf %59 : vector<64x32xf32> to vector<64x32xbf16>
    %c2 = arith.constant 2 : index
    %c0_40 = arith.constant 0 : index
    %c0_41 = arith.constant 0 : index
    %61 = vector.load %arg8[%c2, %c0_40, %c0_41] : memref<9x32x32xbf16, #tpu.memory_space<vmem>>, vector<1x32x32xbf16>
    %62 = vector.shape_cast %61 : vector<1x32x32xbf16> to vector<32x32xbf16>
    %cst_42 = arith.constant dense<0.000000e+00> : vector<64x32xf32>
    %63 = tpu.matmul %60, %62, %cst_42 {dimension_numbers = #tpu.dot_dimension_numbers<[1], [0], [0], [1], [0, 0, 1, 1], [], []>} : vector<64x32xbf16>, vector<32x32xbf16>, vector<64x32xf32> -> vector<64x32xf32>
    %64 = arith.addf %56, %63 : vector<64x32xf32>
    %c15 = arith.constant 15 : index
    %c0_43 = arith.constant 0 : index
    %65 = vector.load %arg17[%c15, %c0_43] : memref<96x32xf32, #tpu.memory_space<vmem>>, vector<64x32xf32>
    %66 = vector.broadcast %4 : vector<64x1xf32> to vector<64x32xf32>
    %67 = arith.mulf %65, %66 : vector<64x32xf32>
    %68 = arith.truncf %67 : vector<64x32xf32> to vector<64x32xbf16>
    %c3 = arith.constant 3 : index
    %c0_44 = arith.constant 0 : index
    %c0_45 = arith.constant 0 : index
    %69 = vector.load %arg8[%c3, %c0_44, %c0_45] : memref<9x32x32xbf16, #tpu.memory_space<vmem>>, vector<1x32x32xbf16>
    %70 = vector.shape_cast %69 : vector<1x32x32xbf16> to vector<32x32xbf16>
    %cst_46 = arith.constant dense<0.000000e+00> : vector<64x32xf32>
    %71 = tpu.matmul %68, %70, %cst_46 {dimension_numbers = #tpu.dot_dimension_numbers<[1], [0], [0], [1], [0, 0, 1, 1], [], []>} : vector<64x32xbf16>, vector<32x32xbf16>, vector<64x32xf32> -> vector<64x32xf32>
    %72 = arith.addf %64, %71 : vector<64x32xf32>
    %c16_47 = arith.constant 16 : index
    %c0_48 = arith.constant 0 : index
    %73 = vector.load %arg17[%c16_47, %c0_48] : memref<96x32xf32, #tpu.memory_space<vmem>>, vector<64x32xf32>
    %74 = arith.truncf %73 : vector<64x32xf32> to vector<64x32xbf16>
    %c4 = arith.constant 4 : index
    %c0_49 = arith.constant 0 : index
    %c0_50 = arith.constant 0 : index
    %75 = vector.load %arg8[%c4, %c0_49, %c0_50] : memref<9x32x32xbf16, #tpu.memory_space<vmem>>, vector<1x32x32xbf16>
    %76 = vector.shape_cast %75 : vector<1x32x32xbf16> to vector<32x32xbf16>
    %cst_51 = arith.constant dense<0.000000e+00> : vector<64x32xf32>
    %77 = tpu.matmul %74, %76, %cst_51 {dimension_numbers = #tpu.dot_dimension_numbers<[1], [0], [0], [1], [0, 0, 1, 1], [], []>} : vector<64x32xbf16>, vector<32x32xbf16>, vector<64x32xf32> -> vector<64x32xf32>
    %78 = arith.addf %72, %77 : vector<64x32xf32>
    %c17 = arith.constant 17 : index
    %c0_52 = arith.constant 0 : index
    %79 = vector.load %arg17[%c17, %c0_52] : memref<96x32xf32, #tpu.memory_space<vmem>>, vector<64x32xf32>
    %80 = vector.broadcast %5 : vector<64x1xf32> to vector<64x32xf32>
    %81 = arith.mulf %79, %80 : vector<64x32xf32>
    %82 = arith.truncf %81 : vector<64x32xf32> to vector<64x32xbf16>
    %c5 = arith.constant 5 : index
    %c0_53 = arith.constant 0 : index
    %c0_54 = arith.constant 0 : index
    %83 = vector.load %arg8[%c5, %c0_53, %c0_54] : memref<9x32x32xbf16, #tpu.memory_space<vmem>>, vector<1x32x32xbf16>
    %84 = vector.shape_cast %83 : vector<1x32x32xbf16> to vector<32x32xbf16>
    %cst_55 = arith.constant dense<0.000000e+00> : vector<64x32xf32>
    %85 = tpu.matmul %82, %84, %cst_55 {dimension_numbers = #tpu.dot_dimension_numbers<[1], [0], [0], [1], [0, 0, 1, 1], [], []>} : vector<64x32xbf16>, vector<32x32xbf16>, vector<64x32xf32> -> vector<64x32xf32>
    %86 = arith.addf %78, %85 : vector<64x32xf32>
    %c23 = arith.constant 23 : index
    %c0_56 = arith.constant 0 : index
    %87 = vector.load %arg17[%c23, %c0_56] : memref<96x32xf32, #tpu.memory_space<vmem>>, vector<64x32xf32>
    %88 = vector.broadcast %4 : vector<64x1xf32> to vector<64x32xf32>
    %89 = arith.mulf %87, %88 : vector<64x32xf32>
    %90 = arith.truncf %89 : vector<64x32xf32> to vector<64x32xbf16>
    %c6 = arith.constant 6 : index
    %c0_57 = arith.constant 0 : index
    %c0_58 = arith.constant 0 : index
    %91 = vector.load %arg8[%c6, %c0_57, %c0_58] : memref<9x32x32xbf16, #tpu.memory_space<vmem>>, vector<1x32x32xbf16>
    %92 = vector.shape_cast %91 : vector<1x32x32xbf16> to vector<32x32xbf16>
    %cst_59 = arith.constant dense<0.000000e+00> : vector<64x32xf32>
    %93 = tpu.matmul %90, %92, %cst_59 {dimension_numbers = #tpu.dot_dimension_numbers<[1], [0], [0], [1], [0, 0, 1, 1], [], []>} : vector<64x32xbf16>, vector<32x32xbf16>, vector<64x32xf32> -> vector<64x32xf32>
    %94 = arith.addf %86, %93 : vector<64x32xf32>
    %c24 = arith.constant 24 : index
    %c0_60 = arith.constant 0 : index
    %95 = vector.load %arg17[%c24, %c0_60] : memref<96x32xf32, #tpu.memory_space<vmem>>, vector<64x32xf32>
    %96 = arith.truncf %95 : vector<64x32xf32> to vector<64x32xbf16>
    %c7_61 = arith.constant 7 : index
    %c0_62 = arith.constant 0 : index
    %c0_63 = arith.constant 0 : index
    %97 = vector.load %arg8[%c7_61, %c0_62, %c0_63] : memref<9x32x32xbf16, #tpu.memory_space<vmem>>, vector<1x32x32xbf16>
    %98 = vector.shape_cast %97 : vector<1x32x32xbf16> to vector<32x32xbf16>
    %cst_64 = arith.constant dense<0.000000e+00> : vector<64x32xf32>
    %99 = tpu.matmul %96, %98, %cst_64 {dimension_numbers = #tpu.dot_dimension_numbers<[1], [0], [0], [1], [0, 0, 1, 1], [], []>} : vector<64x32xbf16>, vector<32x32xbf16>, vector<64x32xf32> -> vector<64x32xf32>
    %100 = arith.addf %94, %99 : vector<64x32xf32>
    %c25 = arith.constant 25 : index
    %c0_65 = arith.constant 0 : index
    %101 = vector.load %arg17[%c25, %c0_65] : memref<96x32xf32, #tpu.memory_space<vmem>>, vector<64x32xf32>
    %102 = vector.broadcast %5 : vector<64x1xf32> to vector<64x32xf32>
    %103 = arith.mulf %101, %102 : vector<64x32xf32>
    %104 = arith.truncf %103 : vector<64x32xf32> to vector<64x32xbf16>
    %c8_66 = arith.constant 8 : index
    %c0_67 = arith.constant 0 : index
    %c0_68 = arith.constant 0 : index
    %105 = vector.load %arg8[%c8_66, %c0_67, %c0_68] : memref<9x32x32xbf16, #tpu.memory_space<vmem>>, vector<1x32x32xbf16>
    %106 = vector.shape_cast %105 : vector<1x32x32xbf16> to vector<32x32xbf16>
    %cst_69 = arith.constant dense<0.000000e+00> : vector<64x32xf32>
    %107 = tpu.matmul %104, %106, %cst_69 {dimension_numbers = #tpu.dot_dimension_numbers<[1], [0], [0], [1], [0, 0, 1, 1], [], []>} : vector<64x32xbf16>, vector<32x32xbf16>, vector<64x32xf32> -> vector<64x32xf32>
    %108 = arith.addf %100, %107 : vector<64x32xf32>
    %109 = vector.broadcast %40 : vector<1x32xf32> to vector<64x32xf32>
    %110 = arith.addf %108, %109 : vector<64x32xf32>
    %c0_70 = arith.constant 0 : index
    %c0_71 = arith.constant 0 : index
    %c0_72 = arith.constant 0 : index
    %111 = vector.load %arg2[%c0_70, %c0_71, %c0_72] : memref<1x1x32xf32, #tpu.memory_space<vmem>>, vector<1x1x32xf32>
    %112 = vector.shape_cast %111 : vector<1x1x32xf32> to vector<1x32xf32>
    %113 = arith.negf %112 : vector<1x32xf32>
    %114 = math.exp %113 : vector<1x32xf32>
    %cst_73 = arith.constant 1.000000e+00 : f32
    %115 = vector.broadcast %cst_73 : f32 to vector<1x32xf32>
    %116 = arith.addf %115, %114 : vector<1x32xf32>
    %117 = arith.divf %115, %116 : vector<1x32xf32>
    %118 = arith.mulf %112, %117 : vector<1x32xf32>
    %119 = arith.truncf %118 : vector<1x32xf32> to vector<1x32xbf16>
    %c0_74 = arith.constant 0 : index
    %c0_75 = arith.constant 0 : index
    %120 = vector.load %arg10[%c0_74, %c0_75] : memref<32x32xbf16, #tpu.memory_space<vmem>>, vector<32x32xbf16>
    %cst_76 = arith.constant dense<0.000000e+00> : vector<1x32xf32>
    %121 = tpu.matmul %119, %120, %cst_76 {dimension_numbers = #tpu.dot_dimension_numbers<[1], [0], [0], [1], [0, 0, 1, 1], [], []>} : vector<1x32xbf16>, vector<32x32xbf16>, vector<1x32xf32> -> vector<1x32xf32>
    %c0_77 = arith.constant 0 : index
    %c0_78 = arith.constant 0 : index
    %122 = vector.load %arg11[%c0_77, %c0_78] : memref<1x32xf32, #tpu.memory_space<vmem>>, vector<1x32xf32>
    %123 = arith.addf %121, %122 : vector<1x32xf32>
    %124 = vector.broadcast %123 : vector<1x32xf32> to vector<64x32xf32>
    %125 = arith.addf %110, %124 : vector<64x32xf32>
    %c0_79 = arith.constant 0 : index
    %c0_80 = arith.constant 0 : index
    %126 = vector.load %arg12[%c0_79, %c0_80] : memref<1x32xf32, #tpu.memory_space<vmem>>, vector<1x32xf32>
    %c0_81 = arith.constant 0 : index
    %c0_82 = arith.constant 0 : index
    %127 = vector.load %arg13[%c0_81, %c0_82] : memref<1x32xf32, #tpu.memory_space<vmem>>, vector<1x32xf32>
    %cst_83 = arith.constant dense<0.000000e+00> : vector<32xf32>
    %128 = vector.multi_reduction <add>, %125, %cst_83 [0] : vector<64x32xf32> to vector<32xf32>
    %129 = vector.shape_cast %128 : vector<32xf32> to vector<1x32xf32>
    %cst_84 = arith.constant dense<0.000000e+00> : vector<1x8xf32>
    %130 = tpu.matmul %129, %2, %cst_84 {dimension_numbers = #tpu.dot_dimension_numbers<[1], [0], [0], [1], [0, 0, 1, 1], [], []>} : vector<1x32xf32>, vector<32x8xf32>, vector<1x8xf32> -> vector<1x8xf32>
    %cst_85 = arith.constant 3.906250e-03 : f32
    %131 = vector.broadcast %cst_85 : f32 to vector<1x8xf32>
    %132 = arith.mulf %130, %131 : vector<1x8xf32>
    %cst_86 = arith.constant dense<0.000000e+00> : vector<1x32xf32>
    %133 = tpu.matmul %132, %3, %cst_86 {dimension_numbers = #tpu.dot_dimension_numbers<[1], [0], [0], [1], [0, 0, 1, 1], [], []>} : vector<1x8xf32>, vector<8x32xf32>, vector<1x32xf32> -> vector<1x32xf32>
    %134 = vector.broadcast %133 : vector<1x32xf32> to vector<64x32xf32>
    %135 = arith.subf %125, %134 : vector<64x32xf32>
    %136 = arith.mulf %135, %135 : vector<64x32xf32>
    %cst_87 = arith.constant dense<0.000000e+00> : vector<32xf32>
    %137 = vector.multi_reduction <add>, %136, %cst_87 [0] : vector<64x32xf32> to vector<32xf32>
    %138 = vector.shape_cast %137 : vector<32xf32> to vector<1x32xf32>
    %cst_88 = arith.constant dense<0.000000e+00> : vector<1x8xf32>
    %139 = tpu.matmul %138, %2, %cst_88 {dimension_numbers = #tpu.dot_dimension_numbers<[1], [0], [0], [1], [0, 0, 1, 1], [], []>} : vector<1x32xf32>, vector<32x8xf32>, vector<1x8xf32> -> vector<1x8xf32>
    %cst_89 = arith.constant 3.906250e-03 : f32
    %140 = vector.broadcast %cst_89 : f32 to vector<1x8xf32>
    %141 = arith.mulf %139, %140 : vector<1x8xf32>
    %cst_90 = arith.constant dense<0.000000e+00> : vector<1x32xf32>
    %142 = tpu.matmul %141, %3, %cst_90 {dimension_numbers = #tpu.dot_dimension_numbers<[1], [0], [0], [1], [0, 0, 1, 1], [], []>} : vector<1x8xf32>, vector<8x32xf32>, vector<1x32xf32> -> vector<1x32xf32>
    %cst_91 = arith.constant 9.99999997E-7 : f32
    %143 = vector.broadcast %cst_91 : f32 to vector<1x32xf32>
    %144 = arith.addf %142, %143 : vector<1x32xf32>
    %145 = math.rsqrt %144 : vector<1x32xf32>
    %146 = vector.broadcast %145 : vector<1x32xf32> to vector<64x32xf32>
    %147 = arith.mulf %135, %146 : vector<64x32xf32>
    %148 = vector.broadcast %126 : vector<1x32xf32> to vector<64x32xf32>
    %149 = arith.mulf %147, %148 : vector<64x32xf32>
    %150 = vector.broadcast %127 : vector<1x32xf32> to vector<64x32xf32>
    %151 = arith.addf %149, %150 : vector<64x32xf32>
    %152 = arith.negf %151 : vector<64x32xf32>
    %153 = math.exp %152 : vector<64x32xf32>
    %cst_92 = arith.constant 1.000000e+00 : f32
    %154 = vector.broadcast %cst_92 : f32 to vector<64x32xf32>
    %155 = arith.addf %154, %153 : vector<64x32xf32>
    %156 = arith.divf %154, %155 : vector<64x32xf32>
    %157 = arith.mulf %151, %156 : vector<64x32xf32>
    %c0_93 = arith.constant 0 : index
    %c0_94 = arith.constant 0 : index
    %158 = vector.load %arg15[%c0_93, %c0_94] : memref<1x32xf32, #tpu.memory_space<vmem>>, vector<1x32xf32>
    %c16_95 = arith.constant 16 : index
    %c0_96 = arith.constant 0 : index
    %159 = vector.load %arg17[%c16_95, %c0_96] : memref<96x32xf32, #tpu.memory_space<vmem>>, vector<64x32xf32>
    tpu.vector_store %arg17[%c16_95, %c0_96], %157 {strides = array<i32>} : memref<96x32xf32, #tpu.memory_space<vmem>>, vector<64x32xf32>,
    %cst_97 = arith.constant 0.000000e+00 : f32
    %160 = vector.broadcast %cst_97 : f32 to vector<64x32xf32>
    %c7_98 = arith.constant 7 : index
    %c0_99 = arith.constant 0 : index
    %161 = vector.load %arg17[%c7_98, %c0_99] : memref<96x32xf32, #tpu.memory_space<vmem>>, vector<64x32xf32>
    %162 = vector.broadcast %4 : vector<64x1xf32> to vector<64x32xf32>
    %163 = arith.mulf %161, %162 : vector<64x32xf32>
    %164 = arith.truncf %163 : vector<64x32xf32> to vector<64x32xbf16>
    %c0_100 = arith.constant 0 : index
    %c0_101 = arith.constant 0 : index
    %c0_102 = arith.constant 0 : index
    %165 = vector.load %arg14[%c0_100, %c0_101, %c0_102] : memref<9x32x32xbf16, #tpu.memory_space<vmem>>, vector<1x32x32xbf16>
    %166 = vector.shape_cast %165 : vector<1x32x32xbf16> to vector<32x32xbf16>
    %cst_103 = arith.constant dense<0.000000e+00> : vector<64x32xf32>
    %167 = tpu.matmul %164, %166, %cst_103 {dimension_numbers = #tpu.dot_dimension_numbers<[1], [0], [0], [1], [0, 0, 1, 1], [], []>} : vector<64x32xbf16>, vector<32x32xbf16>, vector<64x32xf32> -> vector<64x32xf32>
    %168 = arith.addf %160, %167 : vector<64x32xf32>
    %c8_104 = arith.constant 8 : index
    %c0_105 = arith.constant 0 : index
    %169 = vector.load %arg17[%c8_104, %c0_105] : memref<96x32xf32, #tpu.memory_space<vmem>>, vector<64x32xf32>
    %170 = arith.truncf %169 : vector<64x32xf32> to vector<64x32xbf16>
    %c1_106 = arith.constant 1 : index
    %c0_107 = arith.constant 0 : index
    %c0_108 = arith.constant 0 : index
    %171 = vector.load %arg14[%c1_106, %c0_107, %c0_108] : memref<9x32x32xbf16, #tpu.memory_space<vmem>>, vector<1x32x32xbf16>
    %172 = vector.shape_cast %171 : vector<1x32x32xbf16> to vector<32x32xbf16>
    %cst_109 = arith.constant dense<0.000000e+00> : vector<64x32xf32>
    %173 = tpu.matmul %170, %172, %cst_109 {dimension_numbers = #tpu.dot_dimension_numbers<[1], [0], [0], [1], [0, 0, 1, 1], [], []>} : vector<64x32xbf16>, vector<32x32xbf16>, vector<64x32xf32> -> vector<64x32xf32>
    %174 = arith.addf %168, %173 : vector<64x32xf32>
    %c9_110 = arith.constant 9 : index
    %c0_111 = arith.constant 0 : index
    %175 = vector.load %arg17[%c9_110, %c0_111] : memref<96x32xf32, #tpu.memory_space<vmem>>, vector<64x32xf32>
    %176 = vector.broadcast %5 : vector<64x1xf32> to vector<64x32xf32>
    %177 = arith.mulf %175, %176 : vector<64x32xf32>
    %178 = arith.truncf %177 : vector<64x32xf32> to vector<64x32xbf16>
    %c2_112 = arith.constant 2 : index
    %c0_113 = arith.constant 0 : index
    %c0_114 = arith.constant 0 : index
    %179 = vector.load %arg14[%c2_112, %c0_113, %c0_114] : memref<9x32x32xbf16, #tpu.memory_space<vmem>>, vector<1x32x32xbf16>
    %180 = vector.shape_cast %179 : vector<1x32x32xbf16> to vector<32x32xbf16>
    %cst_115 = arith.constant dense<0.000000e+00> : vector<64x32xf32>
    %181 = tpu.matmul %178, %180, %cst_115 {dimension_numbers = #tpu.dot_dimension_numbers<[1], [0], [0], [1], [0, 0, 1, 1], [], []>} : vector<64x32xbf16>, vector<32x32xbf16>, vector<64x32xf32> -> vector<64x32xf32>
    %182 = arith.addf %174, %181 : vector<64x32xf32>
    %c15_116 = arith.constant 15 : index
    %c0_117 = arith.constant 0 : index
    %183 = vector.load %arg17[%c15_116, %c0_117] : memref<96x32xf32, #tpu.memory_space<vmem>>, vector<64x32xf32>
    %184 = vector.broadcast %4 : vector<64x1xf32> to vector<64x32xf32>
    %185 = arith.mulf %183, %184 : vector<64x32xf32>
    %186 = arith.truncf %185 : vector<64x32xf32> to vector<64x32xbf16>
    %c3_118 = arith.constant 3 : index
    %c0_119 = arith.constant 0 : index
    %c0_120 = arith.constant 0 : index
    %187 = vector.load %arg14[%c3_118, %c0_119, %c0_120] : memref<9x32x32xbf16, #tpu.memory_space<vmem>>, vector<1x32x32xbf16>
    %188 = vector.shape_cast %187 : vector<1x32x32xbf16> to vector<32x32xbf16>
    %cst_121 = arith.constant dense<0.000000e+00> : vector<64x32xf32>
    %189 = tpu.matmul %186, %188, %cst_121 {dimension_numbers = #tpu.dot_dimension_numbers<[1], [0], [0], [1], [0, 0, 1, 1], [], []>} : vector<64x32xbf16>, vector<32x32xbf16>, vector<64x32xf32> -> vector<64x32xf32>
    %190 = arith.addf %182, %189 : vector<64x32xf32>
    %c16_122 = arith.constant 16 : index
    %c0_123 = arith.constant 0 : index
    %191 = vector.load %arg17[%c16_122, %c0_123] : memref<96x32xf32, #tpu.memory_space<vmem>>, vector<64x32xf32>
    %192 = arith.truncf %191 : vector<64x32xf32> to vector<64x32xbf16>
    %c4_124 = arith.constant 4 : index
    %c0_125 = arith.constant 0 : index
    %c0_126 = arith.constant 0 : index
    %193 = vector.load %arg14[%c4_124, %c0_125, %c0_126] : memref<9x32x32xbf16, #tpu.memory_space<vmem>>, vector<1x32x32xbf16>
    %194 = vector.shape_cast %193 : vector<1x32x32xbf16> to vector<32x32xbf16>
    %cst_127 = arith.constant dense<0.000000e+00> : vector<64x32xf32>
    %195 = tpu.matmul %192, %194, %cst_127 {dimension_numbers = #tpu.dot_dimension_numbers<[1], [0], [0], [1], [0, 0, 1, 1], [], []>} : vector<64x32xbf16>, vector<32x32xbf16>, vector<64x32xf32> -> vector<64x32xf32>
    %196 = arith.addf %190, %195 : vector<64x32xf32>
    %c17_128 = arith.constant 17 : index
    %c0_129 = arith.constant 0 : index
    %197 = vector.load %arg17[%c17_128, %c0_129] : memref<96x32xf32, #tpu.memory_space<vmem>>, vector<64x32xf32>
    %198 = vector.broadcast %5 : vector<64x1xf32> to vector<64x32xf32>
    %199 = arith.mulf %197, %198 : vector<64x32xf32>
    %200 = arith.truncf %199 : vector<64x32xf32> to vector<64x32xbf16>
    %c5_130 = arith.constant 5 : index
    %c0_131 = arith.constant 0 : index
    %c0_132 = arith.constant 0 : index
    %201 = vector.load %arg14[%c5_130, %c0_131, %c0_132] : memref<9x32x32xbf16, #tpu.memory_space<vmem>>, vector<1x32x32xbf16>
    %202 = vector.shape_cast %201 : vector<1x32x32xbf16> to vector<32x32xbf16>
    %cst_133 = arith.constant dense<0.000000e+00> : vector<64x32xf32>
    %203 = tpu.matmul %200, %202, %cst_133 {dimension_numbers = #tpu.dot_dimension_numbers<[1], [0], [0], [1], [0, 0, 1, 1], [], []>} : vector<64x32xbf16>, vector<32x32xbf16>, vector<64x32xf32> -> vector<64x32xf32>
    %204 = arith.addf %196, %203 : vector<64x32xf32>
    %c23_134 = arith.constant 23 : index
    %c0_135 = arith.constant 0 : index
    %205 = vector.load %arg17[%c23_134, %c0_135] : memref<96x32xf32, #tpu.memory_space<vmem>>, vector<64x32xf32>
    %206 = vector.broadcast %4 : vector<64x1xf32> to vector<64x32xf32>
    %207 = arith.mulf %205, %206 : vector<64x32xf32>
    %208 = arith.truncf %207 : vector<64x32xf32> to vector<64x32xbf16>
    %c6_136 = arith.constant 6 : index
    %c0_137 = arith.constant 0 : index
    %c0_138 = arith.constant 0 : index
    %209 = vector.load %arg14[%c6_136, %c0_137, %c0_138] : memref<9x32x32xbf16, #tpu.memory_space<vmem>>, vector<1x32x32xbf16>
    %210 = vector.shape_cast %209 : vector<1x32x32xbf16> to vector<32x32xbf16>
    %cst_139 = arith.constant dense<0.000000e+00> : vector<64x32xf32>
    %211 = tpu.matmul %208, %210, %cst_139 {dimension_numbers = #tpu.dot_dimension_numbers<[1], [0], [0], [1], [0, 0, 1, 1], [], []>} : vector<64x32xbf16>, vector<32x32xbf16>, vector<64x32xf32> -> vector<64x32xf32>
    %212 = arith.addf %204, %211 : vector<64x32xf32>
    %c24_140 = arith.constant 24 : index
    %c0_141 = arith.constant 0 : index
    %213 = vector.load %arg17[%c24_140, %c0_141] : memref<96x32xf32, #tpu.memory_space<vmem>>, vector<64x32xf32>
    %214 = arith.truncf %213 : vector<64x32xf32> to vector<64x32xbf16>
    %c7_142 = arith.constant 7 : index
    %c0_143 = arith.constant 0 : index
    %c0_144 = arith.constant 0 : index
    %215 = vector.load %arg14[%c7_142, %c0_143, %c0_144] : memref<9x32x32xbf16, #tpu.memory_space<vmem>>, vector<1x32x32xbf16>
    %216 = vector.shape_cast %215 : vector<1x32x32xbf16> to vector<32x32xbf16>
    %cst_145 = arith.constant dense<0.000000e+00> : vector<64x32xf32>
    %217 = tpu.matmul %214, %216, %cst_145 {dimension_numbers = #tpu.dot_dimension_numbers<[1], [0], [0], [1], [0, 0, 1, 1], [], []>} : vector<64x32xbf16>, vector<32x32xbf16>, vector<64x32xf32> -> vector<64x32xf32>
    %218 = arith.addf %212, %217 : vector<64x32xf32>
    %c25_146 = arith.constant 25 : index
    %c0_147 = arith.constant 0 : index
    %219 = vector.load %arg17[%c25_146, %c0_147] : memref<96x32xf32, #tpu.memory_space<vmem>>, vector<64x32xf32>
    %220 = vector.broadcast %5 : vector<64x1xf32> to vector<64x32xf32>
    %221 = arith.mulf %219, %220 : vector<64x32xf32>
    %222 = arith.truncf %221 : vector<64x32xf32> to vector<64x32xbf16>
    %c8_148 = arith.constant 8 : index
    %c0_149 = arith.constant 0 : index
    %c0_150 = arith.constant 0 : index
    %223 = vector.load %arg14[%c8_148, %c0_149, %c0_150] : memref<9x32x32xbf16, #tpu.memory_space<vmem>>, vector<1x32x32xbf16>
    %224 = vector.shape_cast %223 : vector<1x32x32xbf16> to vector<32x32xbf16>
    %cst_151 = arith.constant dense<0.000000e+00> : vector<64x32xf32>
    %225 = tpu.matmul %222, %224, %cst_151 {dimension_numbers = #tpu.dot_dimension_numbers<[1], [0], [0], [1], [0, 0, 1, 1], [], []>} : vector<64x32xbf16>, vector<32x32xbf16>, vector<64x32xf32> -> vector<64x32xf32>
    %226 = arith.addf %218, %225 : vector<64x32xf32>
    %227 = vector.broadcast %158 : vector<1x32xf32> to vector<64x32xf32>
    %228 = arith.addf %226, %227 : vector<64x32xf32>
    %229 = arith.addf %1, %228 : vector<64x32xf32>
    %230 = vector.shape_cast %229 : vector<64x32xf32> to vector<1x64x32xf32>
    %c0_152 = arith.constant 0 : index
    %c0_153 = arith.constant 0 : index
    %c0_154 = arith.constant 0 : index
    %231 = vector.load %arg16[%c0_152, %c0_153, %c0_154] : memref<1x64x32xf32, #tpu.memory_space<vmem>>, vector<1x64x32xf32>
    tpu.vector_store %arg16[%c0_152, %c0_153, %c0_154], %230 {strides = array<i32>} : memref<1x64x32xf32, #tpu.memory_space<vmem>>, vector<1x64x32xf32>,
    return
  }
  func.func @transform_0(%arg0: i32) -> (i32, i32, i32) {
    %c0_i32 = arith.constant 0 : i32
    %c0_i32_0 = arith.constant 0 : i32
    %c0_i32_1 = arith.constant 0 : i32
    return %arg0, %c0_i32, %c0_i32_0 : i32, i32, i32
  }
  func.func @transform_1(%arg0: i32) -> (i32, i32, i32) {
    %c0_i32 = arith.constant 0 : i32
    %c0_i32_0 = arith.constant 0 : i32
    %c0_i32_1 = arith.constant 0 : i32
    return %arg0, %c0_i32, %c0_i32_0 : i32, i32, i32
  }
  func.func @transform_2(%arg0: i32) -> (i32, i32) {
    %c0_i32 = arith.constant 0 : i32
    %c0_i32_0 = arith.constant 0 : i32
    %c0_i32_1 = arith.constant 0 : i32
    return %c0_i32, %c0_i32_0 : i32, i32
  }
  func.func @transform_3(%arg0: i32) -> (i32, i32) {
    %c0_i32 = arith.constant 0 : i32
    %c0_i32_0 = arith.constant 0 : i32
    %c0_i32_1 = arith.constant 0 : i32
    return %c0_i32, %c0_i32_0 : i32, i32
  }
  func.func @transform_4(%arg0: i32) -> (i32, i32) {
    %c0_i32 = arith.constant 0 : i32
    %c0_i32_0 = arith.constant 0 : i32
    %c0_i32_1 = arith.constant 0 : i32
    return %c0_i32, %c0_i32_0 : i32, i32
  }
  func.func @transform_5(%arg0: i32) -> (i32, i32) {
    %c0_i32 = arith.constant 0 : i32
    %c0_i32_0 = arith.constant 0 : i32
    %c0_i32_1 = arith.constant 0 : i32
    return %c0_i32, %c0_i32_0 : i32, i32
  }
  func.func @transform_6(%arg0: i32) -> (i32, i32) {
    %c0_i32 = arith.constant 0 : i32
    %c0_i32_0 = arith.constant 0 : i32
    %c0_i32_1 = arith.constant 0 : i32
    return %c0_i32, %c0_i32_0 : i32, i32
  }
  func.func @transform_7(%arg0: i32) -> (i32, i32, i32) {
    %c0_i32 = arith.constant 0 : i32
    %c0_i32_0 = arith.constant 0 : i32
    %c0_i32_1 = arith.constant 0 : i32
    %c0_i32_2 = arith.constant 0 : i32
    return %c0_i32, %c0_i32_0, %c0_i32_1 : i32, i32, i32
  }
  func.func @transform_8(%arg0: i32) -> (i32, i32) {
    %c0_i32 = arith.constant 0 : i32
    %c0_i32_0 = arith.constant 0 : i32
    %c0_i32_1 = arith.constant 0 : i32
    return %c0_i32, %c0_i32_0 : i32, i32
  }
  func.func @transform_9(%arg0: i32) -> (i32, i32) {
    %c0_i32 = arith.constant 0 : i32
    %c0_i32_0 = arith.constant 0 : i32
    %c0_i32_1 = arith.constant 0 : i32
    return %c0_i32, %c0_i32_0 : i32, i32
  }
  func.func @transform_10(%arg0: i32) -> (i32, i32) {
    %c0_i32 = arith.constant 0 : i32
    %c0_i32_0 = arith.constant 0 : i32
    %c0_i32_1 = arith.constant 0 : i32
    return %c0_i32, %c0_i32_0 : i32, i32
  }
  func.func @transform_11(%arg0: i32) -> (i32, i32) {
    %c0_i32 = arith.constant 0 : i32
    %c0_i32_0 = arith.constant 0 : i32
    %c0_i32_1 = arith.constant 0 : i32
    return %c0_i32, %c0_i32_0 : i32, i32
  }
  func.func @transform_12(%arg0: i32) -> (i32, i32) {
    %c0_i32 = arith.constant 0 : i32
    %c0_i32_0 = arith.constant 0 : i32
    %c0_i32_1 = arith.constant 0 : i32
    return %c0_i32, %c0_i32_0 : i32, i32
  }
  func.func @transform_13(%arg0: i32) -> (i32, i32, i32) {
    %c0_i32 = arith.constant 0 : i32
    %c0_i32_0 = arith.constant 0 : i32
    %c0_i32_1 = arith.constant 0 : i32
    %c0_i32_2 = arith.constant 0 : i32
    return %c0_i32, %c0_i32_0, %c0_i32_1 : i32, i32, i32
  }
  func.func @transform_14(%arg0: i32) -> (i32, i32) {
    %c0_i32 = arith.constant 0 : i32
    %c0_i32_0 = arith.constant 0 : i32
    %c0_i32_1 = arith.constant 0 : i32
    return %c0_i32, %c0_i32_0 : i32, i32
  }
  func.func @transform_15(%arg0: i32) -> (i32, i32, i32) {
    %c0_i32 = arith.constant 0 : i32
    %c0_i32_0 = arith.constant 0 : i32
    %c0_i32_1 = arith.constant 0 : i32
    return %arg0, %c0_i32, %c0_i32_0 : i32, i32, i32
  }
}

</mosaic_0001>

<bundles_post_ra>
// kernel: unet_mid_block_forward.2
= control target key start
LH: loop header
LB: loop body
LE: loop exit
PB: predicated region body
PF: predicated region fallthrough
CT: control target
= control target key end

     0   :  { %s6500_s0 = inlined_call_operand.vmem [shape: f32[2,64,32], index: 0, kind: input, shape index: {}]   ;;  %s6501_s1 = inlined_call_operand.vmem [shape: f32[2,1,32], index: 1, kind: input, shape index: {}]   ;;  %s6502_s2 = inlined_call_operand.vmem [shape: f32[64,2], index: 2, kind: input, shape index: {}]   ;;  %s6503_s3 = inlined_call_operand.vmem [shape: f32[32,8], index: 3, kind: input, shape index: {}]   ;;  %s6504_s4 = inlined_call_operand.vmem [shape: f32[8,32], index: 4, kind: input, shape index: {}]   ;;  %s6505_s5 = inlined_call_operand.vmem [shape: f32[1,32], index: 5, kind: input, shape index: {}]   ;;  %s6506_s6 = inlined_call_operand.hbm [shape: f32[1,32], index: 6, kind: input, shape index: {}]   ;;  %s6507_s7 = inlined_call_operand.vmem [shape: bf16[9,32,32], index: 7, kind: input, shape index: {}]   ;;  %s6508_s8 = inlined_call_operand.hbm [shape: f32[1,32], index: 8, kind: input, shape index: {}]   ;;  %s6509_s9 = inlined_call_operand.hbm [shape: bf16[32,32], index: 9, kind: input, shape index: {}]   ;;  %s6510_s10 = inlined_call_operand.hbm [shape: f32[1,32], index: 10, kind: input, shape index: {}]   ;;  %s6511_s11 = inlined_call_operand.hbm [shape: f32[1,32], index: 11, kind: input, shape index: {}]   ;;  %s6512_s12 = inlined_call_operand.hbm [shape: f32[1,32], index: 12, kind: input, shape index: {}]   ;;  %s6513_s13 = inlined_call_operand.hbm [shape: bf16[9,32,32], index: 13, kind: input, shape index: {}]   ;;  %s6514_s14 = inlined_call_operand.hbm [shape: f32[1,32], index: 14, kind: input, shape index: {}]   ;;  %s6515_s15 = inlined_call_operand.vmem [shape: f32[2,64,32], index: 15, kind: output, shape index: {}]  }
   0x1   :  { %6520 = sst [smem:[#allocation23_spill]] %s6501_s1 }
   0x2   :  { %6521 = sst [smem:[#allocation24_spill]] %s6506_s6 }
   0x3   :  { %6522 = sst [smem:[#allocation25_spill]] %s6515_s15 }
   0x4   :  { %20 = vsyncpa [#allocation4], 0 }
   0x5   :  { %21 = vsyncpa [#allocation6], 0 }
   0x6   :  { %22 = vsyncpa [#allocation9], 0 }
   0x7   :  { %23 = vsyncpa [#allocation12], 0 }
   0x8   :  { %24 = vsyncpa [#allocation15], 0  ;;  %s5380_s18 = smov 0  }
   0x9 LB: > { %6523 = sst [smem:[#allocation21_spill]] %s5283_s18  ;;  %s5285_s19 = smov [#allocation5]   ;;  %s5283_s18 = sphi %s5380_s18, %s30_s18  }
   0xa   : > { %s425_s20 = sshll.u32 %s5285_s19, 4  ;;  %s5386_s21 = sadd.s32 4294967295, %s5283_s18   ;;  %s5391_s20 = int_to_ptr.vmem [resolvable:$true] %s425_s20 }
   0xb   : > { %p4034_p0 = scmp.ge.s32.totalorder %s5283_s18, 1  ;;  %p386_p1 = scmp.lt.s32.totalorder %s5283_s18, 3 }
   0xc   : > { %p6517_p2 = scmp.eq.s32.totalorder %s5386_s21, 0  ;;  %s5286_s23 = smov [#allocation8]  }
   0xd   : > { %p5393_p3 = pnand %p4034_p0, %p386_p1  ;;  %s449_s24 = sshll.u32 %s5286_s23, 4  ;;  %s5399_s24 = int_to_ptr.vmem [resolvable:$true] %s449_s24 }
   0xe   : > { %s5287_s25 = smov [#allocation11]   ;;  %s5288_s28 = smov [#allocation3]  }
   0xf   : > { %s6524_s22 = scalar_select %p5393_p3, 1, 0 }
  0x10   : > { %p4846_p4 = pneg %p5393_p3  ;;  %s471_s26 = sshll.u32 %s5287_s25, 4  ;;  %s5407_s26 = int_to_ptr.vmem [resolvable:$true] %s471_s26 }
  0x11   : > { %s411_s29 = sshll.u32 %s5288_s28, 4  ;;  %s5033_s17 = scalar_lea.hbm %s6508_s8, 16  ;;  %s5409_s29 = int_to_ptr.vmem [resolvable:$true] %s411_s29 }
  0x12   : > { %p5403_p5 = pnand %p6517_p2, %p4846_p4  ;;  %p5034_p6 = scmp.ne.s32.totalorder %s6508_s8, %s5033_s17 }
  0x13   : > { %p5040_p10 = scmp.lt.u32.totalorder %s5033_s17, %s6508_s8 }
  0x14   : > { %p5419_p7 = pneg %p5403_p5 }
  0x16   : > { %p5036_p8 = pnand %p5419_p7, %p5034_p6 }
  0x18   : > { %p5037_p9 = pneg %p5036_p8 }
  0x1a   : > { %p5042_p11 = pnand %p5040_p10, %p5037_p9 }
  0x1c   : > { %5045 = shalt.err (!%p5042_p11)
}
  0x1d   : > { %s5046_s30 = scalar_lea.vmem %s5391_s20, 16  ;;  %s5053_s16 = scalar_lea.vmem %s5391_s20, 32 }
  0x1e   : > { %p5047_p12 = scmp.ne.s32.totalorder %s5391_s20, %s5046_s30  ;;  %p5054_p1 = scmp.lt.s32.totalorder %s5391_s20, %s5391_s20 }
  0x1f   : > { %p5055_p4 = scmp.lt.s32.totalorder %s5053_s16, %s5046_s30 }
  0x20   : > { %p5049_p13 = pnand %p5047_p12, %p5419_p7 }
  0x21   : > { %p5056_p6 = por %p5055_p4, %p5054_p1 }
  0x22   : > { %p5050_p0 = pneg %p5049_p13 }
  0x24   : > { %p5057_p8 = pnand %p5056_p6, %p5050_p0 }
  0x26   : > { %5060 = shalt.err (!%p5057_p8)
}
  0x27   : > { %4852 = dma.hbm_to_vmem [thread:$0]  (!%p5403_p5), %s6508_s8, 16, %s5391_s20, [#allocation6]  }
  0x28   : > { %s5061_s28 = scalar_lea.hbm %s6510_s10, 16 }
  0x29   : > { %p5062_p9 = scmp.ne.s32.totalorder %s6510_s10, %s5061_s28  ;;  %p5068_p12 = scmp.lt.u32.totalorder %s5061_s28, %s6510_s10 }
  0x2b   : > { %p5064_p10 = pnand %p5062_p9, %p5419_p7 }
  0x2d   : > { %p5065_p11 = pneg %p5064_p10 }
  0x2f   : > { %p5070_p13 = pnand %p5068_p12, %p5065_p11 }
  0x31   : > { %5073 = shalt.err (!%p5070_p13)
}
  0x32   : > { %s5074_s20 = scalar_lea.vmem %s5399_s24, 16  ;;  %s5081_s1 = scalar_lea.vmem %s5399_s24, 32 }
  0x33   : > { %p5075_p0 = scmp.ne.s32.totalorder %s5399_s24, %s5074_s20  ;;  %p5082_p6 = scmp.lt.s32.totalorder %s5399_s24, %s5399_s24 }
  0x34   : > { %p5083_p8 = scmp.lt.s32.totalorder %s5081_s1, %s5074_s20 }
  0x35   : > { %p5077_p1 = pnand %p5075_p0, %p5419_p7 }
  0x36   : > { %p5084_p9 = por %p5083_p8, %p5082_p6 }
  0x37   : > { %p5078_p4 = pneg %p5077_p1 }
  0x39   : > { %p5085_p10 = pnand %p5084_p9, %p5078_p4 }
  0x3b   : > { %5088 = shalt.err (!%p5085_p10)
}
  0x3c   : > { %4858 = dma.hbm_to_vmem [thread:$0]  (!%p5403_p5), %s6510_s10, 16, %s5399_s24, [#allocation9]  }
  0x3d   : > { %s5089_s23 = scalar_lea.hbm %s6512_s12, 16 }
  0x3e   : > { %p5090_p11 = scmp.ne.s32.totalorder %s6512_s12, %s5089_s23  ;;  %p5096_p0 = scmp.lt.u32.totalorder %s5089_s23, %s6512_s12 }
  0x40   : > { %p5092_p12 = pnand %p5090_p11, %p5419_p7 }
  0x42   : > { %p5093_p13 = pneg %p5092_p12 }
  0x44   : > { %p5098_p1 = pnand %p5096_p0, %p5093_p13 }
  0x46   : > { %5101 = shalt.err (!%p5098_p1)
}
  0x47   : > { %s5102_s24 = scalar_lea.vmem %s5407_s26, 16  ;;  %s5109_s1 = scalar_lea.vmem %s5407_s26, 32 }
  0x48   : > { %p5103_p4 = scmp.ne.s32.totalorder %s5407_s26, %s5102_s24  ;;  %p5110_p9 = scmp.lt.s32.totalorder %s5407_s26, %s5407_s26 }
  0x49   : > { %p5111_p10 = scmp.lt.s32.totalorder %s5109_s1, %s5102_s24 }
  0x4a   : > { %p5105_p6 = pnand %p5103_p4, %p5419_p7 }
  0x4b   : > { %p5112_p11 = por %p5111_p10, %p5110_p9 }
  0x4c   : > { %p5106_p8 = pneg %p5105_p6 }
  0x4e   : > { %p5113_p12 = pnand %p5112_p11, %p5106_p8 }
  0x50   : > { %5116 = shalt.err (!%p5113_p12)
}
  0x51   : > { %4864 = dma.hbm_to_vmem [thread:$0]  (!%p5403_p5), %s6512_s12, 16, %s5407_s26, [#allocation12]  }
  0x52   : > { %s6527_s6 = sld [smem:[#allocation24_spill]] }
  0x58   : > { %s5117_s23 = scalar_lea.hbm %s6527_s6, 16 }
  0x59   : > { %p5118_p13 = scmp.ne.s32.totalorder %s6527_s6, %s5117_s23  ;;  %p5124_p4 = scmp.lt.u32.totalorder %s5117_s23, %s6527_s6 }
  0x5b   : > { %p5120_p0 = pnand %p5118_p13, %p5419_p7 }
  0x5d   : > { %p5121_p1 = pneg %p5120_p0 }
  0x5f   : > { %p5126_p6 = pnand %p5124_p4, %p5121_p1 }
  0x61   : > { %5129 = shalt.err (!%p5126_p6)
}
  0x62   : > { %s5130_s26 = scalar_lea.vmem %s5409_s29, 16  ;;  %s5137_s24 = scalar_lea.vmem %s5409_s29, 32 }
  0x63   : > { %p5131_p8 = scmp.ne.s32.totalorder %s5409_s29, %s5130_s26  ;;  %p5138_p11 = scmp.lt.s32.totalorder %s5409_s29, %s5409_s29 }
  0x64   : > { %p5139_p12 = scmp.lt.s32.totalorder %s5137_s24, %s5130_s26 }
  0x65   : > { %p5133_p9 = pnand %p5131_p8, %p5419_p7 }
  0x66   : > { %p5140_p13 = por %p5139_p12, %p5138_p11 }
  0x67   : > { %p5134_p10 = pneg %p5133_p9 }
  0x69   : > { %p5141_p0 = pnand %p5140_p13, %p5134_p10 }
  0x6b   : > { %5144 = shalt.err (!%p5141_p0)
}
  0x6c   : > { %4849 = dma.hbm_to_vmem [thread:$0]  (!%p5403_p5), %s6527_s6, 16, %s5409_s29, [#allocation4]  }
  0x6d   : > { %s5289_s18 = smov [#allocation7]   ;;  %s5145_s28 = scalar_lea.hbm %s6509_s9, 256 }
  0x6e   : > { %s435_s17 = sshll.u32 %s5289_s18, 4  ;;  %p5146_p1 = scmp.ne.s32.totalorder %s6509_s9, %s5145_s28  ;;  %s436_s17 = int_to_ptr.vmem [resolvable:$true] %s435_s17 }
  0x6f   : > { %p5152_p8 = scmp.lt.u32.totalorder %s5145_s28, %s6509_s9 }
  0x70   : > { %p5148_p4 = pnand %p5146_p1, %p5419_p7 }
  0x72   : > { %p5149_p6 = pneg %p5148_p4 }
  0x74   : > { %p5154_p9 = pnand %p5152_p8, %p5149_p6 }
  0x76   : > { %5157 = shalt.err (!%p5154_p9)
}
  0x77   : > { %s5158_s29 = scalar_lea.vmem %s436_s17, 256  ;;  %p5166_p13 = scmp.lt.s32.totalorder %s436_s17, %s436_s17 }
  0x78   : > { %p5159_p10 = scmp.ne.s32.totalorder %s436_s17, %s5158_s29  ;;  %p5167_p0 = scmp.lt.s32.totalorder %s5158_s29, %s5158_s29 }
  0x7a   : > { %p5161_p11 = pnand %p5159_p10, %p5419_p7  ;;  %p5168_p2 = por %p5167_p0, %p5166_p13 }
  0x7c   : > { %p5162_p12 = pneg %p5161_p11 }
  0x7e   : > { %p5169_p3 = pnand %p5168_p2, %p5162_p12 }
  0x80   : > { %5172 = shalt.err (!%p5169_p3)
}
  0x81   : > { %s5290_s24 = smov 64   ;;  %s5291_s1 = smov 4  }
  0x82   : > { %4855 = dma.hbm_to_vmem [thread:$0]  (!%p5403_p5), %s6509_s9, 256, %s436_s17, [#allocation6], %s5290_s24, %s5290_s24, %s5291_s1  }
  0x83   : > { %s5292_s19 = smov [#allocation10]   ;;  %s5293_s28 = smov [#allocation13]  }
  0x84   : > { %s460_s23 = sshll.u32 %s5292_s19, 4  ;;  %s481_s30 = sshll.u32 %s5293_s28, 4  ;;  %s461_s23 = int_to_ptr.vmem [resolvable:$true] %s460_s23  ;;  %s5534_s30 = int_to_ptr.vmem [resolvable:$true] %s481_s30 }
  0x85   : > { %s5173_s26 = scalar_lea.hbm %s6511_s11, 16 }
  0x86   : > { %p5174_p2 = scmp.ne.s32.totalorder %s6511_s11, %s5173_s26  ;;  %p5180_p4 = scmp.lt.u32.totalorder %s5173_s26, %s6511_s11 }
  0x88   : > { %p5176_p3 = pnand %p5174_p2, %p5419_p7 }
  0x8a   : > { %p5177_p1 = pneg %p5176_p3 }
  0x8c   : > { %p5182_p6 = pnand %p5180_p4, %p5177_p1 }
  0x8e   : > { %5185 = shalt.err (!%p5182_p6)
}
  0x8f   : > { %s5186_s18 = scalar_lea.vmem %s461_s23, 16  ;;  %s5193_s19 = scalar_lea.vmem %s461_s23, 32 }
  0x90   : > { %p5187_p8 = scmp.ne.s32.totalorder %s461_s23, %s5186_s18  ;;  %p5194_p11 = scmp.lt.s32.totalorder %s461_s23, %s461_s23 }
  0x91   : > { %p5195_p12 = scmp.lt.s32.totalorder %s5193_s19, %s5186_s18 }
  0x92   : > { %p5189_p9 = pnand %p5187_p8, %p5419_p7 }
  0x93   : > { %p5196_p13 = por %p5195_p12, %p5194_p11 }
  0x94   : > { %p5190_p10 = pneg %p5189_p9 }
  0x96   : > { %p5197_p0 = pnand %p5196_p13, %p5190_p10 }
  0x98   : > { %5200 = shalt.err (!%p5197_p0)
}
  0x99   : > { %4861 = dma.hbm_to_vmem [thread:$0]  (!%p5403_p5), %s6511_s11, 16, %s461_s23, [#allocation9]  }
  0x9a   : > { %s5201_s26 = scalar_lea.hbm %s6513_s13, 2304 }
  0x9b   : > { %p5202_p2 = scmp.ne.s32.totalorder %s6513_s13, %s5201_s26  ;;  %p5208_p4 = scmp.lt.u32.totalorder %s5201_s26, %s6513_s13 }
  0x9d   : > { %p5204_p3 = pnand %p5202_p2, %p5419_p7 }
  0x9f   : > { %p5205_p1 = pneg %p5204_p3 }
  0xa1   : > { %p5210_p6 = pnand %p5208_p4, %p5205_p1 }
  0xa3   : > { %5213 = shalt.err (!%p5210_p6)
}
  0xa4   : > { %s5214_s23 = scalar_lea.vmem %s5534_s30, 2304  ;;  %p5222_p11 = scmp.lt.s32.totalorder %s5534_s30, %s5534_s30 }
  0xa5   : > { %p5215_p8 = scmp.ne.s32.totalorder %s5534_s30, %s5214_s23  ;;  %p5223_p12 = scmp.lt.s32.totalorder %s5214_s23, %s5214_s23 }
  0xa7   : > { %p5217_p9 = pnand %p5215_p8, %p5419_p7  ;;  %p5224_p13 = por %p5223_p12, %p5222_p11 }
  0xa9   : > { %p5218_p10 = pneg %p5217_p9 }
  0xab   : > { %p5225_p0 = pnand %p5224_p13, %p5218_p10 }
  0xad   : > { %5228 = shalt.err (!%p5225_p0)
}
  0xae   : > { %4867 = dma.hbm_to_vmem [thread:$0]  (!%p5403_p5), %s6513_s13, 2304, %s5534_s30, [#allocation12], %s5290_s24, %s5290_s24, %s5291_s1  }
  0xaf   : > { %s5294_s28 = smov [#allocation14]   ;;  %s5229_s29 = scalar_lea.hbm %s6514_s14, 16 }
  0xb0   : > { %s495_s16 = sshll.u32 %s5294_s28, 4  ;;  %p5230_p2 = scmp.ne.s32.totalorder %s6514_s14, %s5229_s29  ;;  %s496_s16 = int_to_ptr.vmem [resolvable:$true] %s495_s16 }
  0xb1   : > { %p5236_p4 = scmp.lt.u32.totalorder %s5229_s29, %s6514_s14 }
  0xb2   : > { %p5232_p3 = pnand %p5230_p2, %p5419_p7 }
  0xb4   : > { %p5233_p1 = pneg %p5232_p3 }
  0xb6   : > { %p5238_p6 = pnand %p5236_p4, %p5233_p1 }
  0xb8   : > { %5241 = shalt.err (!%p5238_p6)
}
  0xb9   : > { %s5242_s24 = scalar_lea.vmem %s496_s16, 16  ;;  %s5249_s1 = scalar_lea.vmem %s496_s16, 32 }
  0xba   : > { %p5243_p8 = scmp.ne.s32.totalorder %s496_s16, %s5242_s24  ;;  %p5250_p11 = scmp.lt.s32.totalorder %s496_s16, %s496_s16 }
  0xbb   : > { %p5251_p12 = scmp.lt.s32.totalorder %s5249_s1, %s5242_s24 }
  0xbc   : > { %p5245_p9 = pnand %p5243_p8, %p5419_p7 }
  0xbd   : > { %p5252_p13 = por %p5251_p12, %p5250_p11 }
  0xbe   : > { %p5246_p10 = pneg %p5245_p9 }
  0xc0   : > { %p5253_p0 = pnand %p5252_p13, %p5246_p10 }
  0xc2   : > { %5256 = shalt.err (!%p5253_p0)
}
  0xc3   : > { %4870 = dma.hbm_to_vmem [thread:$0]  (!%p5403_p5), %s6514_s14, 16, %s496_s16, [#allocation15]  }
  0xc4   : > { %p6528_p2 = scmp.ne.s32.totalorder %s6524_s22, 0 }
  0xc6   : > { %522 = sbr.rel (%p6528_p2) target bundleno = 2864 (0xb30), region = 80 }
  0xcd   : > { %p6529_p3 = scmp.eq.s32.totalorder %s5386_s21, 0 }
  0xcf   : > { %5262 = dma.done.wait (%p6529_p3), [#allocation4], 16   ;;  %p6530_p7 = pmov %p6529_p3 }
  0xd0   : > { %p6531_p1 = pmov %p6529_p3 }
  0xd1   : > { %5264 = vsyncadd (%p6530_p7), [#allocation4], 4294967280 }
  0xd2   : > { %5266 = dma.done.wait (%p6531_p1), [#allocation6], 272   ;;  %p6532_p4 = pmov %p6531_p1 }
  0xd3   : > { %p6533_p6 = pmov %p6531_p1 }
  0xd4   : > { %5268 = vsyncadd (%p6532_p4), [#allocation6], 4294967024 }
  0xd5   : > { %5270 = dma.done.wait (%p6533_p6), [#allocation9], 32   ;;  %p6534_p5 = pmov %p6531_p1 }
  0xd6   : > { %p6535_p8 = pmov %p6531_p1 }
  0xd7   : > { %5272 = vsyncadd (%p6534_p5), [#allocation9], 4294967264 }
  0xd8   : > { %5274 = dma.done.wait (%p6535_p8), [#allocation12], 2320   ;;  %p6536_p9 = pmov %p6531_p1 }
  0xd9   : > { %p6537_p10 = pmov %p6531_p1 }
  0xda   : > { %5276 = vsyncadd (%p6536_p9), [#allocation12], 4294964976 }
  0xdb   : > { %5278 = dma.done.wait (%p6537_p10), [#allocation15], 16   ;;  %p6538_p11 = pmov %p6531_p1 }
  0xdc   : > { %p601_p12 = scmp.lt.s32.totalorder %s5386_s21, 1  ;;  %v5295_v0 = vmov 0.0|0.0   ;;  %vm5296_vm0 = vmmov 0   ;;  %v5297_v1 = vmov 0.0   ;;  %vm636_vm1 = vcmask 261120   ;;  %v623_v2 = vld [vmem:[%s6503_s3] sm:$0xff] }
  0xdd   : > { %5280 = vsyncadd (%p6538_p11), [#allocation15], 4294967280  ;;  %4662 = vmatprep.subr.bf16.mxu0 %v5295_v0  ;;  %4382 = vmatprep.mubr.msk.f32.mxu0 %vm5296_vm0, %v5297_v1  ;;  %637 = vst.msk [vmem:[#allocation2] sm:$0xff] %vm636_vm1, %v5297_v1  ;;  %v624_v3 = vld [vmem:[%s6503_s3 + $0x8] sm:$0xff]  ;;  %v625_v4 = vld [vmem:[%s6503_s3 + $0x10] sm:$0xff]  ;;  %vm746_vm2 = vcmask 64512   ;;  %v820_v41 = vlaneseq }
  0xde   : > { %s6550_s21 = smov (!%p601_p12, %s5386_s21), 1  ;;  %638 = vst.msk [vmem:[#allocation2 + $0x8] sm:$0xff] %vm636_vm1, %v5297_v1  ;;  %639 = vst.msk [vmem:[#allocation2 + $0x10] sm:$0xff] %vm636_vm1, %v5297_v1  ;;  %4385 = vmatprep.subr.mxu1 %v5297_v1  ;;  %4387 = vmatprep.mubr.msk.f32.mxu1 %vm5296_vm0, %v5297_v1  ;;  %v5671_v5 = vpack.c.bf16 %v624_v3, %v623_v2  ;;  %v626_v6 = vld [vmem:[%s6503_s3 + $0x18] sm:$0xff]  ;;  %v5704_v37 = vld [vmem:[%s6504_s4] sm:$0xff]  ;;  %s6539_s17 = sld [smem:[#allocation23_spill]] }
  0xdf   : > { %640 = vst.msk [vmem:[#allocation2 + $0x18] sm:$0xff] %vm636_vm1, %v5297_v1  ;;  %641 = vst.msk [vmem:[#allocation2 + $0x20] sm:$0xff] %vm636_vm1, %v5297_v1  ;;  %s4233_s22 = sshll.u32 %s6550_s21, 6  ;;  %v5684_v14 = vpack.c.bf16 %v626_v6, %v625_v4  ;;  %4386 = vmatpush3.msra.mxu1 %v5704_v37  ;;  %v821_v42 = vshrl.u32 %v820_v41, 7  ;;  %s6547_s19 = sld [smem:[#allocation25_spill]] }
  0xe0   : > { %642 = vst.msk [vmem:[#allocation2 + $0x28] sm:$0xff] %vm636_vm1, %v5297_v1  ;;  %643 = vst.msk [vmem:[#allocation2 + $0x30] sm:$0xff] %vm636_vm1, %v5297_v1  ;;  %s5660_s6 = scalar_lea.vmem %s6500_s0, %s4233_s22  ;;  %4664 = vmatpush3.bf16.msra.mxu0 %v5671_v5  ;;  %4668 = vmatprep.subr.bf16.mxu1 %v5295_v0 }
  0xe1   : > { %644 = vst.msk [vmem:[#allocation2 + $0x38] sm:$0xff] %vm636_vm1, %v5297_v1  ;;  %645 = vst.msk [vmem:[#allocation2 + $0x40] sm:$0xff] %vm636_vm1, %v5297_v1  ;;  %v615_v7 = vld [vmem:[%s5660_s6] sm:$0xff]  ;;  %v616_v8 = vld [vmem:[%s5660_s6 + $0x8] sm:$0xff]  ;;  %4665 = vmatprep.subr.bf16.mxu0 %v5295_v0  ;;  %v5716_v43 = vsub.s32 0, %v821_v42 }
  0xe2   : > { %646 = vst.msk [vmem:[#allocation2 + $0x48] sm:$0xff] %vm636_vm1, %v5297_v1  ;;  %647 = vst.msk [vmem:[#allocation2 + $0x50] sm:$0xff] %vm636_vm1, %v5297_v1  ;;  %v617_v9 = vld [vmem:[%s5660_s6 + $0x10] sm:$0xff]  ;;  %v618_v10 = vld [vmem:[%s5660_s6 + $0x18] sm:$0xff]  ;;  %v651_v12 = vsel %vm636_vm1, %v615_v7, 0.0  ;;  %v652_v13 = vsel %vm636_vm1, %v616_v8, 0.0 }
  0xe3   : > { %648 = vst.msk [vmem:[#allocation2 + $0x58] sm:$0xff] %vm636_vm1, %v5297_v1  ;;  %v619_v11 = vld [vmem:[%s5660_s6 + $0x20] sm:$0xff]  ;;  %v620_v15 = vld [vmem:[%s5660_s6 + $0x28] sm:$0xff]  ;;  %v621_v16 = vld [vmem:[%s5660_s6 + $0x30] sm:$0xff]  ;;  %v653_v18 = vadd.f32 %v652_v13, %v651_v12  ;;  %v654_v19 = vsel %vm636_vm1, %v617_v9, 0.0  ;;  %v656_v20 = vsel %vm636_vm1, %v618_v10, 0.0 }
  0xe4   : > { %v622_v17 = vld [vmem:[%s5660_s6 + $0x38] sm:$0xff]  ;;  %v658_v21 = vsel %vm636_vm1, %v619_v11, 0.0  ;;  %v660_v22 = vsel %vm636_vm1, %v620_v15, 0.0  ;;  %v662_v23 = vsel %vm636_vm1, %v621_v16, 0.0  ;;  %4667 = vmatpush3.bf16.msra.mxu0 %v5684_v14  ;;  %s608_s18 = scalar_lea.vmem %s6539_s17, %s6550_s21 }
  0xe5   : > { %v664_v24 = vsel %vm636_vm1, %v622_v17, 0.0  ;;  %v655_v25 = vadd.f32 %v654_v19, %v653_v18  ;;  %4401 = vmatprep.subr.mxu0 %v5297_v1  ;;  %s6471_s27 = scalar_lea.vmem %s6547_s19, %s4233_s22 }
  0xe7   : > { %v657_v26 = vadd.f32 %v656_v20, %v655_v25  ;;  %v628_v25 = vld [vmem:[%s6502_s2] sm:$0xff] }
  0xe9   : > { %v659_v27 = vadd.f32 %v658_v21, %v657_v26  ;;  %v5298_v26 = vmov 0  }
  0xea   : > { %4911 = vset.pattern.permute.xlu1 %v5298_v26  ;;  %4910 = vset.pattern.permute.xlu0 %v5298_v26 }
  0xeb   : > { %v661_v28 = vadd.f32 %v660_v22, %v659_v27  ;;  %1124 = vperm.xlu0 %4910, %v628_v25   ;;  %v631_v27 = vld [vmem:[%s6502_s2 + $0x18] sm:$0xff] }
  0xed   : > { %v663_v29 = vadd.f32 %v662_v23, %v661_v28  ;;  %v629_v28 = vld [vmem:[%s6502_s2 + $0x8] sm:$0xff] }
  0xef   : > { %v665_v30 = vadd.f32 %v664_v24, %v663_v29  ;;  %v630_v24 = vld [vmem:[%s6502_s2 + $0x10] sm:$0xff]  ;;  %1129 = vperm.xlu0 %4910, %v629_v28   ;;  %v633_v29 = vld [vmem:[%s6502_s2 + $0x28] sm:$0xff] }
  0xf0   : > { %1134 = vperm.xlu1 %4911, %v630_v24  }
  0xf1   : > { %v666_v31 = vrot.slane %v665_v30, 4 }
  0xf3   : > { %v667_v32 = vadd.f32 %v666_v31, %v665_v30  ;;  %v632_v30 = vld [vmem:[%s6502_s2 + $0x20] sm:$0xff]  ;;  %v635_v31 = vld [vmem:[%s6502_s2 + $0x38] sm:$0xff] }
  0xf4   : > { %1139 = vperm.xlu1 %4911, %v631_v27   ;;  %1144 = vperm.xlu0 %4910, %v632_v30  }
  0xf5   : > { %v668_v33 = vrot.slane %v667_v32, 2 }
  0xf7   : > { %v669_v34 = vadd.f32 %v668_v33, %v667_v32  ;;  %v634_v32 = vld [vmem:[%s6502_s2 + $0x30] sm:$0xff]  ;;  %v5299_v33 = vmov 1  }
  0xf8   : > { %1149 = vperm.xlu1 %4911, %v633_v29   ;;  %1154 = vperm.xlu0 %4910, %v634_v32  }
  0xf9   : > { %v670_v35 = vrot.slane %v669_v34, 1 }
  0xfb   : > { %v671_v36 = vadd.f32 %v670_v35, %v669_v34 }
  0xfc   : > { %1159 = vperm.xlu1 %4911, %v635_v31   ;;  %4912 = vset.pattern.permute.xlu0 %v5299_v33 }
  0xfd   : > { %4383 = vmatmul.mubr.msk.f32.vlgmr.msra.gmra.mrb[0].mxu0 %vm636_vm1, %v671_v36  ;;  %1382 = vperm.xlu0 %4912, %v628_v25  }
  0xfe   : > { %4403 = vmatprep.mubr.msk.f32.mxu0 %vm5296_vm0, %v5297_v1  ;;  %4402 = vmatpush3.msra.mxu0 %v5704_v37 }
  0xff   : > { %4514 = vmatprep.subr.bf16.mxu0 %v5297_v1 }
 0x100   : > { %4913 = vset.pattern.permute.xlu1 %v5299_v33 }
 0x101   : > { %1386 = vperm.xlu1 %4913, %v629_v28   ;;  %1394 = vperm.xlu0 %4912, %v631_v27  }
 0x105   : > { %1390 = vperm.xlu1 %4913, %v630_v24   ;;  %1402 = vperm.xlu0 %4912, %v633_v29  }
 0x109   : > { %1398 = vperm.xlu1 %4913, %v632_v30   ;;  %1410 = vperm.xlu0 %4912, %v635_v31  }
 0x10d   : > { %1406 = vperm.xlu1 %4913, %v634_v32  }
 0x1d0   : > { %v741_v38 = vpop.f32.mrb[0].mxu0 }
 0x1d1   : > { %v745_v39 = vmul.f32 0.00390625, %v741_v38  ;;  %v4384_v40 = vpop.f32.mrb[1].mxu0  ;;  %v4914_v38 = vld [vmem:[%s6507_s7 + $0x10] sm:$0xff]  }
 0x1d2   : > { %v5796_v40 = vld [vmem:[%s6507_s7] sm:$0xff]  }
 0x1d3   : > { %4388 = vmatmul.mubr.msk.f32.vlgmr.msra.gmra.mrb[0].mxu1 %vm746_vm2, %v745_v39  ;;  %v4915_v39 = vld [vmem:[%s6507_s7 + $0x18] sm:$0xff]  }
 0x1d4   : > { %4670 = vmatpush3.bf16.msra.mxu1 %v5671_v5  ;;  %4398 = vmatprep.mubr.msk.f32.mxu1 %vm5296_vm0, %v5297_v1 }
 0x1d5   : > { %4671 = vmatprep.subr.bf16.mxu1 %v5295_v0 }
 0x1d8   : > { %4673 = vmatpush3.bf16.msra.mxu1 %v5684_v14 }
 0x1d9   : > { %4406 = vmatprep.subr.bf16.mxu1 %v4914_v38 }
 0x2a6   : > { %v816_v44 = vpop.f32.mrb[0].mxu1 }
 0x2a7   : > { %v823_v45 = vrot.slane %v816_v44, %v5716_v43  ;;  %v4389_v46 = vpop.f32.mrb[1].mxu1 }
 0x2a9   : > { %v5719_v47 = vsub.f32 %v615_v7, %v823_v45  ;;  %v5721_v48 = vsub.f32 %v616_v8, %v823_v45  ;;  %v5723_v49 = vsub.f32 %v617_v9, %v823_v45  ;;  %v5725_v50 = vsub.f32 %v618_v10, %v823_v45 }
 0x2aa   : > { %v5727_v51 = vsub.f32 %v619_v11, %v823_v45  ;;  %v5735_v55 = vsub.f32 %v620_v15, %v823_v45  ;;  %v5741_v60 = vsub.f32 %v621_v16, %v823_v45  ;;  %v5746_v2 = vsub.f32 %v622_v17, %v823_v45 }
 0x2ab   : > { %v832_v52 = vmul.f32 %v5719_v47, %v5719_v47  ;;  %v833_v53 = vmul.f32 %v5721_v48, %v5721_v48  ;;  %v834_v54 = vmul.f32 %v5723_v49, %v5723_v49  ;;  %v835_v56 = vmul.f32 %v5725_v50, %v5725_v50 }
 0x2ac   : > { %v836_v61 = vmul.f32 %v5727_v51, %v5727_v51  ;;  %v837_v3 = vmul.f32 %v5735_v55, %v5735_v55  ;;  %v838_v7 = vmul.f32 %v5741_v60, %v5741_v60  ;;  %v839_v10 = vmul.f32 %v5746_v2, %v5746_v2 }
 0x2ad   : > { %v840_v57 = vsel %vm636_vm1, %v832_v52, 0.0  ;;  %v841_v58 = vsel %vm636_vm1, %v833_v53, 0.0  ;;  %v843_v62 = vsel %vm636_vm1, %v834_v54, 0.0  ;;  %v845_v4 = vsel %vm636_vm1, %v835_v56, 0.0  ;;  %v4061_v52 = vld [vmem:[%s6505_s5] ss:$0 sm:$0xff] }
 0x2ae   : > { %v842_v59 = vadd.f32 %v841_v58, %v840_v57  ;;  %v847_v8 = vsel %vm636_vm1, %v836_v61, 0.0  ;;  %v849_v11 = vsel %vm636_vm1, %v837_v3, 0.0  ;;  %v851_v13 = vsel %vm636_vm1, %v838_v7, 0.0  ;;  %v4062_v58 = vld [vmem:[#allocation3] ss:$0 sm:$0xff] }
 0x2af   : > { %v853_v16 = vsel %vm636_vm1, %v839_v10, 0.0 }
 0x2b0   : > { %v844_v63 = vadd.f32 %v843_v62, %v842_v59 }
 0x2b2   : > { %v846_v6 = vadd.f32 %v845_v4, %v844_v63 }
 0x2b4   : > { %v848_v9 = vadd.f32 %v847_v8, %v846_v6 }
 0x2b6   : > { %v850_v12 = vadd.f32 %v849_v11, %v848_v9 }
 0x2b8   : > { %v852_v15 = vadd.f32 %v851_v13, %v850_v12 }
 0x2ba   : > { %v854_v17 = vadd.f32 %v853_v16, %v852_v15 }
 0x2bc   : > { %v855_v18 = vrot.slane %v854_v17, 4 }
 0x2be   : > { %v856_v19 = vadd.f32 %v855_v18, %v854_v17 }
 0x2c0   : > { %v857_v20 = vrot.slane %v856_v19, 2 }
 0x2c2   : > { %v858_v21 = vadd.f32 %v857_v20, %v856_v19 }
 0x2c4   : > { %v859_v22 = vrot.slane %v858_v21, 1 }
 0x2c6   : > { %v860_v23 = vadd.f32 %v859_v22, %v858_v21 }
 0x2c8   : > { %4399 = vmatmul.mubr.msk.f32.vlgmr.msra.gmra.mrb[2].mxu1 %vm636_vm1, %v860_v23 }
 0x2c9   : > { %4407 = vmatpush3.bf16.msra.mxu1 %v4914_v38 }
 0x2ca   : > { %4408 = vmatprep.subr.bf16.mxu1 %v4915_v39 }
 0x2cd   : > { %4409 = vmatpush3.bf16.msra.mxu1 %v4915_v39 }
 0x2ce   : > { %4418 = vmatprep.subr.bf16.mxu1 %v5796_v40 }
 0x39b   : > { %v930_v34 = vpop.f32.mrb[2].mxu1 }
 0x39c   : > { %v934_v35 = vmul.f32 0.00390625, %v930_v34  ;;  %v4400_v36 = vpop.f32.mrb[3].mxu1 }
 0x39e   : > { %4404 = vmatmul.mubr.msk.f32.vlgmr.msra.gmra.mrb[2].mxu0 %vm746_vm2, %v934_v35 }
 0x39f   : > { %4518 = vmatprep.mubr.msk.bf16.mxu0 %vm5296_vm0, %v5297_v1 }
 0x471   : > { %v1004_v41 = vpop.f32.mrb[2].mxu0 }
 0x472   : > { %v1005_v42 = vadd.f32 1e-06, %v1004_v41  ;;  %v4405_v44 = vpop.f32.mrb[3].mxu0 }
 0x474   : > { %4952 = vrsqrt.f32 %v1005_v42  ;;  %v4932_v42 = vld [vmem:[#allocation7] sm:$0xff]  }
 0x475   : > { %4515 = vmatpush3.bf16.msra.mxu0 %v4932_v42 }
 0x476   : > { %4516 = vmatprep.subr.bf16.mxu0 %v5297_v1 }
 0x47e   : > { %v4953_v45 = vpop.eup %4952 }
 0x47f   : > { %v1012_v46 = vrot.slane %v4953_v45, %v5716_v43 }
 0x481   : > { %v1013_v53 = vmul.f32 %v1012_v46, %v5719_v47  ;;  %v1014_v54 = vmul.f32 %v1012_v46, %v5721_v48  ;;  %v1015_v56 = vmul.f32 %v1012_v46, %v5723_v49  ;;  %v1016_v57 = vmul.f32 %v1012_v46, %v5725_v50 }
 0x482   : > { %v1017_v59 = vmul.f32 %v1012_v46, %v5727_v51  ;;  %v1018_v61 = vmul.f32 %v1012_v46, %v5735_v55  ;;  %v1019_v62 = vmul.f32 %v1012_v46, %v5741_v60  ;;  %v1020_v63 = vmul.f32 %v1012_v46, %v5746_v2 }
 0x483   : > { %v1027_v3 = vmul.f32 %v4061_v52, %v1013_v53  ;;  %v1028_v4 = vmul.f32 %v4061_v52, %v1014_v54  ;;  %v1029_v6 = vmul.f32 %v4061_v52, %v1015_v56  ;;  %v1030_v7 = vmul.f32 %v4061_v52, %v1016_v57  ;;  %v5822_v56 = vpop.permute.xlu1 %1134  ;;  %v5824_v57 = vpop.permute.xlu0 %1124 }
 0x484   : > { %v1031_v47 = vmul.f32 %v4061_v52, %v1017_v59  ;;  %v1032_v8 = vmul.f32 %v4061_v52, %v1018_v61  ;;  %v1033_v48 = vmul.f32 %v4061_v52, %v1019_v62  ;;  %v1034_v9 = vmul.f32 %v4061_v52, %v1020_v63 }
 0x485   : > { %v1041_v49 = vadd.f32 %v4062_v58, %v1027_v3  ;;  %v1042_v10 = vadd.f32 %v4062_v58, %v1028_v4  ;;  %v1043_v50 = vadd.f32 %v4062_v58, %v1029_v6  ;;  %v1044_v11 = vadd.f32 %v4062_v58, %v1030_v7  ;;  %v5838_v6 = vld [vmem:[#allocation2 + $0x8] sm:$0xff] }
 0x486   : > { %v1045_v12 = vadd.f32 %v4062_v58, %v1031_v47  ;;  %v5811_v51 = vadd.f32 %v4062_v58, %v1032_v8  ;;  %v5813_v55 = vadd.f32 %v4062_v58, %v1033_v48  ;;  %v5815_v15 = vadd.f32 %v4062_v58, %v1034_v9  ;;  %v4933_v7 = vld [vmem:[#allocation7 + $0x8] sm:$0xff]   ;;  %v5841_v47 = vld [vmem:[%s608_s18] sm:$0x1] }
 0x487   : > { %v4063_v60 = vmul.f32 -1.442695, %v1041_v49  ;;  %v4064_v13 = vmul.f32 -1.442695, %v1042_v10  ;;  %v4065_v2 = vmul.f32 -1.442695, %v1043_v50  ;;  %v5843_v8 = vpop.permute.xlu1 %1139  ;;  %v5845_v48 = vpop.permute.xlu0 %1129  ;;  %4517 = vmatpush3.bf16.msra.mxu0 %v4933_v7 }
 0x488   : > { %v4066_v16 = vmul.f32 -1.442695, %v1044_v11  ;;  %v4067_v17 = vmul.f32 -1.442695, %v1045_v12  ;;  %v4068_v18 = vmul.f32 -1.442695, %v5811_v51  ;;  %4674 = vmatprep.subr.bf16.mxu0 %v5295_v0 }
 0x489   : > { %4954 = vpow2.f32 %v4063_v60  ;;  %v4069_v19 = vmul.f32 -1.442695, %v5813_v55  ;;  %v4070_v20 = vmul.f32 -1.442695, %v5815_v15 }
 0x48a   : > { %4956 = vpow2.f32 %v4064_v13  ;;  %v1114_v13 = vld [vmem:[#allocation2 + $0x7] sm:$0xff] }
 0x48b   : > { %4958 = vpow2.f32 %v4065_v2 }
 0x48c   : > { %4960 = vpow2.f32 %v4066_v16  ;;  %v5876_v16 = vpop.permute.xlu0 %1144 }
 0x48d   : > { %4962 = vpow2.f32 %v4067_v17 }
 0x48e   : > { %4964 = vpow2.f32 %v4068_v18  ;;  %v4918_v18 = vld [vmem:[%s6507_s7 + $0x20] sm:$0xff]  }
 0x48f   : > { %4966 = vpow2.f32 %v4069_v19 }
 0x490   : > { %4968 = vpow2.f32 %v4070_v20 }
 0x493   : > { %v4955_v21 = vpop.eup %4954 }
 0x494   : > { %v4957_v22 = vpop.eup %4956  ;;  %v1073_v23 = vadd.f32 1.0, %v4955_v21  ;;  %v5893_v21 = vmul.f32 %v5824_v57, %v1114_v13 }
 0x495   : > { %v4959_v24 = vpop.eup %4958  ;;  %v1074_v25 = vadd.f32 1.0, %v4957_v22 }
 0x496   : > { %v4961_v26 = vpop.eup %4960  ;;  %v1075_v27 = vadd.f32 1.0, %v4959_v24  ;;  %4970 = vrcp.f32 %v1073_v23 }
 0x497   : > { %v4963_v28 = vpop.eup %4962  ;;  %v1076_v29 = vadd.f32 1.0, %v4961_v26  ;;  %4972 = vrcp.f32 %v1074_v25  ;;  %v5907_v26 = vpop.permute.xlu0 %1154 }
 0x498   : > { %v4965_v30 = vpop.eup %4964  ;;  %v1077_v31 = vadd.f32 1.0, %v4963_v28  ;;  %4974 = vrcp.f32 %v1075_v27 }
 0x499   : > { %v4967_v32 = vpop.eup %4966  ;;  %v1078_v33 = vadd.f32 1.0, %v4965_v30  ;;  %4976 = vrcp.f32 %v1076_v29 }
 0x49a   : > { %v4969_v34 = vpop.eup %4968  ;;  %v1079_v35 = vadd.f32 1.0, %v4967_v32  ;;  %4978 = vrcp.f32 %v1077_v31 }
 0x49b   : > { %v1080_v36 = vadd.f32 1.0, %v4969_v34  ;;  %4980 = vrcp.f32 %v1078_v33 }
 0x49c   : > { %4982 = vrcp.f32 %v1079_v35 }
 0x49d   : > { %4984 = vrcp.f32 %v1080_v36  ;;  %v5927_v36 = vpop.permute.xlu0 %1382 }
 0x4a0   : > { %v4971_v38 = vpop.eup %4970 }
 0x4a1   : > { %v4973_v39 = vpop.eup %4972  ;;  %v1097_v41 = vmul.f32 %v4971_v38, %v1041_v49 }
 0x4a2   : > { %v4975_v44 = vpop.eup %4974  ;;  %v1098_v45 = vmul.f32 %v4973_v39, %v1042_v10  ;;  %v4919_v39 = vld [vmem:[%s6507_s7 + $0x28] sm:$0xff]  }
 0x4a3   : > { %v4977_v46 = vpop.eup %4976  ;;  %v1099_v52 = vmul.f32 %v4975_v44, %v1043_v50  ;;  %1106 = vst.msk [vmem:[#allocation2 + $0x10] sm:$0xff] %vm636_vm1, %v1097_v41 }
 0x4a4   : > { %v4979_v53 = vpop.eup %4978  ;;  %v1100_v54 = vmul.f32 %v4977_v46, %v1044_v11  ;;  %1107 = vst.msk [vmem:[#allocation2 + $0x18] sm:$0xff] %vm636_vm1, %v1098_v45  ;;  %v4158_v11 = vmul.f32 -1.442695, %v5841_v47 }
 0x4a5   : > { %v4981_v58 = vpop.eup %4980  ;;  %v1101_v59 = vmul.f32 %v4979_v53, %v1045_v12  ;;  %1108 = vst.msk [vmem:[#allocation2 + $0x20] sm:$0xff] %vm636_vm1, %v1099_v52 }
 0x4a6   : > { %v4983_v61 = vpop.eup %4982  ;;  %v1102_v62 = vmul.f32 %v4981_v58, %v5811_v51  ;;  %1109 = vst.msk [vmem:[#allocation2 + $0x28] sm:$0xff] %vm636_vm1, %v1100_v54  ;;  %4986 = vpow2.f32 %v4158_v11  ;;  %v4920_v58 = vld [vmem:[%s6507_s7 + $0x30] sm:$0xff]  }
 0x4a7   : > { %v4985_v63 = vpop.eup %4984  ;;  %v1103_v3 = vmul.f32 %v4983_v61, %v5813_v55  ;;  %1110 = vst.msk [vmem:[#allocation2 + $0x30] sm:$0xff] %vm636_vm1, %v1101_v59  ;;  %v4917_v55 = vld [vmem:[%s6507_s7 + $0x8] sm:$0xff]   ;;  %v5949_v61 = vpop.permute.xlu0 %1394 }
 0x4a8   : > { %1111 = vst.msk [vmem:[#allocation2 + $0x38] sm:$0xff] %vm636_vm1, %v1102_v62  ;;  %v1104_v4 = vmul.f32 %v4985_v63, %v5815_v15  ;;  %v5874_v15 = vpop.permute.xlu1 %1149 }
 0x4a9   : > { %1112 = vst.msk [vmem:[#allocation2 + $0x40] sm:$0xff] %vm636_vm1, %v1103_v3 }
 0x4aa   : > { %1113 = vst.msk [vmem:[#allocation2 + $0x48] sm:$0xff] %vm636_vm1, %v1104_v4  ;;  %v5848_v9 = vld [vmem:[#allocation2 + $0x10] sm:$0xff] }
 0x4ab   : > { %v1186_v49 = vpack.c.bf16 %v5848_v9, %v5838_v6  ;;  %v5852_v10 = vld [vmem:[#allocation2 + $0x18] sm:$0xff]  ;;  %v5872_v2 = vld [vmem:[#allocation2 + $0xf] sm:$0xff] }
 0x4ac   : > { %v5855_v50 = vld [vmem:[#allocation2 + $0x20] sm:$0xff]  ;;  %v5901_v23 = vld [vmem:[#allocation2 + $0x17] sm:$0xff]  ;;  %v5905_v25 = vpop.permute.xlu1 %1159  ;;  %v1373_v46 = vld [vmem:[#allocation2 + $0x9] sm:$0xff] }
 0x4ad   : > { %4410 = vmatprep.mubr.msk.bf16.mxu1 %vm636_vm1, %v1186_v49  ;;  %v5861_v12 = vpack.c.bf16 %v5855_v50, %v5852_v10  ;;  %v5863_v51 = vld [vmem:[#allocation2 + $0x28] sm:$0xff]  ;;  %v5903_v24 = vld [vmem:[#allocation2 + $0x1f] sm:$0xff]  ;;  %v1164_v30 = vmul.f32 %v5822_v56, %v5901_v23  ;;  %v5937_v52 = vld [vmem:[#allocation2 + $0x11] sm:$0xff]  ;;  %v1413_v62 = vmul.f32 %v5927_v36, %v1373_v46 }
 0x4ae   : > { %v5868_v60 = vld [vmem:[#allocation2 + $0x30] sm:$0xff]  ;;  %v5910_v28 = vld [vmem:[#allocation2 + $0x27] sm:$0xff]  ;;  %v1165_v31 = vmul.f32 %v5903_v24, %v5843_v8  ;;  %v5954_v4 = vld [vmem:[#allocation2 + $0x19] sm:$0xff] }
 0x4af   : > { %4411 = vmatmul.mubr.msk.bf16.vlgmr.msra.gmra.mrb[4].mxu1 %vm636_vm1, %v5861_v12  ;;  %v5881_v17 = vpack.c.bf16 %v5868_v60, %v5863_v51  ;;  %v5888_v19 = vld [vmem:[#allocation2 + $0x38] sm:$0xff]  ;;  %v5912_v29 = vld [vmem:[#allocation2 + $0x2f] sm:$0xff]  ;;  %v1166_v33 = vmul.f32 %v5910_v28, %v5876_v16  ;;  %v5956_v7 = vld [vmem:[#allocation2 + $0x21] sm:$0xff] }
 0x4b0   : > { %4419 = vmatpush3.bf16.msra.mxu1 %v5796_v40  ;;  %v5890_v20 = vld [vmem:[#allocation2 + $0x40] sm:$0xff]  ;;  %v1163_v40 = vmul.f32 %v5845_v48, %v5872_v2  ;;  %v4987_v32 = vpop.eup %4986  ;;  %v1167_v34 = vmul.f32 %v5912_v29, %v5874_v15  ;;  %v5925_v35 = vpop.permute.xlu1 %1386  ;;  %v1171_v38 = vpack.c.bf16 %v1165_v31, %v1164_v30  ;;  %v5932_v44 = vld [vmem:[#allocation2 + $0x37] sm:$0xff]  ;;  %v5958_v11 = vld [vmem:[#allocation2 + $0x29] sm:$0xff]  ;;  %v1416_v30 = vmul.f32 %v5956_v7, %v5949_v61 }
 0x4b1   : > { %4420 = vmatprep.subr.bf16.mxu1 %v4917_v55  ;;  %4414 = vmatprep.mubr.msk.bf16.mxu1 %vm636_vm1, %v5881_v17  ;;  %v5899_v22 = vpack.c.bf16 %v5890_v20, %v5888_v19  ;;  %v2261_v41 = vadd.f32 1.0, %v4987_v32  ;;  %v5934_v45 = vld [vmem:[#allocation2 + $0x3f] sm:$0xff]  ;;  %v1168_v53 = vmul.f32 %v5907_v26, %v5932_v44  ;;  %v1414_v63 = vmul.f32 %v5925_v35, %v5937_v52 }
 0x4b2   : > { %v1170_v27 = vpack.c.bf16 %v1163_v40, %v5893_v21  ;;  %v1172_v42 = vpack.c.bf16 %v1167_v34, %v1166_v33  ;;  %v1169_v54 = vmul.f32 %v5905_v25, %v5934_v45  ;;  %v5984_v46 = vld [vmem:[#allocation2 + $0x41] sm:$0xff] }
 0x4b3   : > { %4988 = vrcp.f32 %v2261_v41  ;;  %v1421_v49 = vpack.c.bf16 %v1414_v63, %v1413_v62  ;;  %v4922_v63 = vld [vmem:[%s6507_s7 + $0x40] sm:$0xff]  }
 0x4b4   : > { %4421 = vmatpush3.bf16.msra.mxu1 %v4917_v55  ;;  %v5947_v59 = vpop.permute.xlu1 %1390  ;;  %v1173_v3 = vpack.c.bf16 %v1169_v54, %v1168_v53  ;;  %v5960_v55 = vld [vmem:[#allocation2 + $0x31] sm:$0xff] }
 0x4b5   : > { %4430 = vmatprep.subr.bf16.mxu1 %v4918_v18 }
 0x4b7   : > { %4415 = vmatmul.mubr.msk.bf16.gmra.mrb[8].mxu1 %vm636_vm1, %v5899_v22 }
 0x4b8   : > { %4422 = vmatprep.mubr.msk.bf16.mxu1 %vm636_vm1, %v1170_v27  ;;  %v5963_v13 = vpop.permute.xlu1 %1398  ;;  %v1415_v27 = vmul.f32 %v5947_v59, %v5954_v4 }
 0x4b9   : > { %v1417_v31 = vmul.f32 %v5958_v11, %v5963_v13 }
 0x4bc   : > { %v5980_v41 = vpop.permute.xlu1 %1406 }
 0x4bd   : > { %v4989_v40 = vpop.eup %4988 }
 0x4be   : > { %v2264_v33 = vmul.f32 %v4989_v40, %v5841_v47 }
 0x4bf   : > { %4423 = vmatmul.mubr.msk.bf16.vlgmr.msra.gmra.mrb[4].mxu1 %vm636_vm1, %v1171_v38  ;;  %v1422_v38 = vpack.c.bf16 %v1416_v30, %v1415_v27  ;;  %v1538_v27 = vmul.f32 %v5910_v28, %v5843_v8  ;;  %v1539_v30 = vmul.f32 %v5912_v29, %v5876_v16 }
 0x4c0   : > { %4431 = vmatpush3.bf16.msra.mxu1 %v4918_v18  ;;  %4426 = vmatprep.mubr.msk.bf16.mxu1 %vm636_vm1, %v1172_v42  ;;  %v5965_v18 = vpop.permute.xlu0 %1402  ;;  %v2265_v34 = vpack.c.bf16 %v2264_v33, %v2264_v33  ;;  %v5982_v42 = vld [vmem:[#allocation2 + $0x39] sm:$0xff]  ;;  %v4923_v33 = vld [vmem:[%s6507_s7 + $0x48] sm:$0xff]  }
 0x4c1   : > { %4432 = vmatprep.subr.bf16.mxu1 %v4919_v39  ;;  %v1418_v32 = vmul.f32 %v5960_v55, %v5965_v18  ;;  %v1419_v47 = vmul.f32 %v5980_v41, %v5982_v42 }
 0x4c2   : > { %4519 = vmatmul.mubr.msk.bf16.vlgmr.msra.gmra.mrb[4].mxu0 %vm636_vm1, %v2265_v34 }
 0x4c3   : > { %v1423_v54 = vpack.c.bf16 %v1418_v32, %v1417_v31  ;;  %4676 = vmatpush3.bf16.msra.mxu0 %v5671_v5  ;;  %4530 = vmatprep.mubr.msk.f32.mxu0 %vm5296_vm0, %v5297_v1  ;;  %v1540_v31 = vmul.f32 %v5874_v15, %v5932_v44 }
 0x4c4   : > { %4433 = vmatpush3.bf16.msra.mxu1 %v4919_v39  ;;  %v4921_v39 = vld [vmem:[%s6507_s7 + $0x38] sm:$0xff]   ;;  %v5986_v53 = vpop.permute.xlu0 %1410  ;;  %4677 = vmatprep.subr.bf16.mxu0 %v5295_v0 }
 0x4c5   : > { %4442 = vmatprep.subr.bf16.mxu1 %v4920_v58  ;;  %v1420_v62 = vmul.f32 %v5984_v46, %v5986_v53  ;;  %v1545_v34 = vpack.c.bf16 %v1540_v31, %v1539_v30  ;;  %v2127_v31 = vld [vmem:[#allocation2 + $0x49] sm:$0xff] }
 0x4c7   : > { %4427 = vmatmul.mubr.msk.bf16.gmra.mrb[8].mxu1 %vm636_vm1, %v1173_v3  ;;  %v1535_v3 = vmul.f32 %v5824_v57, %v5872_v2  ;;  %4679 = vmatpush3.bf16.msra.mxu0 %v5684_v14  ;;  %v1537_v2 = vmul.f32 %v5903_v24, %v5822_v56 }
 0x4c8   : > { %4434 = vmatprep.mubr.msk.bf16.mxu1 %vm636_vm1, %v1421_v49  ;;  %4533 = vmatprep.subr.mxu0 %v5297_v1  ;;  %v1424_v49 = vpack.c.bf16 %v1420_v62, %v1419_v47  ;;  %v4924_v47 = vld [vmem:[%s6507_s7 + $0x50] sm:$0xff]  }
 0x4c9   : > { %v1544_v32 = vpack.c.bf16 %v1538_v27, %v1537_v2  ;;  %v1774_v2 = vmul.f32 %v5958_v11, %v5949_v61  ;;  %v1776_v27 = vmul.f32 %v5965_v18, %v5982_v42 }
 0x4cf   : > { %4435 = vmatmul.mubr.msk.bf16.vlgmr.msra.gmra.mrb[4].mxu1 %vm636_vm1, %v1422_v38  ;;  %v6021_v38 = vld [vmem:[#allocation2 + $0x47] sm:$0xff] }
 0x4d0   : > { %4443 = vmatpush3.bf16.msra.mxu1 %v4920_v58  ;;  %4438 = vmatprep.mubr.msk.bf16.mxu1 %vm636_vm1, %v1423_v54  ;;  %v1536_v58 = vmul.f32 %v5845_v48, %v5901_v23  ;;  %v1542_v54 = vmul.f32 %v6021_v38, %v5905_v25 }
 0x4d1   : > { %4444 = vmatprep.subr.bf16.mxu1 %v4921_v39 }
 0x4d2   : > { %v1543_v40 = vpack.c.bf16 %v1536_v58, %v1535_v3  ;;  %v1657_v3 = vpack.c.bf16 %v5852_v10, %v5848_v9  ;;  %v4925_v58 = vld [vmem:[%s6507_s7 + $0x58] sm:$0xff]   ;;  %v4926_v9 = vld [vmem:[%s6507_s7 + $0x60] sm:$0xff]   ;;  %v6048_v10 = vld [vmem:[#allocation2 + $0x48] sm:$0xff] }
 0x4d4   : > { %4445 = vmatpush3.bf16.msra.mxu1 %v4921_v39  ;;  %v1541_v39 = vmul.f32 %v5907_v26, %v5934_v45 }
 0x4d5   : > { %4454 = vmatprep.subr.bf16.mxu1 %v4922_v63 }
 0x4d6   : > { %v1546_v62 = vpack.c.bf16 %v1542_v54, %v1541_v39  ;;  %v4928_v39 = vld [vmem:[%s6507_s7 + $0x70] sm:$0xff]   ;;  %v1893_v54 = vmul.f32 %v5824_v57, %v5901_v23  ;;  %v1897_v23 = vmul.f32 %v5876_v16, %v5932_v44  ;;  %v4930_v44 = vld [vmem:[%s6507_s7 + $0x80] sm:$0xff]  }
 0x4d7   : > { %4439 = vmatmul.mubr.msk.bf16.gmra.mrb[8].mxu1 %vm636_vm1, %v1424_v49  ;;  %v1659_v49 = vpack.c.bf16 %v5888_v19, %v5868_v60  ;;  %v1660_v60 = vpack.c.bf16 %v6048_v10, %v5890_v20  ;;  %v4927_v20 = vld [vmem:[%s6507_s7 + $0x68] sm:$0xff]  }
 0x4d8   : > { %4446 = vmatprep.mubr.msk.bf16.mxu1 %vm636_vm1, %v1543_v40  ;;  %v1773_v40 = vmul.f32 %v5956_v7, %v5947_v59 }
 0x4da   : > { %v1780_v30 = vpack.c.bf16 %v1774_v2, %v1773_v40 }
 0x4df   : > { %4447 = vmatmul.mubr.msk.bf16.vlgmr.msra.gmra.mrb[4].mxu1 %vm636_vm1, %v1544_v32 }
 0x4e0   : > { %4455 = vmatpush3.bf16.msra.mxu1 %v4922_v63  ;;  %4450 = vmatprep.mubr.msk.bf16.mxu1 %vm636_vm1, %v1545_v34  ;;  %v1658_v63 = vpack.c.bf16 %v5863_v51, %v5855_v50  ;;  %v1771_v50 = vmul.f32 %v5927_v36, %v5937_v52  ;;  %v1772_v51 = vmul.f32 %v5925_v35, %v5954_v4 }
 0x4e1   : > { %4456 = vmatprep.subr.bf16.mxu1 %v4923_v33  ;;  %v1775_v52 = vmul.f32 %v5960_v55, %v5963_v13  ;;  %v1778_v34 = vmul.f32 %v2127_v31, %v5986_v53 }
 0x4e2   : > { %v1779_v19 = vpack.c.bf16 %v1772_v51, %v1771_v50  ;;  %v1892_v51 = vld [vmem:[#allocation2 + $0x4f] sm:$0xff] }
 0x4e3   : > { %v1781_v32 = vpack.c.bf16 %v1776_v27, %v1775_v52  ;;  %v2128_v27 = vld [vmem:[#allocation2 + $0x51] sm:$0xff] }
 0x4e4   : > { %4457 = vmatpush3.bf16.msra.mxu1 %v4923_v33  ;;  %v1777_v33 = vmul.f32 %v5984_v46, %v5980_v41 }
 0x4e5   : > { %4466 = vmatprep.subr.bf16.mxu1 %v4924_v47 }
 0x4e7   : > { %4451 = vmatmul.mubr.msk.bf16.gmra.mrb[8].mxu1 %vm636_vm1, %v1546_v62  ;;  %v1782_v62 = vpack.c.bf16 %v1778_v34, %v1777_v33  ;;  %v2270_v33 = vld [vmem:[#allocation8] sm:$0x1] }
 0x4e8   : > { %4458 = vmatprep.mubr.msk.bf16.mxu1 %vm636_vm1, %v1657_v3 }
 0x4ef   : > { %4459 = vmatmul.mubr.msk.bf16.vlgmr.msra.gmra.mrb[4].mxu1 %vm636_vm1, %v1658_v63  ;;  %v1895_v63 = vmul.f32 %v5910_v28, %v5822_v56  ;;  %v1899_v28 = vmul.f32 %v6021_v38, %v5907_v26  ;;  %v6112_v38 = vld [vmem:[#allocation2 + $0x50] sm:$0xff] }
 0x4f0   : > { %4467 = vmatpush3.bf16.msra.mxu1 %v4924_v47  ;;  %4462 = vmatprep.mubr.msk.bf16.mxu1 %vm636_vm1, %v1659_v49  ;;  %v1894_v47 = vmul.f32 %v5903_v24, %v5845_v48  ;;  %v1898_v24 = vmul.f32 %v5874_v15, %v5934_v45  ;;  %v2018_v40 = vpack.c.bf16 %v6112_v38, %v6048_v10 }
 0x4f1   : > { %4468 = vmatprep.subr.bf16.mxu1 %v4925_v58 }
 0x4f2   : > { %v1901_v3 = vpack.c.bf16 %v1894_v47, %v1893_v54  ;;  %v1903_v50 = vpack.c.bf16 %v1898_v24, %v1897_v23 }
 0x4f4   : > { %4469 = vmatpush3.bf16.msra.mxu1 %v4925_v58  ;;  %v1896_v58 = vmul.f32 %v5912_v29, %v5843_v8  ;;  %v1900_v29 = vmul.f32 %v1892_v51, %v5905_v25 }
 0x4f5   : > { %4478 = vmatprep.subr.bf16.mxu1 %v4926_v9 }
 0x4f6   : > { %v1902_v49 = vpack.c.bf16 %v1896_v58, %v1895_v63  ;;  %v1904_v45 = vpack.c.bf16 %v1900_v29, %v1899_v28 }
 0x4f7   : > { %4463 = vmatmul.mubr.msk.bf16.gmra.mrb[8].mxu1 %vm636_vm1, %v1660_v60  ;;  %v4931_v60 = vld [vmem:[%s6507_s7 + $0x88] sm:$0xff]  }
 0x4f8   : > { %4470 = vmatprep.mubr.msk.bf16.mxu1 %vm636_vm1, %v1779_v19  ;;  %v2129_v19 = vmul.f32 %v5927_v36, %v5954_v4  ;;  %v2133_v4 = vmul.f32 %v5963_v13, %v5982_v42 }
 0x4ff   : > { %4471 = vmatmul.mubr.msk.bf16.vlgmr.msra.gmra.mrb[4].mxu1 %vm636_vm1, %v1780_v30  ;;  %v2135_v30 = vmul.f32 %v2127_v31, %v5980_v41 }
 0x500   : > { %4479 = vmatpush3.bf16.msra.mxu1 %v4926_v9  ;;  %4474 = vmatprep.mubr.msk.bf16.mxu1 %vm636_vm1, %v1781_v32  ;;  %v4929_v9 = vld [vmem:[%s6507_s7 + $0x78] sm:$0xff]  }
 0x501   : > { %4480 = vmatprep.subr.bf16.mxu1 %v4927_v20 }
 0x504   : > { %4481 = vmatpush3.bf16.msra.mxu1 %v4927_v20 }
 0x505   : > { %4490 = vmatprep.subr.bf16.mxu1 %v4928_v39 }
 0x507   : > { %4475 = vmatmul.mubr.msk.bf16.gmra.mrb[8].mxu1 %vm636_vm1, %v1782_v62 }
 0x508   : > { %4482 = vmatprep.mubr.msk.bf16.mxu1 %vm636_vm1, %v1901_v3 }
 0x50f   : > { %4483 = vmatmul.mubr.msk.bf16.vlgmr.msra.gmra.mrb[4].mxu1 %vm636_vm1, %v1902_v49 }
 0x510   : > { %4491 = vmatpush3.bf16.msra.mxu1 %v4928_v39  ;;  %4486 = vmatprep.mubr.msk.bf16.mxu1 %vm636_vm1, %v1903_v50  ;;  %v4157_v39 = vld [vmem:[#allocation5] ss:$0 sm:$0xff] }
 0x511   : > { %4492 = vmatprep.subr.bf16.mxu1 %v4929_v9 }
 0x514   : > { %4493 = vmatpush3.bf16.msra.mxu1 %v4929_v9 }
 0x515   : > { %4502 = vmatprep.subr.bf16.mxu1 %v4930_v44 }
 0x517   : > { %4487 = vmatmul.mubr.msk.bf16.gmra.mrb[8].mxu1 %vm636_vm1, %v1904_v45 }
 0x518   : > { %4494 = vmatprep.mubr.msk.bf16.mxu1 %vm636_vm1, %v5861_v12  ;;  %v2130_v12 = vmul.f32 %v5956_v7, %v5925_v35  ;;  %v2134_v7 = vmul.f32 %v5984_v46, %v5965_v18 }
 0x51a   : > { %v2137_v2 = vpack.c.bf16 %v2130_v12, %v2129_v19  ;;  %v2139_v10 = vpack.c.bf16 %v2134_v7, %v2133_v4 }
 0x51f   : > { %4495 = vmatmul.mubr.msk.bf16.vlgmr.msra.gmra.mrb[4].mxu1 %vm636_vm1, %v5881_v17  ;;  %v2131_v17 = vmul.f32 %v5958_v11, %v5947_v59  ;;  %v6134_v11 = vmul.f32 %v2128_v27, %v5986_v53 }
 0x520   : > { %4503 = vmatpush3.bf16.msra.mxu1 %v4930_v44  ;;  %4498 = vmatprep.mubr.msk.bf16.mxu1 %vm636_vm1, %v5899_v22  ;;  %v2132_v22 = vmul.f32 %v5960_v55, %v5949_v61 }
 0x521   : > { %4504 = vmatprep.subr.bf16.mxu1 %v4931_v60  ;;  %6540 = vst [vmem:[#allocation22_spill] sm:$0xff] %v6134_v11  ;;  %v2140_v55 = vpack.c.bf16 %v6134_v11, %v2135_v30 }
 0x522   : > { %v2138_v52 = vpack.c.bf16 %v2132_v22, %v2131_v17 }
 0x524   : > { %4505 = vmatpush3.bf16.msra.mxu1 %v4931_v60 }
 0x527   : > { %4499 = vmatmul.mubr.msk.bf16.gmra.mrb[8].mxu1 %vm636_vm1, %v2018_v40 }
 0x528   : > { %4506 = vmatprep.mubr.msk.bf16.mxu1 %vm636_vm1, %v2137_v2 }
 0x52f   : > { %4507 = vmatmul.mubr.msk.bf16.vlgmr.msra.gmra.mrb[4].mxu1 %vm636_vm1, %v2138_v52 }
 0x530   : > { %4510 = vmatprep.mubr.msk.bf16.mxu1 %vm636_vm1, %v2139_v10 }
 0x537   : > { %4511 = vmatmul.mubr.msk.bf16.gmra.mrb[8].mxu1 %vm636_vm1, %v2140_v55 }
 0x595   : > { %v2320_v42 = vpop.f32.mrb[4].mxu0 }
 0x596   : > { %v4520_v20 = vpop.f32.mrb[5].mxu0  ;;  %v2321_v34 = vadd.f32 %v2320_v42, %v2270_v33 }
 0x597   : > { %v2323_v32 = vpop.f32.mrb[6].mxu0 }
 0x598   : > { %v4521_v46 = vpop.f32.mrb[7].mxu0  ;;  %v2329_v54 = vrot.slane %v2321_v34, %v5716_v43 }
 0x602   : > { %v4508_v47 = vpop.f32.mrb[4].mxu1 }
 0x603   : > { %v2251_v62 = vadd.f32 %v4508_v47, %v4157_v39  ;;  %v2204_v3 = vpop.f32.mrb[5].mxu1 }
 0x604   : > { %v2249_v31 = vadd.f32 %v4157_v39, %v2204_v3  ;;  %v4509_v63 = vpop.f32.mrb[6].mxu1 }
 0x605   : > { %v2332_v58 = vadd.f32 %v2329_v54, %v2251_v62  ;;  %v2252_v23 = vadd.f32 %v4509_v63, %v4157_v39  ;;  %v2207_v24 = vpop.f32.mrb[7].mxu1 }
 0x606   : > { %v2330_v49 = vadd.f32 %v2329_v54, %v2249_v31  ;;  %v2250_v9 = vadd.f32 %v4157_v39, %v2207_v24 }
 0x607   : > { %v2333_v50 = vadd.f32 %v2329_v54, %v2252_v23  ;;  %v2343_v12 = vsel %vm636_vm1, %v2332_v58, 0.0 }
 0x608   : > { %v2331_v51 = vadd.f32 %v2329_v54, %v2250_v9  ;;  %v2340_v28 = vsel %vm636_vm1, %v2330_v49, 0.0 }
 0x609   : > { %v2345_v52 = vsel %vm636_vm1, %v2333_v50, 0.0 }
 0x60a   : > { %v2341_v29 = vsel %vm636_vm1, %v2331_v51, 0.0  ;;  %v4512_v44 = vpop.f32.mrb[8].mxu1 }
 0x60b   : > { %v2342_v45 = vadd.f32 %v2341_v29, %v2340_v28  ;;  %v2255_v60 = vadd.f32 %v4512_v44, %v4157_v39  ;;  %v2220_v19 = vpop.f32.mrb[9].mxu1 }
 0x60c   : > { %v2253_v40 = vadd.f32 %v4157_v39, %v2220_v19  ;;  %v4513_v2 = vpop.f32.mrb[10].mxu1 }
 0x60d   : > { %v2344_v17 = vadd.f32 %v2343_v12, %v2342_v45  ;;  %v2336_v22 = vadd.f32 %v2329_v54, %v2255_v60  ;;  %v2256_v4 = vadd.f32 %v4513_v2, %v4157_v39  ;;  %v2223_v7 = vpop.f32.mrb[11].mxu1 }
 0x60e   : > { %v2334_v27 = vadd.f32 %v2329_v54, %v2253_v40  ;;  %v2254_v10 = vadd.f32 %v4157_v39, %v2223_v7 }
 0x60f   : > { %v2346_v30 = vadd.f32 %v2345_v52, %v2344_v17  ;;  %v2337_v55 = vadd.f32 %v2329_v54, %v2256_v4  ;;  %v2351_v34 = vsel %vm636_vm1, %v2336_v22, 0.0 }
 0x610   : > { %v2347_v42 = vsel %vm636_vm1, %v2334_v27, 0.0  ;;  %v2335_v20 = vadd.f32 %v2329_v54, %v2254_v10 }
 0x611   : > { %v2348_v32 = vadd.f32 %v2347_v42, %v2346_v30  ;;  %v2353_v62 = vsel %vm636_vm1, %v2337_v55, 0.0 }
 0x612   : > { %v2349_v46 = vsel %vm636_vm1, %v2335_v20, 0.0 }
 0x613   : > { %v2350_v33 = vadd.f32 %v2349_v46, %v2348_v32 }
 0x615   : > { %v2352_v47 = vadd.f32 %v2351_v34, %v2350_v33 }
 0x617   : > { %v2354_v3 = vadd.f32 %v2353_v62, %v2352_v47 }
 0x619   : > { %v2355_v31 = vrot.slane %v2354_v3, 4 }
 0x61b   : > { %v2356_v63 = vadd.f32 %v2355_v31, %v2354_v3 }
 0x61d   : > { %v2357_v23 = vrot.slane %v2356_v63, 2 }
 0x61f   : > { %v2358_v24 = vadd.f32 %v2357_v23, %v2356_v63 }
 0x621   : > { %v2359_v39 = vrot.slane %v2358_v24, 1 }
 0x623   : > { %v2360_v9 = vadd.f32 %v2359_v39, %v2358_v24 }
 0x625   : > { %4531 = vmatmul.mubr.msk.f32.vlgmr.msra.gmra.mrb[8].mxu0 %vm636_vm1, %v2360_v9 }
 0x626   : > { %4534 = vmatpush3.msra.mxu0 %v5704_v37  ;;  %4535 = vmatprep.mubr.msk.f32.mxu0 %vm5296_vm0, %v5297_v1 }
 0x627   : > { %4680 = vmatprep.subr.bf16.mxu0 %v5295_v0 }
 0x6f8   : > { %v2430_v54 = vpop.f32.mrb[8].mxu0 }
 0x6f9   : > { %v2434_v28 = vmul.f32 0.00390625, %v2430_v54  ;;  %v4532_v29 = vpop.f32.mrb[9].mxu0 }
 0x6fb   : > { %4536 = vmatmul.mubr.msk.f32.vlgmr.msra.gmra.mrb[10].mxu0 %vm746_vm2, %v2434_v28  ;;  %v5024_v28 = vld [vmem:[%s6504_s4] sm:$0xff] }
 0x6fc   : > { %4682 = vmatpush3.bf16.msra.mxu0 %v5671_v5  ;;  %4546 = vmatprep.mubr.msk.f32.mxu0 %vm5296_vm0, %v5297_v1 }
 0x6fd   : > { %4683 = vmatprep.subr.bf16.mxu0 %v5295_v0 }
 0x700   : > { %4685 = vmatpush3.bf16.msra.mxu0 %v5684_v14 }
 0x701   : > { %4549 = vmatprep.subr.mxu0 %v5297_v1 }
 0x7ce   : > { %v2504_v37 = vpop.f32.mrb[10].mxu0 }
 0x7cf   : > { %v2511_v44 = vrot.slane %v2504_v37, %v5716_v43  ;;  %v4537_v45 = vpop.f32.mrb[11].mxu0 }
 0x7d0   : > { %v4934_v45 = vld [vmem:[#allocation13 + $0x10] sm:$0xff]  }
 0x7d1   : > { %v6160_v60 = vsub.f32 %v2330_v49, %v2511_v44  ;;  %v6162_v19 = vsub.f32 %v2331_v51, %v2511_v44  ;;  %v6164_v12 = vsub.f32 %v2332_v58, %v2511_v44  ;;  %v6166_v5 = vsub.f32 %v2333_v50, %v2511_v44  ;;  %4554 = vmatprep.subr.bf16.mxu1 %v4934_v45 }
 0x7d2   : > { %v6168_v40 = vsub.f32 %v2334_v27, %v2511_v44  ;;  %v6176_v17 = vsub.f32 %v2335_v20, %v2511_v44  ;;  %v2518_v4 = vsub.f32 %v2336_v22, %v2511_v44  ;;  %v2519_v10 = vsub.f32 %v2337_v55, %v2511_v44  ;;  %4555 = vmatpush3.bf16.msra.mxu1 %v4934_v45 }
 0x7d3   : > { %v2520_v0 = vmul.f32 %v6160_v60, %v6160_v60  ;;  %v2521_v14 = vmul.f32 %v6162_v19, %v6162_v19  ;;  %v2522_v2 = vmul.f32 %v6164_v12, %v6164_v12  ;;  %v2523_v49 = vmul.f32 %v6166_v5, %v6166_v5 }
 0x7d4   : > { %v2524_v7 = vmul.f32 %v6168_v40, %v6168_v40  ;;  %v2525_v30 = vmul.f32 %v6176_v17, %v6176_v17  ;;  %v2526_v32 = vmul.f32 %v2518_v4, %v2518_v4  ;;  %v2527_v34 = vmul.f32 %v2519_v10, %v2519_v10 }
 0x7d5   : > { %v2528_v58 = vsel %vm636_vm1, %v2520_v0, 0.0  ;;  %v2529_v50 = vsel %vm636_vm1, %v2521_v14, 0.0  ;;  %v2531_v52 = vsel %vm636_vm1, %v2522_v2, 0.0  ;;  %v2533_v42 = vsel %vm636_vm1, %v2523_v49, 0.0  ;;  %v4935_v0 = vld [vmem:[#allocation13] sm:$0xff]   ;;  %v4936_v14 = vld [vmem:[#allocation13 + $0x18] sm:$0xff]  }
 0x7d6   : > { %v2530_v51 = vadd.f32 %v2529_v50, %v2528_v58  ;;  %v2535_v46 = vsel %vm636_vm1, %v2524_v7, 0.0  ;;  %v2537_v22 = vsel %vm636_vm1, %v2525_v30, 0.0  ;;  %v2539_v62 = vsel %vm636_vm1, %v2526_v32, 0.0  ;;  %v4937_v2 = vld [vmem:[#allocation13 + $0x8] sm:$0xff]   ;;  %4556 = vmatprep.subr.bf16.mxu1 %v4936_v14  ;;  %v6199_v49 = vld [vmem:[#allocation13 + $0x20] sm:$0xff]  }
 0x7d7   : > { %v2541_v31 = vsel %vm636_vm1, %v2527_v34, 0.0  ;;  %4557 = vmatpush3.bf16.msra.mxu1 %v4936_v14  ;;  %v4167_v32 = vld [vmem:[#allocation11] ss:$0 sm:$0xff] }
 0x7d8   : > { %v2532_v27 = vadd.f32 %v2531_v52, %v2530_v51  ;;  %v4166_v52 = vld [vmem:[#allocation10] ss:$0 sm:$0xff] }
 0x7da   : > { %v2534_v20 = vadd.f32 %v2533_v42, %v2532_v27 }
 0x7dc   : > { %v2536_v33 = vadd.f32 %v2535_v46, %v2534_v20 }
 0x7de   : > { %v2538_v47 = vadd.f32 %v2537_v22, %v2536_v33 }
 0x7e0   : > { %v2540_v3 = vadd.f32 %v2539_v62, %v2538_v47 }
 0x7e2   : > { %v2542_v55 = vadd.f32 %v2541_v31, %v2540_v3 }
 0x7e4   : > { %v2543_v63 = vrot.slane %v2542_v55, 4 }
 0x7e6   : > { %v2544_v23 = vadd.f32 %v2543_v63, %v2542_v55 }
 0x7e8   : > { %v2545_v24 = vrot.slane %v2544_v23, 2 }
 0x7ea   : > { %v2546_v39 = vadd.f32 %v2545_v24, %v2544_v23 }
 0x7ec   : > { %v2547_v9 = vrot.slane %v2546_v39, 1 }
 0x7ee   : > { %v2548_v54 = vadd.f32 %v2547_v9, %v2546_v39 }
 0x7f0   : > { %4547 = vmatmul.mubr.msk.f32.vlgmr.msra.gmra.mrb[12].mxu0 %vm636_vm1, %v2548_v54 }
 0x7f1   : > { %4550 = vmatpush3.msra.mxu0 %v5024_v28  ;;  %4551 = vmatprep.mubr.msk.f32.mxu0 %vm5296_vm0, %v5297_v1 }
 0x7f2   : > { %4566 = vmatprep.subr.bf16.mxu0 %v4935_v0 }
 0x8c3   : > { %v2618_v29 = vpop.f32.mrb[12].mxu0 }
 0x8c4   : > { %v2622_v37 = vmul.f32 0.00390625, %v2618_v29  ;;  %v4548_v44 = vpop.f32.mrb[13].mxu0 }
 0x8c6   : > { %4552 = vmatmul.mubr.msk.f32.vlgmr.msra.gmra.mrb[14].mxu0 %vm746_vm2, %v2622_v37 }
 0x8c7   : > { %4567 = vmatpush3.bf16.msra.mxu0 %v4935_v0 }
 0x8c8   : > { %4568 = vmatprep.subr.bf16.mxu0 %v4937_v2 }
 0x8cb   : > { %4569 = vmatpush3.bf16.msra.mxu0 %v4937_v2 }
 0x8cc   : > { %4578 = vmatprep.subr.bf16.mxu0 %v6199_v49 }
 0x999   : > { %v2692_v1 = vpop.f32.mrb[14].mxu0 }
 0x99a   : > { %v2693_v58 = vadd.f32 1e-06, %v2692_v1  ;;  %v4553_v50 = vpop.f32.mrb[15].mxu0 }
 0x99c   : > { %4990 = vrsqrt.f32 %v2693_v58 }
 0x9a6   : > { %v4991_v51 = vpop.eup %4990 }
 0x9a7   : > { %v2700_v7 = vrot.slane %v4991_v51, %v5716_v43 }
 0x9a9   : > { %v2701_v27 = vmul.f32 %v2700_v7, %v6160_v60  ;;  %v2702_v30 = vmul.f32 %v2700_v7, %v6162_v19  ;;  %v2703_v42 = vmul.f32 %v2700_v7, %v6164_v12  ;;  %v2704_v20 = vmul.f32 %v2700_v7, %v6166_v5 }
 0x9aa   : > { %v2705_v46 = vmul.f32 %v2700_v7, %v6168_v40  ;;  %v2706_v33 = vmul.f32 %v2700_v7, %v6176_v17  ;;  %v2707_v34 = vmul.f32 %v2700_v7, %v2518_v4  ;;  %v2708_v22 = vmul.f32 %v2700_v7, %v2519_v10 }
 0x9ab   : > { %v2715_v47 = vmul.f32 %v4166_v52, %v2701_v27  ;;  %v2716_v62 = vmul.f32 %v4166_v52, %v2702_v30  ;;  %v2717_v3 = vmul.f32 %v4166_v52, %v2703_v42  ;;  %v2718_v43 = vmul.f32 %v4166_v52, %v2704_v20 }
 0x9ac   : > { %v2719_v31 = vmul.f32 %v4166_v52, %v2705_v46  ;;  %v2720_v55 = vmul.f32 %v4166_v52, %v2706_v33  ;;  %v2721_v60 = vmul.f32 %v4166_v52, %v2707_v34  ;;  %v2722_v63 = vmul.f32 %v4166_v52, %v2708_v22 }
 0x9ad   : > { %v2729_v19 = vadd.f32 %v4167_v32, %v2715_v47  ;;  %v2730_v23 = vadd.f32 %v4167_v32, %v2716_v62  ;;  %v2731_v12 = vadd.f32 %v4167_v32, %v2717_v3  ;;  %v2732_v24 = vadd.f32 %v4167_v32, %v2718_v43 }
 0x9ae   : > { %v2733_v5 = vadd.f32 %v4167_v32, %v2719_v31  ;;  %v2734_v39 = vadd.f32 %v4167_v32, %v2720_v55  ;;  %v2735_v9 = vadd.f32 %v4167_v32, %v2721_v60  ;;  %v2736_v4 = vadd.f32 %v4167_v32, %v2722_v63 }
 0x9af   : > { %v4168_v40 = vmul.f32 -1.442695, %v2729_v19  ;;  %v4169_v54 = vmul.f32 -1.442695, %v2730_v23  ;;  %v4170_v17 = vmul.f32 -1.442695, %v2731_v12 }
 0x9b0   : > { %v4171_v10 = vmul.f32 -1.442695, %v2732_v24  ;;  %v4172_v28 = vmul.f32 -1.442695, %v2733_v5  ;;  %v4173_v29 = vmul.f32 -1.442695, %v2734_v39 }
 0x9b1   : > { %4992 = vpow2.f32 %v4168_v40  ;;  %v4174_v37 = vmul.f32 -1.442695, %v2735_v9  ;;  %v4175_v44 = vmul.f32 -1.442695, %v2736_v4 }
 0x9b2   : > { %4994 = vpow2.f32 %v4169_v54 }
 0x9b3   : > { %4996 = vpow2.f32 %v4170_v17 }
 0x9b4   : > { %4998 = vpow2.f32 %v4171_v10 }
 0x9b5   : > { %5000 = vpow2.f32 %v4172_v28 }
 0x9b6   : > { %5002 = vpow2.f32 %v4173_v29 }
 0x9b7   : > { %5004 = vpow2.f32 %v4174_v37 }
 0x9b8   : > { %5006 = vpow2.f32 %v4175_v44 }
 0x9bb   : > { %v4993_v45 = vpop.eup %4992 }
 0x9bc   : > { %v4995_v0 = vpop.eup %4994  ;;  %v2761_v14 = vadd.f32 1.0, %v4993_v45 }
 0x9bd   : > { %v4997_v2 = vpop.eup %4996  ;;  %v2762_v1 = vadd.f32 1.0, %v4995_v0 }
 0x9be   : > { %v4999_v58 = vpop.eup %4998  ;;  %v2763_v50 = vadd.f32 1.0, %v4997_v2  ;;  %5008 = vrcp.f32 %v2761_v14 }
 0x9bf   : > { %v5001_v51 = vpop.eup %5000  ;;  %v2764_v7 = vadd.f32 1.0, %v4999_v58  ;;  %5010 = vrcp.f32 %v2762_v1 }
 0x9c0   : > { %v5003_v52 = vpop.eup %5002  ;;  %v2765_v27 = vadd.f32 1.0, %v5001_v51  ;;  %5012 = vrcp.f32 %v2763_v50  ;;  %v4939_v51 = vld [vmem:[#allocation13 + $0x28] sm:$0xff]  }
 0x9c1   : > { %v5005_v30 = vpop.eup %5004  ;;  %v2766_v42 = vadd.f32 1.0, %v5003_v52  ;;  %5014 = vrcp.f32 %v2764_v7 }
 0x9c2   : > { %v5007_v20 = vpop.eup %5006  ;;  %v2767_v32 = vadd.f32 1.0, %v5005_v30  ;;  %5016 = vrcp.f32 %v2765_v27 }
 0x9c3   : > { %v2768_v46 = vadd.f32 1.0, %v5007_v20  ;;  %5018 = vrcp.f32 %v2766_v42 }
 0x9c4   : > { %5020 = vrcp.f32 %v2767_v32 }
 0x9c5   : > { %5022 = vrcp.f32 %v2768_v46 }
 0x9c8   : > { %v5009_v33 = vpop.eup %5008 }
 0x9c9   : > { %v5011_v34 = vpop.eup %5010  ;;  %v2785_v22 = vmul.f32 %v5009_v33, %v2729_v19 }
 0x9ca   : > { %v5013_v47 = vpop.eup %5012  ;;  %v2786_v62 = vmul.f32 %v5011_v34, %v2730_v23  ;;  %v4940_v34 = vld [vmem:[#allocation13 + $0x30] sm:$0xff]  }
 0x9cb   : > { %v5015_v3 = vpop.eup %5014  ;;  %v2787_v43 = vmul.f32 %v5013_v47, %v2731_v12  ;;  %2794 = vst.msk [vmem:[#allocation2 + $0x10] sm:$0xff] %vm636_vm1, %v2785_v22 }
 0x9cc   : > { %v5017_v31 = vpop.eup %5016  ;;  %v2788_v55 = vmul.f32 %v5015_v3, %v2732_v24  ;;  %2795 = vst.msk [vmem:[#allocation2 + $0x18] sm:$0xff] %vm636_vm1, %v2786_v62 }
 0x9cd   : > { %v5019_v60 = vpop.eup %5018  ;;  %v2789_v63 = vmul.f32 %v5017_v31, %v2733_v5  ;;  %2796 = vst.msk [vmem:[#allocation2 + $0x20] sm:$0xff] %vm636_vm1, %v2787_v43 }
 0x9ce   : > { %v5021_v40 = vpop.eup %5020  ;;  %v2790_v54 = vmul.f32 %v5019_v60, %v2734_v39  ;;  %2797 = vst.msk [vmem:[#allocation2 + $0x28] sm:$0xff] %vm636_vm1, %v2788_v55 }
 0x9cf   : > { %v5023_v17 = vpop.eup %5022  ;;  %v2791_v19 = vmul.f32 %v5021_v40, %v2735_v9  ;;  %2798 = vst.msk [vmem:[#allocation2 + $0x30] sm:$0xff] %vm636_vm1, %v2789_v63 }
 0x9d0   : > { %v2792_v23 = vmul.f32 %v5023_v17, %v2736_v4  ;;  %2799 = vst.msk [vmem:[#allocation2 + $0x38] sm:$0xff] %vm636_vm1, %v2790_v54 }
 0x9d1   : > { %2800 = vst.msk [vmem:[#allocation2 + $0x40] sm:$0xff] %vm636_vm1, %v2791_v19 }
 0x9d2   : > { %2801 = vst.msk [vmem:[#allocation2 + $0x48] sm:$0xff] %vm636_vm1, %v2792_v23  ;;  %v6217_v12 = vld [vmem:[#allocation2 + $0x10] sm:$0xff] }
 0x9d3   : > { %v6219_v24 = vld [vmem:[#allocation2 + $0xf] sm:$0xff]  ;;  %v2834_v5 = vpack.c.bf16 %v6217_v12, %v5838_v6  ;;  %v6223_v39 = vld [vmem:[#allocation2 + $0x18] sm:$0xff] }
 0x9d4   : > { %v2811_v9 = vmul.f32 %v6219_v24, %v5845_v48  ;;  %v6227_v10 = vld [vmem:[#allocation2 + $0x17] sm:$0xff]  ;;  %v6229_v4 = vld [vmem:[#allocation2 + $0x20] sm:$0xff]  ;;  %v3021_v30 = vld [vmem:[#allocation2 + $0x9] sm:$0xff] }
 0x9d5   : > { %v6231_v28 = vld [vmem:[#allocation2 + $0x1f] sm:$0xff]  ;;  %v2812_v29 = vmul.f32 %v6227_v10, %v5822_v56  ;;  %4558 = vmatprep.mubr.msk.bf16.mxu1 %vm636_vm1, %v2834_v5  ;;  %v6238_v37 = vpack.c.bf16 %v6229_v4, %v6223_v39  ;;  %v6240_v6 = vld [vmem:[#allocation2 + $0x28] sm:$0xff]  ;;  %v6269_v42 = vld [vmem:[#allocation2 + $0x11] sm:$0xff]  ;;  %v3029_v22 = vmul.f32 %v3021_v30, %v5927_v36  ;;  %v6301_v63 = vmul.f32 %v6227_v10, %v5824_v57 }
 0x9d6   : > { %v2818_v44 = vpack.c.bf16 %v2811_v9, %v5893_v21  ;;  %v2813_v45 = vmul.f32 %v6231_v28, %v5843_v8  ;;  %v6245_v0 = vld [vmem:[#allocation2 + $0x27] sm:$0xff]  ;;  %v6247_v14 = vld [vmem:[#allocation2 + $0x30] sm:$0xff]  ;;  %v3030_v47 = vmul.f32 %v6269_v42, %v5925_v35  ;;  %v6290_v3 = vld [vmem:[#allocation2 + $0x19] sm:$0xff]  ;;  %v6305_v40 = vmul.f32 %v6231_v28, %v5845_v48 }
 0x9d7   : > { %v6249_v2 = vld [vmem:[#allocation2 + $0x2f] sm:$0xff]  ;;  %v2814_v1 = vmul.f32 %v6245_v0, %v5876_v16  ;;  %4559 = vmatmul.mubr.msk.bf16.vlgmr.msra.gmra.mrb[12].mxu1 %vm636_vm1, %v6238_v37  ;;  %v6257_v58 = vpack.c.bf16 %v6247_v14, %v6240_v6  ;;  %v6262_v7 = vld [vmem:[#allocation2 + $0x37] sm:$0xff]  ;;  %v6292_v31 = vld [vmem:[#allocation2 + $0x21] sm:$0xff]  ;;  %v6309_v54 = vmul.f32 %v6245_v0, %v5822_v56  ;;  %v3031_v17 = vmul.f32 %v6290_v3, %v5947_v59 }
 0x9d8   : > { %4570 = vmatprep.mubr.msk.bf16.mxu0 %vm636_vm1, %v2818_v44  ;;  %v2819_v21 = vpack.c.bf16 %v2813_v45, %v2812_v29  ;;  %v2815_v50 = vmul.f32 %v6249_v2, %v5874_v15  ;;  %v6264_v52 = vld [vmem:[#allocation2 + $0x3f] sm:$0xff]  ;;  %v2816_v46 = vmul.f32 %v6262_v7, %v5907_v26  ;;  %v3037_v43 = vpack.c.bf16 %v3030_v47, %v3029_v22  ;;  %v6294_v55 = vld [vmem:[#allocation2 + $0x29] sm:$0xff]  ;;  %v6297_v60 = vld [vmem:[#allocation2 + $0x31] sm:$0xff] }
 0x9d9   : > { %4562 = vmatprep.mubr.msk.bf16.mxu1 %vm636_vm1, %v6257_v58  ;;  %v6272_v20 = vld [vmem:[#allocation2 + $0x38] sm:$0xff]  ;;  %v6274_v32 = vld [vmem:[#allocation2 + $0x40] sm:$0xff]  ;;  %v2817_v33 = vmul.f32 %v6264_v52, %v5905_v25  ;;  %v6316_v19 = vmul.f32 %v6249_v2, %v5843_v8  ;;  %v6320_v23 = vmul.f32 %v6262_v7, %v5876_v16  ;;  %v3032_v5 = vmul.f32 %v6292_v31, %v5949_v61 }
 0x9da   : > { %4571 = vmatmul.mubr.msk.bf16.vlgmr.msra.gmra.mrb[16].mxu0 %vm636_vm1, %v2819_v21  ;;  %v2820_v27 = vpack.c.bf16 %v2815_v50, %v2814_v1  ;;  %v3033_v9 = vmul.f32 %v6294_v55, %v5963_v13  ;;  %v6326_v29 = vld [vmem:[#allocation2 + $0x39] sm:$0xff]  ;;  %v6328_v44 = vld [vmem:[#allocation2 + $0x41] sm:$0xff]  ;;  %v6334_v1 = vmul.f32 %v6264_v52, %v5874_v15  ;;  %v3034_v21 = vmul.f32 %v6297_v60, %v5965_v18 }
 0x9db   : > { %4579 = vmatpush3.bf16.msra.mxu0 %v6199_v49  ;;  %v6286_v49 = vpack.c.bf16 %v6274_v32, %v6272_v20  ;;  %v2821_v62 = vpack.c.bf16 %v2817_v33, %v2816_v46  ;;  %v6352_v46 = vmul.f32 %v6294_v55, %v5947_v59  ;;  %v6356_v33 = vmul.f32 %v6297_v60, %v5949_v61  ;;  %v4941_v30 = vld [vmem:[#allocation13 + $0x38] sm:$0xff]  }
 0x9dc   : > { %4574 = vmatprep.mubr.msk.bf16.mxu0 %vm636_vm1, %v2820_v27  ;;  %4580 = vmatprep.subr.bf16.mxu0 %v4939_v51  ;;  %v6346_v27 = vmul.f32 %v6292_v31, %v5925_v35  ;;  %v6362_v47 = vmul.f32 %v6326_v29, %v5963_v13  ;;  %v3039_v45 = vpack.c.bf16 %v3034_v21, %v3033_v9 }
 0x9dd   : > { %v3035_v22 = vmul.f32 %v6326_v29, %v5980_v41  ;;  %v3151_v50 = vmul.f32 %v6219_v24, %v5824_v57  ;;  %v3152_v9 = vmul.f32 %v6227_v10, %v5845_v48  ;;  %v3155_v57 = vmul.f32 %v6249_v2, %v5876_v16  ;;  %v4943_v10 = vld [vmem:[#allocation13 + $0x48] sm:$0xff]   ;;  %v4945_v2 = vld [vmem:[#allocation13 + $0x58] sm:$0xff]  }
 0x9de   : > { %v3156_v48 = vmul.f32 %v6262_v7, %v5874_v15  ;;  %v3273_v15 = vpack.c.bf16 %v6223_v39, %v6217_v12  ;;  %v3275_v7 = vpack.c.bf16 %v6272_v20, %v6247_v14  ;;  %v3387_v12 = vmul.f32 %v6269_v42, %v5927_v36 }
 0x9df   : > { %4581 = vmatpush3.bf16.msra.mxu0 %v4939_v51  ;;  %4563 = vmatmul.mubr.msk.bf16.gmra.mrb[16].mxu1 %vm636_vm1, %v6286_v49  ;;  %v6342_v51 = vmul.f32 %v6290_v3, %v5927_v36  ;;  %v3388_v39 = vmul.f32 %v6290_v3, %v5925_v35  ;;  %v3389_v14 = vmul.f32 %v6292_v31, %v5947_v59  ;;  %v4948_v31 = vld [vmem:[#allocation13 + $0x70] sm:$0xff]  }
 0x9e0   : > { %4590 = vmatprep.subr.bf16.mxu0 %v4940_v34  ;;  %v3390_v20 = vmul.f32 %v6294_v55, %v5949_v61  ;;  %v3391_v36 = vmul.f32 %v6297_v60, %v5963_v13  ;;  %v3392_v35 = vmul.f32 %v6326_v29, %v5965_v18  ;;  %v3393_v59 = vmul.f32 %v6328_v44, %v5980_v41  ;;  %v4949_v55 = vld [vmem:[#allocation13 + $0x78] sm:$0xff]  }
 0x9e1   : > { %v3508_v60 = vld [vmem:[#allocation2 + $0x4f] sm:$0xff]  ;;  %v6542_v29 = vpack.c.bf16 %v6316_v19, %v6309_v54  ;;  %v4951_v54 = vld [vmem:[#allocation13 + $0x88] sm:$0xff]  }
 0x9e2   : > { %4575 = vmatmul.mubr.msk.bf16.gmra.mrb[20].mxu0 %vm636_vm1, %v2821_v62  ;;  %v6366_v62 = vmul.f32 %v6328_v44, %v5965_v18  ;;  %v3396_v42 = vpack.c.bf16 %v3390_v20, %v3389_v14  ;;  %v3397_v3 = vpack.c.bf16 %v3392_v35, %v3391_v36  ;;  %v6541_v18 = vpack.c.bf16 %v6305_v40, %v6301_v63  ;;  %v4950_v40 = vld [vmem:[#allocation13 + $0x80] sm:$0xff]   ;;  %v5029_v35 = vld [vmem:[%s5660_s6 + $0x30] sm:$0xff] }
 0x9e3   : > { %4582 = vmatprep.mubr.msk.bf16.mxu0 %vm636_vm1, %v3037_v43  ;;  %v3038_v43 = vpack.c.bf16 %v3032_v5, %v3031_v17  ;;  %v3036_v17 = vmul.f32 %v6328_v44, %v5986_v53  ;;  %v4942_v5 = vld [vmem:[#allocation13 + $0x40] sm:$0xff]   ;;  %v3516_v63 = vmul.f32 %v3508_v60, %v5905_v25 }
 0x9e4   : > { %v3755_v11 = vpack.c.bf16 %v6366_v62, %v6362_v47  ;;  %v4230_v47 = vld [vmem:[#allocation14] ss:$0 sm:$0xff] }
 0x9e5   : > { %v3040_v21 = vpack.c.bf16 %v3036_v17, %v3035_v22  ;;  %v3272_v22 = vld [vmem:[#allocation2 + $0x48] sm:$0xff] }
 0x9e6   : > { %v3386_v17 = vld [vmem:[#allocation2 + $0x49] sm:$0xff] }
 0x9e7   : > { %v3394_v61 = vmul.f32 %v3386_v17, %v5986_v53  ;;  %v6543_v53 = vpack.c.bf16 %v6334_v1, %v6320_v23 }
 0x9e9   : > { %v3398_v13 = vpack.c.bf16 %v3394_v61, %v3393_v59  ;;  %v5031_v61 = vld [vmem:[%s5660_s6 + $0x38] sm:$0xff] }
 0x9ea   : > { %4583 = vmatmul.mubr.msk.bf16.vlgmr.msra.gmra.mrb[16].mxu0 %vm636_vm1, %v3038_v43  ;;  %v3154_v43 = vmul.f32 %v6245_v0, %v5843_v8  ;;  %v3274_v0 = vpack.c.bf16 %v6240_v6, %v6229_v4  ;;  %v3276_v4 = vpack.c.bf16 %v3272_v22, %v6274_v32  ;;  %v3395_v6 = vpack.c.bf16 %v3388_v39, %v3387_v12  ;;  %v4947_v32 = vld [vmem:[#allocation13 + $0x68] sm:$0xff]  }
 0x9eb   : > { %4591 = vmatpush3.bf16.msra.mxu0 %v4940_v34  ;;  %4586 = vmatprep.mubr.msk.bf16.mxu0 %vm636_vm1, %v3039_v45  ;;  %v3159_v34 = vpack.c.bf16 %v3152_v9, %v3151_v50  ;;  %v3153_v45 = vmul.f32 %v6231_v28, %v5822_v56  ;;  %v3150_v50 = vld [vmem:[#allocation2 + $0x47] sm:$0xff]  ;;  %v3157_v56 = vmul.f32 %v6264_v52, %v5907_v26  ;;  %v4946_v52 = vld [vmem:[#allocation13 + $0x60] sm:$0xff]  }
 0x9ec   : > { %4592 = vmatprep.subr.bf16.mxu0 %v4941_v30  ;;  %v3158_v8 = vmul.f32 %v3150_v50, %v5905_v25  ;;  %v4944_v28 = vld [vmem:[#allocation13 + $0x50] sm:$0xff]   ;;  %v3515_v44 = vmul.f32 %v3150_v50, %v5907_v26  ;;  %v3634_v25 = vpack.c.bf16 %v6112_v38, %v3272_v22  ;;  %v6544_v26 = vpack.c.bf16 %v6346_v27, %v6342_v51 }
 0x9ed   : > { %v3160_v24 = vpack.c.bf16 %v3154_v43, %v3153_v45  ;;  %v6546_v38 = vld [vmem:[#allocation22_spill] sm:$0xff] }
 0x9ee   : > { %v3162_v16 = vpack.c.bf16 %v3158_v8, %v3157_v56  ;;  %v5026_v56 = vld [vmem:[%s5660_s6] sm:$0xff] }
 0x9ef   : > { %4593 = vmatpush3.bf16.msra.mxu0 %v4941_v30  ;;  %v3161_v30 = vpack.c.bf16 %v3156_v48, %v3155_v57 }
 0x9f0   : > { %4602 = vmatprep.subr.bf16.mxu0 %v4942_v5 }
 0x9f2   : > { %4587 = vmatmul.mubr.msk.bf16.gmra.mrb[20].mxu0 %vm636_vm1, %v3040_v21 }
 0x9f3   : > { %4594 = vmatprep.mubr.msk.bf16.mxu0 %vm636_vm1, %v3159_v34 }
 0x9fa   : > { %4595 = vmatmul.mubr.msk.bf16.vlgmr.msra.gmra.mrb[16].mxu0 %vm636_vm1, %v3160_v24 }
 0x9fb   : > { %4603 = vmatpush3.bf16.msra.mxu0 %v4942_v5  ;;  %4598 = vmatprep.mubr.msk.bf16.mxu0 %vm636_vm1, %v3161_v30  ;;  %v3520_v5 = vpack.c.bf16 %v3516_v63, %v3515_v44 }
 0x9fc   : > { %4604 = vmatprep.subr.bf16.mxu0 %v4943_v10 }
 0x9ff   : > { %4605 = vmatpush3.bf16.msra.mxu0 %v4943_v10  ;;  %v5025_v10 = vld [vmem:[%s5660_s6 + $0x10] sm:$0xff] }
 0xa00   : > { %4614 = vmatprep.subr.bf16.mxu0 %v4944_v28 }
 0xa02   : > { %4599 = vmatmul.mubr.msk.bf16.gmra.mrb[20].mxu0 %vm636_vm1, %v3162_v16  ;;  %v5027_v16 = vld [vmem:[%s5660_s6 + $0x18] sm:$0xff] }
 0xa03   : > { %4606 = vmatprep.mubr.msk.bf16.mxu0 %vm636_vm1, %v3273_v15 }
 0xa0a   : > { %4607 = vmatmul.mubr.msk.bf16.vlgmr.msra.gmra.mrb[16].mxu0 %vm636_vm1, %v3274_v0  ;;  %v5028_v0 = vld [vmem:[%s5660_s6 + $0x8] sm:$0xff] }
 0xa0b   : > { %4615 = vmatpush3.bf16.msra.mxu0 %v4944_v28  ;;  %4610 = vmatprep.mubr.msk.bf16.mxu0 %vm636_vm1, %v3275_v7 }
 0xa0c   : > { %4616 = vmatprep.subr.bf16.mxu0 %v4945_v2 }
 0xa0f   : > { %4617 = vmatpush3.bf16.msra.mxu0 %v4945_v2 }
 0xa10   : > { %4626 = vmatprep.subr.bf16.mxu0 %v4946_v52 }
 0xa12   : > { %4611 = vmatmul.mubr.msk.bf16.gmra.mrb[20].mxu0 %vm636_vm1, %v3276_v4 }
 0xa13   : > { %4618 = vmatprep.mubr.msk.bf16.mxu0 %vm636_vm1, %v3395_v6 }
 0xa1a   : > { %4619 = vmatmul.mubr.msk.bf16.vlgmr.msra.gmra.mrb[16].mxu0 %vm636_vm1, %v3396_v42 }
 0xa1b   : > { %4627 = vmatpush3.bf16.msra.mxu0 %v4946_v52  ;;  %4622 = vmatprep.mubr.msk.bf16.mxu0 %vm636_vm1, %v3397_v3  ;;  %v5030_v3 = vld [vmem:[%s5660_s6 + $0x20] sm:$0xff] }
 0xa1c   : > { %4628 = vmatprep.subr.bf16.mxu0 %v4947_v32 }
 0xa1f   : > { %4629 = vmatpush3.bf16.msra.mxu0 %v4947_v32 }
 0xa20   : > { %4638 = vmatprep.subr.bf16.mxu0 %v4948_v31 }
 0xa22   : > { %4623 = vmatmul.mubr.msk.bf16.gmra.mrb[20].mxu0 %vm636_vm1, %v3398_v13  ;;  %v5032_v13 = vld [vmem:[%s5660_s6 + $0x28] sm:$0xff] }
 0xa23   : > { %4630 = vmatprep.mubr.msk.bf16.mxu0 %vm636_vm1, %v6541_v18 }
 0xa2a   : > { %4631 = vmatmul.mubr.msk.bf16.vlgmr.msra.gmra.mrb[16].mxu0 %vm636_vm1, %v6542_v29 }
 0xa2b   : > { %4639 = vmatpush3.bf16.msra.mxu0 %v4948_v31  ;;  %4634 = vmatprep.mubr.msk.bf16.mxu0 %vm636_vm1, %v6543_v53 }
 0xa2c   : > { %4640 = vmatprep.subr.bf16.mxu0 %v4949_v55 }
 0xa2f   : > { %4641 = vmatpush3.bf16.msra.mxu0 %v4949_v55 }
 0xa30   : > { %4650 = vmatprep.subr.bf16.mxu0 %v4950_v40 }
 0xa32   : > { %4635 = vmatmul.mubr.msk.bf16.gmra.mrb[20].mxu0 %vm636_vm1, %v3520_v5 }
 0xa33   : > { %4642 = vmatprep.mubr.msk.bf16.mxu0 %vm636_vm1, %v6238_v37  ;;  %v6545_v37 = vpack.c.bf16 %v6356_v33, %v6352_v46 }
 0xa3a   : > { %4643 = vmatmul.mubr.msk.bf16.vlgmr.msra.gmra.mrb[16].mxu0 %vm636_vm1, %v6257_v58  ;;  %v3751_v58 = vmul.f32 %v3386_v17, %v5980_v41 }
 0xa3b   : > { %4651 = vmatpush3.bf16.msra.mxu0 %v4950_v40  ;;  %4646 = vmatprep.mubr.msk.bf16.mxu0 %vm636_vm1, %v6286_v49 }
 0xa3c   : > { %4652 = vmatprep.subr.bf16.mxu0 %v4951_v54  ;;  %v3756_v49 = vpack.c.bf16 %v6546_v38, %v3751_v58 }
 0xa3f   : > { %4653 = vmatpush3.bf16.msra.mxu0 %v4951_v54 }
 0xa42   : > { %4647 = vmatmul.mubr.msk.bf16.gmra.mrb[20].mxu0 %vm636_vm1, %v3634_v25 }
 0xa43   : > { %4654 = vmatprep.mubr.msk.bf16.mxu0 %vm636_vm1, %v6544_v26 }
 0xa4a   : > { %4655 = vmatmul.mubr.msk.bf16.vlgmr.msra.gmra.mrb[16].mxu0 %vm636_vm1, %v6545_v37 }
 0xa4b   : > { %4658 = vmatprep.mubr.msk.bf16.mxu0 %vm636_vm1, %v3755_v11 }
 0xa52   : > { %4659 = vmatmul.mubr.msk.bf16.gmra.mrb[20].mxu0 %vm636_vm1, %v3756_v49 }
 0xaaa   : > { %v4560_v19 = vpop.f32.mrb[12].mxu1 }
 0xaab   : > { %v2901_v23 = vpop.f32.mrb[13].mxu1 }
 0xaac   : > { %v4561_v1 = vpop.f32.mrb[14].mxu1 }
 0xaad   : > { %v2904_v51 = vpop.f32.mrb[15].mxu1 }
 0xab2   : > { %v4564_v27 = vpop.f32.mrb[16].mxu1 }
 0xab3   : > { %v2917_v46 = vpop.f32.mrb[17].mxu1 }
 0xab4   : > { %v4565_v33 = vpop.f32.mrb[18].mxu1 }
 0xab5   : > { %v2920_v9 = vpop.f32.mrb[19].mxu1 }
 0xb1d   : > { %v4656_v62 = vpop.f32.mrb[16].mxu0 }
 0xb1e   : > { %v4686_v11 = vadd.f32 %v4656_v62, %v4560_v19  ;;  %v3820_v21 = vpop.f32.mrb[17].mxu0 }
 0xb1f   : > { %v4687_v41 = vadd.f32 %v3820_v21, %v2901_v23  ;;  %v4657_v34 = vpop.f32.mrb[18].mxu0 }
 0xb20   : > { %v3867_v45 = vadd.f32 %v4686_v11, %v4230_v47  ;;  %v4688_v43 = vadd.f32 %v4657_v34, %v4561_v1  ;;  %v3823_v57 = vpop.f32.mrb[19].mxu0 }
 0xb21   : > { %v3865_v48 = vadd.f32 %v4687_v41, %v4230_v47  ;;  %v4689_v24 = vadd.f32 %v3823_v57, %v2904_v51 }
 0xb22   : > { %v3875_v30 = vadd.f32 %v5025_v10, %v3867_v45  ;;  %v3868_v50 = vadd.f32 %v4688_v43, %v4230_v47 }
 0xb23   : > { %v3873_v8 = vadd.f32 %v5026_v56, %v3865_v48  ;;  %v3866_v28 = vadd.f32 %v4689_v24, %v4230_v47 }
 0xb24   : > { %3883 = vst.msk [vmem:[%s6471_s27 + $0x10] sm:$0xff] %vm636_vm1, %v3875_v30  ;;  %v3876_v15 = vadd.f32 %v5027_v16, %v3868_v50 }
 0xb25   : > { %3881 = vst.msk [vmem:[%s6471_s27] sm:$0xff] %vm636_vm1, %v3873_v8  ;;  %v3874_v2 = vadd.f32 %v5028_v0, %v3866_v28  ;;  %v4660_v7 = vpop.f32.mrb[20].mxu0 }
 0xb26   : > { %3884 = vst.msk [vmem:[%s6471_s27 + $0x18] sm:$0xff] %vm636_vm1, %v3876_v15  ;;  %v4690_v52 = vadd.f32 %v4660_v7, %v4564_v27  ;;  %v3836_v22 = vpop.f32.mrb[21].mxu0 }
 0xb27   : > { %3882 = vst.msk [vmem:[%s6471_s27 + $0x8] sm:$0xff] %vm636_vm1, %v3874_v2  ;;  %v4691_v12 = vadd.f32 %v3836_v22, %v2917_v46  ;;  %v4661_v39 = vpop.f32.mrb[22].mxu0 }
 0xb28   : > { %v3871_v4 = vadd.f32 %v4690_v52, %v4230_v47  ;;  %v4692_v6 = vadd.f32 %v4661_v39, %v4565_v33  ;;  %v3839_v14 = vpop.f32.mrb[23].mxu0 }
 0xb29   : > { %v3869_v20 = vadd.f32 %v4691_v12, %v4230_v47  ;;  %v4693_v36 = vadd.f32 %v3839_v14, %v2920_v9 }
 0xb2a   : > { %v3879_v42 = vadd.f32 %v5029_v35, %v3871_v4  ;;  %v3872_v32 = vadd.f32 %v4692_v6, %v4230_v47 }
 0xb2b   : > { %v3877_v17 = vadd.f32 %v5030_v3, %v3869_v20  ;;  %v3870_v59 = vadd.f32 %v4693_v36, %v4230_v47 }
 0xb2c   : > { %3887 = vst.msk [vmem:[%s6471_s27 + $0x30] sm:$0xff] %vm636_vm1, %v3879_v42  ;;  %v3880_v31 = vadd.f32 %v5031_v61, %v3872_v32 }
 0xb2d   : > { %3885 = vst.msk [vmem:[%s6471_s27 + $0x20] sm:$0xff] %vm636_vm1, %v3877_v17  ;;  %v3878_v18 = vadd.f32 %v5032_v13, %v3870_v59 }
 0xb2e   : > { %3888 = vst.msk [vmem:[%s6471_s27 + $0x38] sm:$0xff] %vm636_vm1, %v3880_v31 }
 0xb2f   : > { %3886 = vst.msk [vmem:[%s6471_s27 + $0x28] sm:$0xff] %vm636_vm1, %v3878_v18 }
 0xb30 PF: > { %s6548_s21 = sld [smem:[#allocation21_spill]] }
 0xb36   : > { %s30_s18 = sadd.s32 1, %s6548_s21  }
 0xb37   : > { %p27_p13 = scmp.ge.s32.totalorder %s30_s18, 4  }
 0xb39   :  { %29 = sbr.rel (!%p27_p13) target bundleno = 9 (0x9), region = 162 }
 0xb40   :  { %3910 = vsyncpa [#allocation4], 1 }
 0xb41   :  { %3912 = vsyncpa [#allocation4 + $0x1], 1 }
 0xb42   :  { %3913 = vsyncpa [#allocation6], 1 }
 0xb43   :  { %3914 = vsyncpa [#allocation9], 1 }
 0xb44   :  { %3915 = vsyncpa [#allocation12], 1 }
 0xb45   :  { %3916 = vsyncpa [#allocation15], 1 }

// kernel: unet_mid_block_forward.3
= control target key start
LH: loop header
LB: loop body
LE: loop exit
PB: predicated region body
PF: predicated region fallthrough
CT: control target
= control target key end

     0   :  { %s6040_s0 = inlined_call_operand.vmem [shape: f32[2,64,32], index: 0, kind: input, shape index: {}]   ;;  %s6041_s1 = inlined_call_operand.vmem [shape: f32[2,1,32], index: 1, kind: input, shape index: {}]   ;;  %s6042_s2 = inlined_call_operand.vmem [shape: f32[64,2], index: 2, kind: input, shape index: {}]   ;;  %s6043_s3 = inlined_call_operand.vmem [shape: f32[32,8], index: 3, kind: input, shape index: {}]   ;;  %s6044_s4 = inlined_call_operand.vmem [shape: f32[8,32], index: 4, kind: input, shape index: {}]   ;;  %s6045_s5 = inlined_call_operand.vmem [shape: f32[1,32], index: 5, kind: input, shape index: {}]   ;;  %s6046_s6 = inlined_call_operand.vmem [shape: f32[1,32], index: 6, kind: input, shape index: {}]   ;;  %s6047_s7 = inlined_call_operand.vmem [shape: bf16[9,32,32], index: 7, kind: input, shape index: {}]   ;;  %s6048_s8 = inlined_call_operand.vmem [shape: f32[1,32], index: 8, kind: input, shape index: {}]   ;;  %s6049_s9 = inlined_call_operand.vmem [shape: bf16[32,32], index: 9, kind: input, shape index: {}]   ;;  %s6050_s10 = inlined_call_operand.vmem [shape: f32[1,32], index: 10, kind: input, shape index: {}]   ;;  %s6051_s11 = inlined_call_operand.vmem [shape: f32[1,32], index: 11, kind: input, shape index: {}]   ;;  %s6052_s12 = inlined_call_operand.vmem [shape: f32[1,32], index: 12, kind: input, shape index: {}]   ;;  %s6053_s13 = inlined_call_operand.vmem [shape: bf16[9,32,32], index: 13, kind: input, shape index: {}]   ;;  %s6054_s14 = inlined_call_operand.vmem [shape: f32[1,32], index: 14, kind: input, shape index: {}]   ;;  %s6055_s15 = inlined_call_operand.hbm [shape: f32[2,64,32], index: 15, kind: output, shape index: {}]  }
   0x1   :  { %6060 = sst [smem:[#allocation10_spill]] %s6040_s0 }
   0x2   :  { %6061 = sst [smem:[#allocation11_spill]] %s6043_s3 }
   0x3   :  { %20 = vsyncpa [#allocation4], 0 }
   0x4   :  { %22 = vsyncpa [#allocation4 + $0x1], 0  ;;  %s4987_s18 = smov 0   ;;  %s4989_s19 = smov 0  }
   0x5   :  { %s4991_s20 = smov 0   ;;  %s4993_s21 = smov 0  }
   0x6 LB: > { %6062 = sst [smem:[#allocation6_spill]] %s4893_s20  ;;  %s5008_s22 = sadd.s32 4294967295, %s4897_s21   ;;  %s4897_s21 = sphi %s4993_s21, %s6077_s21   ;;  %s4893_s20 = sphi %s4991_s20, %s6079_s20   ;;  %s4889_s19 = sphi %s4989_s19, %s6081_s19   ;;  %s4885_s18 = sphi %s4987_s18, %s6080_s18  }
   0x7   : > { %s3867_s23 = sadd.s32 4294967294, %s4897_s21   ;;  %s5012_s24 = sadd.s32 1, %s4897_s21  }
   0x8   : > { %6063 = sst [smem:[#allocation7_spill]] %s5012_s24  ;;  %s360_s25 = sadd.s32 1, %s4893_s20 }
   0x9   : > { %s357_s26 = ssub.s32 %s4897_s21, %s5012_s24  ;;  %p370_p0 = scmp.ne.s32.totalorder %s4893_s20, %s4889_s19 }
   0xa   : > { %p358_p1 = scmp.eq.s32.totalorder %s357_s26, 0  ;;  %p371_p2 = scmp.eq.s32.totalorder %s5008_s22, 1 }
   0xb   : > { %p376_p3 = scmp.ne.s32.totalorder %s4889_s19, %s4885_s18  ;;  %p377_p4 = scmp.eq.s32.totalorder %s3867_s23, 1 }
   0xc   : > { %s5023_s27 = scalar_select %p358_p1, %s4893_s20, %s360_s25  }
   0xd   : > { %p5025_p5 = por %p371_p2, %p370_p0  ;;  %p5029_p6 = por %p377_p4, %p376_p3 }
   0xe   : > { %6064 = sst [smem:[#allocation8_spill]] %s5023_s27  ;;  %p3870_p7 = scmp.ge.s32.totalorder %s4897_s21, 1 }
   0xf   : > { %s6066_s29 = scalar_select %p5029_p6, 1, 0 }
  0x10   : > { %p448_p8 = scmp.lt.s32.totalorder %s4897_s21, 3 }
  0x11   : > { %6067 = sst [smem:[#allocation9_spill]] %s6066_s29 }
  0x12   : > { %p449_p9 = pnand %p3870_p7, %p448_p8 }
  0x13   : > { %s6068_s3 = sld [smem:[#allocation11_spill]] (!%p449_p9)  ;;  %v4899_v3 = vmov (!%p449_p9), 0.0|0.0   ;;  %vm4900_vm0 = vmmov (!%p449_p9), 0   ;;  %v4901_v6 = vmov (!%p449_p9), 0.0   ;;  %p499_p10 = scmp.lt.s32.totalorder (!%p449_p9), %s5008_s22, 1  ;;  %vm529_vm1 = vcmask (!%p449_p9), 261120  }
  0x14   : > { %452 = sbr.rel (%p449_p9) target bundleno = 2684 (0xa7c), region = 80  ;;  %4514 = vmatprep.subr.bf16.mxu0 (!%p449_p9), %v4899_v3  ;;  %4234 = vmatprep.mubr.msk.f32.mxu0 (!%p449_p9), %vm4900_vm0, %v4901_v6  ;;  %530 = vst.msk [vmem:[#allocation2] sm:$0xff] (!%p449_p9), %vm529_vm1, %v4901_v6  ;;  %531 = vst.msk [vmem:[#allocation2 + $0x8] sm:$0xff] (!%p449_p9), %vm529_vm1, %v4901_v6  ;;  %s6069_s0 = sld [smem:[#allocation10_spill]] (!%p449_p9)  ;;  %v5119_v37 = vld [vmem:[%s6044_s4] sm:$0xff] (!%p449_p9)  ;;  %vm639_vm2 = vcmask (!%p449_p9), 64512   ;;  %v713_v41 = vlaneseq (!%p449_p9) }
  0x15   : > { %532 = vst.msk [vmem:[#allocation2 + $0x10] sm:$0xff] (!%p449_p9), %vm529_vm1, %v4901_v6  ;;  %533 = vst.msk [vmem:[#allocation2 + $0x18] sm:$0xff] (!%p449_p9), %vm529_vm1, %v4901_v6  ;;  %4237 = vmatprep.subr.mxu1 (!%p449_p9), %v4901_v6  ;;  %4239 = vmatprep.mubr.msk.f32.mxu1 (!%p449_p9), %vm4900_vm0, %v4901_v6  ;;  %s496_s30 = sand.u32 (!%p449_p9), 1, %s4889_s19  }
  0x16   : > { %534 = vst.msk [vmem:[#allocation2 + $0x20] sm:$0xff] (!%p449_p9), %vm529_vm1, %v4901_v6  ;;  %535 = vst.msk [vmem:[#allocation2 + $0x28] sm:$0xff] (!%p449_p9), %vm529_vm1, %v4901_v6  ;;  %4238 = vmatpush3.msra.mxu1 (!%p449_p9), %v5119_v37  ;;  %v714_v42 = vshrl.u32 (!%p449_p9), %v713_v41, 7  ;;  %s3871_s23 = sshll.u32 (!%p449_p9), %s496_s30, 6 }
  0x17   : > { %536 = vst.msk [vmem:[#allocation2 + $0x30] sm:$0xff] (!%p449_p9), %vm529_vm1, %v4901_v6  ;;  %537 = vst.msk [vmem:[#allocation2 + $0x38] sm:$0xff] (!%p449_p9), %vm529_vm1, %v4901_v6  ;;  %4520 = vmatprep.subr.bf16.mxu1 (!%p449_p9), %v4899_v3  ;;  %s5964_s25 = scalar_lea.vmem (!%p449_p9), [#allocation3], %s3871_s23 }
  0x18   : > { %538 = vst.msk [vmem:[#allocation2 + $0x40] sm:$0xff] (!%p449_p9), %vm529_vm1, %v4901_v6  ;;  %539 = vst.msk [vmem:[#allocation2 + $0x48] sm:$0xff] (!%p449_p9), %vm529_vm1, %v4901_v6  ;;  %v5131_v43 = vsub.s32 (!%p449_p9), 0, %v714_v42 }
  0x19   : > { %v516_v0 = vld [vmem:[%s6068_s3] sm:$0xff] (!%p449_p9)  ;;  %v517_v1 = vld [vmem:[%s6068_s3 + $0x8] sm:$0xff] (!%p449_p9)  ;;  %v518_v2 = vld [vmem:[%s6068_s3 + $0x10] sm:$0xff] (!%p449_p9)  ;;  %540 = vst.msk [vmem:[#allocation2 + $0x50] sm:$0xff] (!%p449_p9), %vm529_vm1, %v4901_v6 }
  0x1a   : > { %v5045_v4 = vpack.c.bf16 (!%p449_p9), %v517_v1, %v516_v0  ;;  %v519_v5 = vld [vmem:[%s6068_s3 + $0x18] sm:$0xff] (!%p449_p9)  ;;  %541 = vst.msk [vmem:[#allocation2 + $0x58] sm:$0xff] (!%p449_p9), %vm529_vm1, %v4901_v6  ;;  %s3796_s3 = sshll.u32 (!%p449_p9), %s5964_s25, 4  ;;  %s5988_s3 = int_to_ptr.vmem [resolvable:$true] %s3796_s3 }
  0x1b   : > { %v5081_v7 = vpack.c.bf16 %v519_v5, %v518_v2  ;;  %s5086_s20 = scalar_select %p499_p10, %s5008_s22, 1 }
  0x1c   : > { %4516 = vmatpush3.bf16.msra.mxu0 %v5045_v4 }
  0x1d   : > { %4517 = vmatprep.subr.bf16.mxu0 %v4899_v3  ;;  %s4085_s27 = sshll.u32 %s5086_s20, 6  ;;  %s506_s26 = scalar_lea.vmem %s6041_s1, %s5086_s20 }
  0x1e   : > { %s5093_s17 = scalar_lea.vmem %s6069_s0, %s4085_s27  ;;  %s4086_s0 = sshll.u32 %s5008_s22, 10 }
  0x1f   : > { %v508_v8 = vld [vmem:[%s5093_s17] sm:$0xff]  ;;  %v509_v9 = vld [vmem:[%s5093_s17 + $0x8] sm:$0xff]  ;;  %v510_v10 = vld [vmem:[%s5093_s17 + $0x10] sm:$0xff]  ;;  %s5999_s22 = scalar_lea.sflag [#allocation4], %s496_s30  ;;  %s4835_s27 = scalar_lea.vmem %s5988_s3, 1024 }
  0x20   : > { %4519 = vmatpush3.bf16.msra.mxu0 %v5081_v7  ;;  %v511_v11 = vld [vmem:[%s5093_s17 + $0x18] sm:$0xff]  ;;  %v512_v12 = vld [vmem:[%s5093_s17 + $0x20] sm:$0xff]  ;;  %v513_v13 = vld [vmem:[%s5093_s17 + $0x28] sm:$0xff]  ;;  %v544_v14 = vsel %vm529_vm1, %v508_v8, 0.0  ;;  %v545_v15 = vsel %vm529_vm1, %v509_v9, 0.0  ;;  %v547_v16 = vsel %vm529_vm1, %v510_v10, 0.0  ;;  %p4836_p11 = scmp.ne.s32.totalorder %s5988_s3, %s4835_s27 }
  0x21   : > { %4253 = vmatprep.subr.mxu0 %v4901_v6  ;;  %v514_v17 = vld [vmem:[%s5093_s17 + $0x30] sm:$0xff]  ;;  %v515_v18 = vld [vmem:[%s5093_s17 + $0x38] sm:$0xff]  ;;  %v546_v19 = vadd.f32 %v545_v15, %v544_v14  ;;  %v549_v20 = vsel %vm529_vm1, %v511_v11, 0.0  ;;  %v551_v21 = vsel %vm529_vm1, %v512_v12, 0.0  ;;  %v553_v22 = vsel %vm529_vm1, %v513_v13, 0.0  ;;  %s4904_s20 = smov [#allocation3]  }
  0x22   : > { %v555_v23 = vsel %vm529_vm1, %v514_v17, 0.0  ;;  %v557_v24 = vsel %vm529_vm1, %v515_v18, 0.0  ;;  %p4837_p12 = pnand %p4836_p11, %p5025_p5  ;;  %s4839_s16 = sshll.u32 %s4904_s20, 4  ;;  %s4840_s16 = int_to_ptr.vmem [resolvable:$false] %s4839_s16 }
  0x23   : > { %v548_v25 = vadd.f32 %v547_v16, %v546_v19  ;;  %s4841_s23 = scalar_lea.vmem %s4840_s16, 2048  ;;  %p4842_p0 = scmp.lt.s32.totalorder %s5988_s3, %s4840_s16 }
  0x24   : > { %p4838_p13 = pneg %p4837_p12  ;;  %p4843_p1 = scmp.lt.s32.totalorder %s4841_s23, %s4835_s27 }
  0x25   : > { %v550_v26 = vadd.f32 %v549_v20, %v548_v25  ;;  %v521_v25 = vld [vmem:[%s6042_s2] sm:$0xff] }
  0x26   : > { %p4844_p2 = por %p4843_p1, %p4842_p0 }
  0x27   : > { %v552_v27 = vadd.f32 %v551_v21, %v550_v26  ;;  %v4902_v26 = vmov 0  }
  0x28   : > { %4713 = vset.pattern.permute.xlu1 %v4902_v26  ;;  %4712 = vset.pattern.permute.xlu0 %v4902_v26  ;;  %p4845_p3 = pnand %p4844_p2, %p4838_p13 }
  0x29   : > { %v554_v28 = vadd.f32 %v553_v22, %v552_v27  ;;  %1017 = vperm.xlu0 %4712, %v521_v25   ;;  %v524_v27 = vld [vmem:[%s6042_s2 + $0x18] sm:$0xff] }
  0x2b   : > { %v556_v29 = vadd.f32 %v555_v23, %v554_v28  ;;  %v522_v28 = vld [vmem:[%s6042_s2 + $0x8] sm:$0xff] }
  0x2d   : > { %v558_v30 = vadd.f32 %v557_v24, %v556_v29  ;;  %v523_v24 = vld [vmem:[%s6042_s2 + $0x10] sm:$0xff]  ;;  %1022 = vperm.xlu0 %4712, %v522_v28   ;;  %v526_v29 = vld [vmem:[%s6042_s2 + $0x28] sm:$0xff] }
  0x2e   : > { %1027 = vperm.xlu1 %4713, %v523_v24  }
  0x2f   : > { %v559_v31 = vrot.slane %v558_v30, 4 }
  0x31   : > { %v560_v32 = vadd.f32 %v559_v31, %v558_v30  ;;  %v525_v30 = vld [vmem:[%s6042_s2 + $0x20] sm:$0xff]  ;;  %v528_v31 = vld [vmem:[%s6042_s2 + $0x38] sm:$0xff] }
  0x32   : > { %1032 = vperm.xlu1 %4713, %v524_v27   ;;  %1037 = vperm.xlu0 %4712, %v525_v30  }
  0x33   : > { %v561_v33 = vrot.slane %v560_v32, 2 }
  0x35   : > { %v562_v34 = vadd.f32 %v561_v33, %v560_v32  ;;  %v527_v32 = vld [vmem:[%s6042_s2 + $0x30] sm:$0xff]  ;;  %v4903_v33 = vmov 1  }
  0x36   : > { %1042 = vperm.xlu1 %4713, %v526_v29   ;;  %1047 = vperm.xlu0 %4712, %v527_v32  }
  0x37   : > { %v563_v35 = vrot.slane %v562_v34, 1 }
  0x39   : > { %v564_v36 = vadd.f32 %v563_v35, %v562_v34 }
  0x3a   : > { %1052 = vperm.xlu1 %4713, %v528_v31   ;;  %4714 = vset.pattern.permute.xlu0 %v4903_v33 }
  0x3b   : > { %4235 = vmatmul.mubr.msk.f32.vlgmr.msra.gmra.mrb[0].mxu0 %vm529_vm1, %v564_v36  ;;  %1275 = vperm.xlu0 %4714, %v521_v25  }
  0x3c   : > { %4255 = vmatprep.mubr.msk.f32.mxu0 %vm4900_vm0, %v4901_v6  ;;  %4254 = vmatpush3.msra.mxu0 %v5119_v37 }
  0x3d   : > { %4366 = vmatprep.subr.bf16.mxu0 %v4901_v6 }
  0x3e   : > { %4715 = vset.pattern.permute.xlu1 %v4903_v33 }
  0x3f   : > { %1279 = vperm.xlu1 %4715, %v522_v28   ;;  %1287 = vperm.xlu0 %4714, %v524_v27  }
  0x43   : > { %1283 = vperm.xlu1 %4715, %v523_v24   ;;  %1295 = vperm.xlu0 %4714, %v526_v29  }
  0x47   : > { %1291 = vperm.xlu1 %4715, %v525_v30   ;;  %1303 = vperm.xlu0 %4714, %v528_v31  }
  0x4b   : > { %1299 = vperm.xlu1 %4715, %v527_v32  }
 0x10e   : > { %v634_v38 = vpop.f32.mrb[0].mxu0 }
 0x10f   : > { %v638_v39 = vmul.f32 0.00390625, %v634_v38  ;;  %v4236_v40 = vpop.f32.mrb[1].mxu0  ;;  %v4716_v38 = vld [vmem:[%s6047_s7 + $0x10] sm:$0xff]  }
 0x110   : > { %v5211_v40 = vld [vmem:[%s6047_s7] sm:$0xff]  }
 0x111   : > { %4240 = vmatmul.mubr.msk.f32.vlgmr.msra.gmra.mrb[0].mxu1 %vm639_vm2, %v638_v39  ;;  %v4717_v39 = vld [vmem:[%s6047_s7 + $0x18] sm:$0xff]  }
 0x112   : > { %4522 = vmatpush3.bf16.msra.mxu1 %v5045_v4  ;;  %4250 = vmatprep.mubr.msk.f32.mxu1 %vm4900_vm0, %v4901_v6 }
 0x113   : > { %4523 = vmatprep.subr.bf16.mxu1 %v4899_v3 }
 0x116   : > { %4525 = vmatpush3.bf16.msra.mxu1 %v5081_v7 }
 0x117   : > { %4258 = vmatprep.subr.bf16.mxu1 %v4716_v38 }
 0x1e4   : > { %v709_v44 = vpop.f32.mrb[0].mxu1 }
 0x1e5   : > { %v716_v45 = vrot.slane %v709_v44, %v5131_v43  ;;  %v4241_v46 = vpop.f32.mrb[1].mxu1 }
 0x1e7   : > { %v5134_v47 = vsub.f32 %v508_v8, %v716_v45  ;;  %v5136_v48 = vsub.f32 %v509_v9, %v716_v45  ;;  %v5138_v49 = vsub.f32 %v510_v10, %v716_v45  ;;  %v5140_v50 = vsub.f32 %v511_v11, %v716_v45 }
 0x1e8   : > { %v5142_v51 = vsub.f32 %v512_v12, %v716_v45  ;;  %v5150_v55 = vsub.f32 %v513_v13, %v716_v45  ;;  %v5156_v60 = vsub.f32 %v514_v17, %v716_v45  ;;  %v5161_v0 = vsub.f32 %v515_v18, %v716_v45 }
 0x1e9   : > { %v725_v52 = vmul.f32 %v5134_v47, %v5134_v47  ;;  %v726_v53 = vmul.f32 %v5136_v48, %v5136_v48  ;;  %v727_v54 = vmul.f32 %v5138_v49, %v5138_v49  ;;  %v728_v56 = vmul.f32 %v5140_v50, %v5140_v50 }
 0x1ea   : > { %v729_v61 = vmul.f32 %v5142_v51, %v5142_v51  ;;  %v730_v1 = vmul.f32 %v5150_v55, %v5150_v55  ;;  %v731_v8 = vmul.f32 %v5156_v60, %v5156_v60  ;;  %v732_v11 = vmul.f32 %v5161_v0, %v5161_v0 }
 0x1eb   : > { %v733_v57 = vsel %vm529_vm1, %v725_v52, 0.0  ;;  %v734_v58 = vsel %vm529_vm1, %v726_v53, 0.0  ;;  %v736_v62 = vsel %vm529_vm1, %v727_v54, 0.0  ;;  %v738_v2 = vsel %vm529_vm1, %v728_v56, 0.0  ;;  %v3878_v52 = vld [vmem:[%s6045_s5] ss:$0 sm:$0xff] }
 0x1ec   : > { %v735_v59 = vadd.f32 %v734_v58, %v733_v57  ;;  %v740_v9 = vsel %vm529_vm1, %v729_v61, 0.0  ;;  %v742_v12 = vsel %vm529_vm1, %v730_v1, 0.0  ;;  %v744_v14 = vsel %vm529_vm1, %v731_v8, 0.0  ;;  %v3879_v58 = vld [vmem:[%s6046_s6] ss:$0 sm:$0xff] }
 0x1ed   : > { %v746_v16 = vsel %vm529_vm1, %v732_v11, 0.0 }
 0x1ee   : > { %v737_v63 = vadd.f32 %v736_v62, %v735_v59 }
 0x1f0   : > { %v739_v5 = vadd.f32 %v738_v2, %v737_v63 }
 0x1f2   : > { %v741_v10 = vadd.f32 %v740_v9, %v739_v5 }
 0x1f4   : > { %v743_v13 = vadd.f32 %v742_v12, %v741_v10 }
 0x1f6   : > { %v745_v15 = vadd.f32 %v744_v14, %v743_v13 }
 0x1f8   : > { %v747_v17 = vadd.f32 %v746_v16, %v745_v15 }
 0x1fa   : > { %v748_v18 = vrot.slane %v747_v17, 4 }
 0x1fc   : > { %v749_v19 = vadd.f32 %v748_v18, %v747_v17 }
 0x1fe   : > { %v750_v20 = vrot.slane %v749_v19, 2 }
 0x200   : > { %v751_v21 = vadd.f32 %v750_v20, %v749_v19 }
 0x202   : > { %v752_v22 = vrot.slane %v751_v21, 1 }
 0x204   : > { %v753_v23 = vadd.f32 %v752_v22, %v751_v21 }
 0x206   : > { %4251 = vmatmul.mubr.msk.f32.vlgmr.msra.gmra.mrb[2].mxu1 %vm529_vm1, %v753_v23 }
 0x207   : > { %4259 = vmatpush3.bf16.msra.mxu1 %v4716_v38 }
 0x208   : > { %4260 = vmatprep.subr.bf16.mxu1 %v4717_v39 }
 0x20b   : > { %4261 = vmatpush3.bf16.msra.mxu1 %v4717_v39 }
 0x20c   : > { %4270 = vmatprep.subr.bf16.mxu1 %v5211_v40 }
 0x2d9   : > { %v823_v34 = vpop.f32.mrb[2].mxu1 }
 0x2da   : > { %v827_v35 = vmul.f32 0.00390625, %v823_v34  ;;  %v4252_v36 = vpop.f32.mrb[3].mxu1 }
 0x2dc   : > { %4256 = vmatmul.mubr.msk.f32.vlgmr.msra.gmra.mrb[2].mxu0 %vm639_vm2, %v827_v35 }
 0x2dd   : > { %4370 = vmatprep.mubr.msk.bf16.mxu0 %vm4900_vm0, %v4901_v6 }
 0x3af   : > { %v897_v41 = vpop.f32.mrb[2].mxu0 }
 0x3b0   : > { %v898_v42 = vadd.f32 1e-06, %v897_v41  ;;  %v4257_v44 = vpop.f32.mrb[3].mxu0 }
 0x3b2   : > { %4754 = vrsqrt.f32 %v898_v42  ;;  %v4734_v42 = vld [vmem:[%s6049_s9] sm:$0xff]  }
 0x3b3   : > { %4367 = vmatpush3.bf16.msra.mxu0 %v4734_v42 }
 0x3b4   : > { %4368 = vmatprep.subr.bf16.mxu0 %v4901_v6 }
 0x3bc   : > { %v4755_v45 = vpop.eup %4754 }
 0x3bd   : > { %v905_v46 = vrot.slane %v4755_v45, %v5131_v43 }
 0x3bf   : > { %v906_v53 = vmul.f32 %v905_v46, %v5134_v47  ;;  %v907_v54 = vmul.f32 %v905_v46, %v5136_v48  ;;  %v908_v56 = vmul.f32 %v905_v46, %v5138_v49  ;;  %v909_v57 = vmul.f32 %v905_v46, %v5140_v50 }
 0x3c0   : > { %v910_v59 = vmul.f32 %v905_v46, %v5142_v51  ;;  %v911_v61 = vmul.f32 %v905_v46, %v5150_v55  ;;  %v912_v62 = vmul.f32 %v905_v46, %v5156_v60  ;;  %v913_v63 = vmul.f32 %v905_v46, %v5161_v0 }
 0x3c1   : > { %v920_v1 = vmul.f32 %v3878_v52, %v906_v53  ;;  %v921_v47 = vmul.f32 %v3878_v52, %v907_v54  ;;  %v922_v2 = vmul.f32 %v3878_v52, %v908_v56  ;;  %v923_v48 = vmul.f32 %v3878_v52, %v909_v57  ;;  %v5243_v56 = vpop.permute.xlu1 %1027  ;;  %v5245_v57 = vpop.permute.xlu0 %1017 }
 0x3c2   : > { %v924_v5 = vmul.f32 %v3878_v52, %v910_v59  ;;  %v925_v49 = vmul.f32 %v3878_v52, %v911_v61  ;;  %v926_v8 = vmul.f32 %v3878_v52, %v912_v62  ;;  %v927_v50 = vmul.f32 %v3878_v52, %v913_v63 }
 0x3c3   : > { %v934_v9 = vadd.f32 %v3879_v58, %v920_v1  ;;  %v935_v10 = vadd.f32 %v3879_v58, %v921_v47  ;;  %v936_v11 = vadd.f32 %v3879_v58, %v922_v2  ;;  %v937_v12 = vadd.f32 %v3879_v58, %v923_v48  ;;  %v5259_v2 = vld [vmem:[#allocation2 + $0x8] sm:$0xff] }
 0x3c4   : > { %v938_v13 = vadd.f32 %v3879_v58, %v924_v5  ;;  %v5229_v51 = vadd.f32 %v3879_v58, %v925_v49  ;;  %v5231_v55 = vadd.f32 %v3879_v58, %v926_v8  ;;  %v5233_v16 = vadd.f32 %v3879_v58, %v927_v50  ;;  %v4735_v48 = vld [vmem:[%s6049_s9 + $0x8] sm:$0xff]   ;;  %v5265_v5 = vld [vmem:[%s506_s26] sm:$0x1]  ;;  %s5986_s26 = scalar_lea.hbm %s6055_s15, %s4086_s0 }
 0x3c5   : > { %v3880_v60 = vmul.f32 -1.442695, %v934_v9  ;;  %v3881_v14 = vmul.f32 -1.442695, %v935_v10  ;;  %v3882_v0 = vmul.f32 -1.442695, %v936_v11  ;;  %v5267_v49 = vpop.permute.xlu1 %1032  ;;  %v5269_v8 = vpop.permute.xlu0 %1022  ;;  %4369 = vmatpush3.bf16.msra.mxu0 %v4735_v48 }
 0x3c6   : > { %v3883_v15 = vmul.f32 -1.442695, %v937_v12  ;;  %v3884_v17 = vmul.f32 -1.442695, %v938_v13  ;;  %v3885_v18 = vmul.f32 -1.442695, %v5229_v51  ;;  %4526 = vmatprep.subr.bf16.mxu0 %v4899_v3 }
 0x3c7   : > { %4756 = vpow2.f32 %v3880_v60  ;;  %v3886_v19 = vmul.f32 -1.442695, %v5231_v55  ;;  %v3887_v20 = vmul.f32 -1.442695, %v5233_v16 }
 0x3c8   : > { %4758 = vpow2.f32 %v3881_v14  ;;  %v1007_v14 = vld [vmem:[#allocation2 + $0x7] sm:$0xff] }
 0x3c9   : > { %4760 = vpow2.f32 %v3882_v0 }
 0x3ca   : > { %4762 = vpow2.f32 %v3883_v15  ;;  %v5298_v15 = vpop.permute.xlu1 %1042 }
 0x3cb   : > { %4764 = vpow2.f32 %v3884_v17 }
 0x3cc   : > { %4766 = vpow2.f32 %v3885_v18  ;;  %v4720_v18 = vld [vmem:[%s6047_s7 + $0x20] sm:$0xff]  }
 0x3cd   : > { %4768 = vpow2.f32 %v3886_v19 }
 0x3ce   : > { %4770 = vpow2.f32 %v3887_v20 }
 0x3d1   : > { %v4757_v21 = vpop.eup %4756 }
 0x3d2   : > { %v4759_v22 = vpop.eup %4758  ;;  %v966_v23 = vadd.f32 1.0, %v4757_v21  ;;  %v5317_v21 = vmul.f32 %v5245_v57, %v1007_v14 }
 0x3d3   : > { %v4761_v24 = vpop.eup %4760  ;;  %v967_v25 = vadd.f32 1.0, %v4759_v22 }
 0x3d4   : > { %v4763_v26 = vpop.eup %4762  ;;  %v968_v27 = vadd.f32 1.0, %v4761_v24  ;;  %4772 = vrcp.f32 %v966_v23 }
 0x3d5   : > { %v4765_v28 = vpop.eup %4764  ;;  %v969_v29 = vadd.f32 1.0, %v4763_v26  ;;  %4774 = vrcp.f32 %v967_v25  ;;  %v5329_v25 = vpop.permute.xlu1 %1052 }
 0x3d6   : > { %v4767_v30 = vpop.eup %4766  ;;  %v970_v31 = vadd.f32 1.0, %v4765_v28  ;;  %4776 = vrcp.f32 %v968_v27 }
 0x3d7   : > { %v4769_v32 = vpop.eup %4768  ;;  %v971_v33 = vadd.f32 1.0, %v4767_v30  ;;  %4778 = vrcp.f32 %v969_v29 }
 0x3d8   : > { %v4771_v34 = vpop.eup %4770  ;;  %v972_v35 = vadd.f32 1.0, %v4769_v32  ;;  %4780 = vrcp.f32 %v970_v31 }
 0x3d9   : > { %4782 = vrcp.f32 %v971_v33  ;;  %v973_v36 = vadd.f32 1.0, %v4771_v34 }
 0x3da   : > { %4784 = vrcp.f32 %v972_v35  ;;  %v5349_v35 = vpop.permute.xlu1 %1279 }
 0x3db   : > { %4786 = vrcp.f32 %v973_v36 }
 0x3de   : > { %v4773_v38 = vpop.eup %4772 }
 0x3df   : > { %v4775_v39 = vpop.eup %4774  ;;  %v990_v41 = vmul.f32 %v4773_v38, %v934_v9 }
 0x3e0   : > { %v4777_v44 = vpop.eup %4776  ;;  %v991_v45 = vmul.f32 %v4775_v39, %v935_v10  ;;  %v4721_v39 = vld [vmem:[%s6047_s7 + $0x28] sm:$0xff]  }
 0x3e1   : > { %v4779_v46 = vpop.eup %4778  ;;  %v992_v52 = vmul.f32 %v4777_v44, %v936_v11  ;;  %999 = vst.msk [vmem:[#allocation2 + $0x10] sm:$0xff] %vm529_vm1, %v990_v41 }
 0x3e2   : > { %v4781_v53 = vpop.eup %4780  ;;  %v993_v54 = vmul.f32 %v4779_v46, %v937_v12  ;;  %1000 = vst.msk [vmem:[#allocation2 + $0x18] sm:$0xff] %vm529_vm1, %v991_v45  ;;  %v3975_v12 = vmul.f32 -1.442695, %v5265_v5 }
 0x3e3   : > { %v4783_v58 = vpop.eup %4782  ;;  %v994_v59 = vmul.f32 %v4781_v53, %v938_v13  ;;  %1001 = vst.msk [vmem:[#allocation2 + $0x20] sm:$0xff] %vm529_vm1, %v992_v52 }
 0x3e4   : > { %v4785_v61 = vpop.eup %4784  ;;  %v995_v62 = vmul.f32 %v4783_v58, %v5229_v51  ;;  %1002 = vst.msk [vmem:[#allocation2 + $0x28] sm:$0xff] %vm529_vm1, %v993_v54  ;;  %4788 = vpow2.f32 %v3975_v12  ;;  %v4722_v58 = vld [vmem:[%s6047_s7 + $0x30] sm:$0xff]  }
 0x3e5   : > { %v4787_v63 = vpop.eup %4786  ;;  %1003 = vst.msk [vmem:[#allocation2 + $0x30] sm:$0xff] %vm529_vm1, %v994_v59  ;;  %v996_v1 = vmul.f32 %v4785_v61, %v5231_v55  ;;  %v4719_v55 = vld [vmem:[%s6047_s7 + $0x8] sm:$0xff]   ;;  %v5371_v59 = vpop.permute.xlu1 %1283 }
 0x3e6   : > { %1004 = vst.msk [vmem:[#allocation2 + $0x38] sm:$0xff] %vm529_vm1, %v995_v62  ;;  %v997_v47 = vmul.f32 %v4787_v63, %v5233_v16  ;;  %v5300_v16 = vpop.permute.xlu0 %1037 }
 0x3e7   : > { %1005 = vst.msk [vmem:[#allocation2 + $0x40] sm:$0xff] %vm529_vm1, %v996_v1 }
 0x3e8   : > { %1006 = vst.msk [vmem:[#allocation2 + $0x48] sm:$0xff] %vm529_vm1, %v997_v47  ;;  %v5272_v50 = vld [vmem:[#allocation2 + $0x10] sm:$0xff] }
 0x3e9   : > { %v1079_v9 = vpack.c.bf16 %v5272_v50, %v5259_v2  ;;  %v5276_v10 = vld [vmem:[#allocation2 + $0x18] sm:$0xff]  ;;  %v5296_v0 = vld [vmem:[#allocation2 + $0xf] sm:$0xff]  ;;  %v5387_v14 = vpop.permute.xlu1 %1291 }
 0x3ea   : > { %v5279_v11 = vld [vmem:[#allocation2 + $0x20] sm:$0xff]  ;;  %v5325_v23 = vld [vmem:[#allocation2 + $0x17] sm:$0xff]  ;;  %v5331_v26 = vpop.permute.xlu0 %1047  ;;  %v1266_v46 = vld [vmem:[#allocation2 + $0x9] sm:$0xff] }
 0x3eb   : > { %4262 = vmatprep.mubr.msk.bf16.mxu1 %vm529_vm1, %v1079_v9  ;;  %v5285_v13 = vpack.c.bf16 %v5279_v11, %v5276_v10  ;;  %v5287_v51 = vld [vmem:[#allocation2 + $0x28] sm:$0xff]  ;;  %v5327_v24 = vld [vmem:[#allocation2 + $0x1f] sm:$0xff]  ;;  %v1057_v30 = vmul.f32 %v5243_v56, %v5325_v23  ;;  %v5361_v52 = vld [vmem:[#allocation2 + $0x11] sm:$0xff] }
 0x3ec   : > { %v5292_v60 = vld [vmem:[#allocation2 + $0x30] sm:$0xff]  ;;  %v5334_v28 = vld [vmem:[#allocation2 + $0x27] sm:$0xff]  ;;  %v1058_v31 = vmul.f32 %v5327_v24, %v5267_v49  ;;  %v1307_v63 = vmul.f32 %v5349_v35, %v5361_v52  ;;  %v5378_v47 = vld [vmem:[#allocation2 + $0x19] sm:$0xff] }
 0x3ed   : > { %4263 = vmatmul.mubr.msk.bf16.vlgmr.msra.gmra.mrb[4].mxu1 %vm529_vm1, %v5285_v13  ;;  %v5305_v17 = vpack.c.bf16 %v5292_v60, %v5287_v51  ;;  %v5312_v19 = vld [vmem:[#allocation2 + $0x38] sm:$0xff]  ;;  %v5336_v29 = vld [vmem:[#allocation2 + $0x2f] sm:$0xff]  ;;  %v1059_v33 = vmul.f32 %v5334_v28, %v5300_v16  ;;  %v5380_v48 = vld [vmem:[#allocation2 + $0x21] sm:$0xff] }
 0x3ee   : > { %4271 = vmatpush3.bf16.msra.mxu1 %v5211_v40  ;;  %v5314_v20 = vld [vmem:[#allocation2 + $0x40] sm:$0xff]  ;;  %v1056_v40 = vmul.f32 %v5269_v8, %v5296_v0  ;;  %v4789_v32 = vpop.eup %4788  ;;  %v1060_v34 = vmul.f32 %v5336_v29, %v5298_v15  ;;  %v5351_v36 = vpop.permute.xlu0 %1275  ;;  %v1064_v38 = vpack.c.bf16 %v1058_v31, %v1057_v30  ;;  %v5356_v44 = vld [vmem:[#allocation2 + $0x37] sm:$0xff]  ;;  %v5382_v12 = vld [vmem:[#allocation2 + $0x29] sm:$0xff] }
 0x3ef   : > { %4272 = vmatprep.subr.bf16.mxu1 %v4719_v55  ;;  %4266 = vmatprep.mubr.msk.bf16.mxu1 %vm529_vm1, %v5305_v17  ;;  %v5323_v22 = vpack.c.bf16 %v5314_v20, %v5312_v19  ;;  %v2154_v41 = vadd.f32 1.0, %v4789_v32  ;;  %v5358_v45 = vld [vmem:[#allocation2 + $0x3f] sm:$0xff]  ;;  %v1061_v53 = vmul.f32 %v5331_v26, %v5356_v44  ;;  %v1306_v62 = vmul.f32 %v5351_v36, %v1266_v46 }
 0x3f0   : > { %v1063_v27 = vpack.c.bf16 %v1056_v40, %v5317_v21  ;;  %v1065_v42 = vpack.c.bf16 %v1060_v34, %v1059_v33  ;;  %v1062_v54 = vmul.f32 %v5329_v25, %v5358_v45  ;;  %v1310_v31 = vmul.f32 %v5382_v12, %v5387_v14  ;;  %v5408_v46 = vld [vmem:[#allocation2 + $0x41] sm:$0xff] }
 0x3f1   : > { %4790 = vrcp.f32 %v2154_v41  ;;  %v1314_v9 = vpack.c.bf16 %v1307_v63, %v1306_v62  ;;  %v5404_v41 = vpop.permute.xlu1 %1299  ;;  %v4724_v63 = vld [vmem:[%s6047_s7 + $0x40] sm:$0xff]  }
 0x3f2   : > { %4273 = vmatpush3.bf16.msra.mxu1 %v4719_v55  ;;  %v5373_v61 = vpop.permute.xlu0 %1287  ;;  %v1066_v1 = vpack.c.bf16 %v1062_v54, %v1061_v53  ;;  %v5384_v55 = vld [vmem:[#allocation2 + $0x31] sm:$0xff] }
 0x3f3   : > { %4282 = vmatprep.subr.bf16.mxu1 %v4720_v18  ;;  %v1309_v30 = vmul.f32 %v5380_v48, %v5373_v61 }
 0x3f5   : > { %4267 = vmatmul.mubr.msk.bf16.gmra.mrb[8].mxu1 %vm529_vm1, %v5323_v22 }
 0x3f6   : > { %4274 = vmatprep.mubr.msk.bf16.mxu1 %vm529_vm1, %v1063_v27  ;;  %v1308_v27 = vmul.f32 %v5371_v59, %v5378_v47 }
 0x3fb   : > { %v4791_v40 = vpop.eup %4790 }
 0x3fc   : > { %v2157_v33 = vmul.f32 %v4791_v40, %v5265_v5 }
 0x3fd   : > { %4275 = vmatmul.mubr.msk.bf16.vlgmr.msra.gmra.mrb[4].mxu1 %vm529_vm1, %v1064_v38  ;;  %v1315_v38 = vpack.c.bf16 %v1309_v30, %v1308_v27  ;;  %v1431_v27 = vmul.f32 %v5334_v28, %v5267_v49  ;;  %v1432_v30 = vmul.f32 %v5336_v29, %v5300_v16 }
 0x3fe   : > { %4283 = vmatpush3.bf16.msra.mxu1 %v4720_v18  ;;  %4278 = vmatprep.mubr.msk.bf16.mxu1 %vm529_vm1, %v1065_v42  ;;  %v5389_v18 = vpop.permute.xlu0 %1295  ;;  %v2158_v34 = vpack.c.bf16 %v2157_v33, %v2157_v33  ;;  %v5406_v42 = vld [vmem:[#allocation2 + $0x39] sm:$0xff]  ;;  %v4725_v33 = vld [vmem:[%s6047_s7 + $0x48] sm:$0xff]  }
 0x3ff   : > { %4284 = vmatprep.subr.bf16.mxu1 %v4721_v39  ;;  %v1311_v32 = vmul.f32 %v5384_v55, %v5389_v18  ;;  %v1312_v5 = vmul.f32 %v5404_v41, %v5406_v42 }
 0x400   : > { %4371 = vmatmul.mubr.msk.bf16.vlgmr.msra.gmra.mrb[4].mxu0 %vm529_vm1, %v2158_v34 }
 0x401   : > { %v1316_v54 = vpack.c.bf16 %v1311_v32, %v1310_v31  ;;  %4528 = vmatpush3.bf16.msra.mxu0 %v5045_v4  ;;  %4382 = vmatprep.mubr.msk.f32.mxu0 %vm4900_vm0, %v4901_v6  ;;  %v1433_v31 = vmul.f32 %v5298_v15, %v5356_v44 }
 0x402   : > { %4285 = vmatpush3.bf16.msra.mxu1 %v4721_v39  ;;  %v4723_v39 = vld [vmem:[%s6047_s7 + $0x38] sm:$0xff]   ;;  %v5410_v53 = vpop.permute.xlu0 %1303  ;;  %4529 = vmatprep.subr.bf16.mxu0 %v4899_v3 }
 0x403   : > { %4294 = vmatprep.subr.bf16.mxu1 %v4722_v58  ;;  %v1313_v62 = vmul.f32 %v5408_v46, %v5410_v53  ;;  %v1438_v34 = vpack.c.bf16 %v1433_v31, %v1432_v30  ;;  %v2020_v31 = vld [vmem:[#allocation2 + $0x49] sm:$0xff] }
 0x405   : > { %4279 = vmatmul.mubr.msk.bf16.gmra.mrb[8].mxu1 %vm529_vm1, %v1066_v1  ;;  %v1428_v1 = vmul.f32 %v5245_v57, %v5296_v0  ;;  %4531 = vmatpush3.bf16.msra.mxu0 %v5081_v7  ;;  %v1430_v0 = vmul.f32 %v5327_v24, %v5243_v56 }
 0x406   : > { %4286 = vmatprep.mubr.msk.bf16.mxu1 %vm529_vm1, %v1314_v9  ;;  %4385 = vmatprep.subr.mxu0 %v4901_v6  ;;  %v1317_v9 = vpack.c.bf16 %v1313_v62, %v1312_v5  ;;  %v4726_v5 = vld [vmem:[%s6047_s7 + $0x50] sm:$0xff]  }
 0x407   : > { %v1437_v32 = vpack.c.bf16 %v1431_v27, %v1430_v0  ;;  %v1667_v0 = vmul.f32 %v5382_v12, %v5373_v61  ;;  %v1669_v27 = vmul.f32 %v5389_v18, %v5406_v42 }
 0x40d   : > { %4287 = vmatmul.mubr.msk.bf16.vlgmr.msra.gmra.mrb[4].mxu1 %vm529_vm1, %v1315_v38  ;;  %v5445_v38 = vld [vmem:[#allocation2 + $0x47] sm:$0xff] }
 0x40e   : > { %4295 = vmatpush3.bf16.msra.mxu1 %v4722_v58  ;;  %4290 = vmatprep.mubr.msk.bf16.mxu1 %vm529_vm1, %v1316_v54  ;;  %v1429_v58 = vmul.f32 %v5269_v8, %v5325_v23  ;;  %v1435_v54 = vmul.f32 %v5445_v38, %v5329_v25 }
 0x40f   : > { %4296 = vmatprep.subr.bf16.mxu1 %v4723_v39 }
 0x410   : > { %v1436_v40 = vpack.c.bf16 %v1429_v58, %v1428_v1  ;;  %v1550_v1 = vpack.c.bf16 %v5276_v10, %v5272_v50  ;;  %v4727_v58 = vld [vmem:[%s6047_s7 + $0x58] sm:$0xff]   ;;  %v4728_v50 = vld [vmem:[%s6047_s7 + $0x60] sm:$0xff]   ;;  %v5472_v10 = vld [vmem:[#allocation2 + $0x48] sm:$0xff] }
 0x412   : > { %4297 = vmatpush3.bf16.msra.mxu1 %v4723_v39  ;;  %v1434_v39 = vmul.f32 %v5331_v26, %v5358_v45 }
 0x413   : > { %4306 = vmatprep.subr.bf16.mxu1 %v4724_v63 }
 0x414   : > { %v1439_v62 = vpack.c.bf16 %v1435_v54, %v1434_v39  ;;  %v4730_v39 = vld [vmem:[%s6047_s7 + $0x70] sm:$0xff]   ;;  %v1786_v54 = vmul.f32 %v5245_v57, %v5325_v23  ;;  %v1790_v23 = vmul.f32 %v5300_v16, %v5356_v44  ;;  %v4732_v44 = vld [vmem:[%s6047_s7 + $0x80] sm:$0xff]  }
 0x415   : > { %4291 = vmatmul.mubr.msk.bf16.gmra.mrb[8].mxu1 %vm529_vm1, %v1317_v9  ;;  %v1552_v9 = vpack.c.bf16 %v5312_v19, %v5292_v60  ;;  %v1553_v60 = vpack.c.bf16 %v5472_v10, %v5314_v20  ;;  %v4729_v20 = vld [vmem:[%s6047_s7 + $0x68] sm:$0xff]  }
 0x416   : > { %4298 = vmatprep.mubr.msk.bf16.mxu1 %vm529_vm1, %v1436_v40  ;;  %v1666_v40 = vmul.f32 %v5380_v48, %v5371_v59 }
 0x418   : > { %v1673_v30 = vpack.c.bf16 %v1667_v0, %v1666_v40 }
 0x41d   : > { %4299 = vmatmul.mubr.msk.bf16.vlgmr.msra.gmra.mrb[4].mxu1 %vm529_vm1, %v1437_v32 }
 0x41e   : > { %4307 = vmatpush3.bf16.msra.mxu1 %v4724_v63  ;;  %4302 = vmatprep.mubr.msk.bf16.mxu1 %vm529_vm1, %v1438_v34  ;;  %v1551_v63 = vpack.c.bf16 %v5287_v51, %v5279_v11  ;;  %v1664_v11 = vmul.f32 %v5351_v36, %v5361_v52  ;;  %v1665_v51 = vmul.f32 %v5349_v35, %v5378_v47 }
 0x41f   : > { %4308 = vmatprep.subr.bf16.mxu1 %v4725_v33  ;;  %v1668_v52 = vmul.f32 %v5384_v55, %v5387_v14  ;;  %v1671_v34 = vmul.f32 %v2020_v31, %v5410_v53 }
 0x420   : > { %v1672_v19 = vpack.c.bf16 %v1665_v51, %v1664_v11  ;;  %v1785_v51 = vld [vmem:[#allocation2 + $0x4f] sm:$0xff] }
 0x421   : > { %v1674_v32 = vpack.c.bf16 %v1669_v27, %v1668_v52  ;;  %v2021_v27 = vld [vmem:[#allocation2 + $0x51] sm:$0xff] }
 0x422   : > { %4309 = vmatpush3.bf16.msra.mxu1 %v4725_v33  ;;  %v1670_v33 = vmul.f32 %v5408_v46, %v5404_v41 }
 0x423   : > { %4318 = vmatprep.subr.bf16.mxu1 %v4726_v5 }
 0x425   : > { %4303 = vmatmul.mubr.msk.bf16.gmra.mrb[8].mxu1 %vm529_vm1, %v1439_v62  ;;  %v1675_v62 = vpack.c.bf16 %v1671_v34, %v1670_v33  ;;  %v2163_v33 = vld [vmem:[%s6050_s10] sm:$0x1] }
 0x426   : > { %4310 = vmatprep.mubr.msk.bf16.mxu1 %vm529_vm1, %v1550_v1 }
 0x42d   : > { %4311 = vmatmul.mubr.msk.bf16.vlgmr.msra.gmra.mrb[4].mxu1 %vm529_vm1, %v1551_v63  ;;  %v1788_v63 = vmul.f32 %v5334_v28, %v5243_v56  ;;  %v1792_v28 = vmul.f32 %v5445_v38, %v5331_v26  ;;  %v5536_v38 = vld [vmem:[#allocation2 + $0x50] sm:$0xff] }
 0x42e   : > { %4319 = vmatpush3.bf16.msra.mxu1 %v4726_v5  ;;  %4314 = vmatprep.mubr.msk.bf16.mxu1 %vm529_vm1, %v1552_v9  ;;  %v1787_v5 = vmul.f32 %v5327_v24, %v5269_v8  ;;  %v1791_v24 = vmul.f32 %v5298_v15, %v5358_v45  ;;  %v1911_v40 = vpack.c.bf16 %v5536_v38, %v5472_v10 }
 0x42f   : > { %4320 = vmatprep.subr.bf16.mxu1 %v4727_v58 }
 0x430   : > { %v1794_v1 = vpack.c.bf16 %v1787_v5, %v1786_v54  ;;  %v1796_v11 = vpack.c.bf16 %v1791_v24, %v1790_v23 }
 0x432   : > { %4321 = vmatpush3.bf16.msra.mxu1 %v4727_v58  ;;  %v1789_v58 = vmul.f32 %v5336_v29, %v5267_v49  ;;  %v1793_v29 = vmul.f32 %v1785_v51, %v5329_v25 }
 0x433   : > { %4330 = vmatprep.subr.bf16.mxu1 %v4728_v50 }
 0x434   : > { %v1795_v9 = vpack.c.bf16 %v1789_v58, %v1788_v63  ;;  %v1797_v45 = vpack.c.bf16 %v1793_v29, %v1792_v28 }
 0x435   : > { %4315 = vmatmul.mubr.msk.bf16.gmra.mrb[8].mxu1 %vm529_vm1, %v1553_v60  ;;  %v4733_v60 = vld [vmem:[%s6047_s7 + $0x88] sm:$0xff]  }
 0x436   : > { %4322 = vmatprep.mubr.msk.bf16.mxu1 %vm529_vm1, %v1672_v19  ;;  %v2022_v19 = vmul.f32 %v5351_v36, %v5378_v47  ;;  %v2026_v47 = vmul.f32 %v5387_v14, %v5406_v42 }
 0x43d   : > { %4323 = vmatmul.mubr.msk.bf16.vlgmr.msra.gmra.mrb[4].mxu1 %vm529_vm1, %v1673_v30  ;;  %v2028_v30 = vmul.f32 %v2020_v31, %v5404_v41  ;;  %v3974_v31 = vld [vmem:[%s6048_s8] ss:$0 sm:$0xff] }
 0x43e   : > { %4331 = vmatpush3.bf16.msra.mxu1 %v4728_v50  ;;  %4326 = vmatprep.mubr.msk.bf16.mxu1 %vm529_vm1, %v1674_v32  ;;  %v4731_v50 = vld [vmem:[%s6047_s7 + $0x78] sm:$0xff]  }
 0x43f   : > { %4332 = vmatprep.subr.bf16.mxu1 %v4729_v20 }
 0x442   : > { %4333 = vmatpush3.bf16.msra.mxu1 %v4729_v20 }
 0x443   : > { %4342 = vmatprep.subr.bf16.mxu1 %v4730_v39 }
 0x445   : > { %4327 = vmatmul.mubr.msk.bf16.gmra.mrb[8].mxu1 %vm529_vm1, %v1675_v62 }
 0x446   : > { %4334 = vmatprep.mubr.msk.bf16.mxu1 %vm529_vm1, %v1794_v1 }
 0x44d   : > { %4335 = vmatmul.mubr.msk.bf16.vlgmr.msra.gmra.mrb[4].mxu1 %vm529_vm1, %v1795_v9 }
 0x44e   : > { %4343 = vmatpush3.bf16.msra.mxu1 %v4730_v39  ;;  %4338 = vmatprep.mubr.msk.bf16.mxu1 %vm529_vm1, %v1796_v11 }
 0x44f   : > { %4344 = vmatprep.subr.bf16.mxu1 %v4731_v50 }
 0x452   : > { %4345 = vmatpush3.bf16.msra.mxu1 %v4731_v50 }
 0x453   : > { %4354 = vmatprep.subr.bf16.mxu1 %v4732_v44 }
 0x455   : > { %4339 = vmatmul.mubr.msk.bf16.gmra.mrb[8].mxu1 %vm529_vm1, %v1797_v45 }
 0x456   : > { %4346 = vmatprep.mubr.msk.bf16.mxu1 %vm529_vm1, %v5285_v13  ;;  %v2023_v13 = vmul.f32 %v5380_v48, %v5349_v35  ;;  %v2027_v48 = vmul.f32 %v5408_v46, %v5389_v18 }
 0x458   : > { %v2030_v0 = vpack.c.bf16 %v2023_v13, %v2022_v19  ;;  %v2032_v10 = vpack.c.bf16 %v2027_v48, %v2026_v47 }
 0x45d   : > { %4347 = vmatmul.mubr.msk.bf16.vlgmr.msra.gmra.mrb[4].mxu1 %vm529_vm1, %v5305_v17  ;;  %v2024_v17 = vmul.f32 %v5382_v12, %v5371_v59  ;;  %v5558_v12 = vmul.f32 %v2021_v27, %v5410_v53 }
 0x45e   : > { %4355 = vmatpush3.bf16.msra.mxu1 %v4732_v44  ;;  %4350 = vmatprep.mubr.msk.bf16.mxu1 %vm529_vm1, %v5323_v22  ;;  %v2025_v22 = vmul.f32 %v5384_v55, %v5373_v61 }
 0x45f   : > { %4356 = vmatprep.subr.bf16.mxu1 %v4733_v60  ;;  %v2033_v55 = vpack.c.bf16 %v5558_v12, %v2028_v30 }
 0x460   : > { %v2031_v52 = vpack.c.bf16 %v2025_v22, %v2024_v17 }
 0x462   : > { %4357 = vmatpush3.bf16.msra.mxu1 %v4733_v60 }
 0x465   : > { %4351 = vmatmul.mubr.msk.bf16.gmra.mrb[8].mxu1 %vm529_vm1, %v1911_v40 }
 0x466   : > { %4358 = vmatprep.mubr.msk.bf16.mxu1 %vm529_vm1, %v2030_v0 }
 0x46d   : > { %4359 = vmatmul.mubr.msk.bf16.vlgmr.msra.gmra.mrb[4].mxu1 %vm529_vm1, %v2031_v52 }
 0x46e   : > { %4362 = vmatprep.mubr.msk.bf16.mxu1 %vm529_vm1, %v2032_v10 }
 0x475   : > { %4363 = vmatmul.mubr.msk.bf16.gmra.mrb[8].mxu1 %vm529_vm1, %v2033_v55 }
 0x4d3   : > { %v2213_v42 = vpop.f32.mrb[4].mxu0 }
 0x4d4   : > { %v4372_v20 = vpop.f32.mrb[5].mxu0  ;;  %v2214_v34 = vadd.f32 %v2213_v42, %v2163_v33 }
 0x4d5   : > { %v2216_v32 = vpop.f32.mrb[6].mxu0 }
 0x4d6   : > { %v4373_v46 = vpop.f32.mrb[7].mxu0  ;;  %v2222_v39 = vrot.slane %v2214_v34, %v5131_v43 }
 0x540   : > { %v4360_v54 = vpop.f32.mrb[4].mxu1 }
 0x541   : > { %v2144_v5 = vadd.f32 %v4360_v54, %v3974_v31  ;;  %v2097_v62 = vpop.f32.mrb[5].mxu1 }
 0x542   : > { %v2142_v1 = vadd.f32 %v3974_v31, %v2097_v62  ;;  %v4361_v63 = vpop.f32.mrb[6].mxu1 }
 0x543   : > { %v2225_v58 = vadd.f32 %v2222_v39, %v2144_v5  ;;  %v2145_v23 = vadd.f32 %v4361_v63, %v3974_v31  ;;  %v2100_v24 = vpop.f32.mrb[7].mxu1 }
 0x544   : > { %v2223_v9 = vadd.f32 %v2222_v39, %v2142_v1  ;;  %v2143_v50 = vadd.f32 %v3974_v31, %v2100_v24 }
 0x545   : > { %v2226_v11 = vadd.f32 %v2222_v39, %v2145_v23  ;;  %v2236_v13 = vsel %vm529_vm1, %v2225_v58, 0.0 }
 0x546   : > { %v2224_v51 = vadd.f32 %v2222_v39, %v2143_v50  ;;  %v2233_v28 = vsel %vm529_vm1, %v2223_v9, 0.0 }
 0x547   : > { %v2238_v52 = vsel %vm529_vm1, %v2226_v11, 0.0 }
 0x548   : > { %v2234_v29 = vsel %vm529_vm1, %v2224_v51, 0.0  ;;  %v4364_v44 = vpop.f32.mrb[8].mxu1 }
 0x549   : > { %v2235_v45 = vadd.f32 %v2234_v29, %v2233_v28  ;;  %v2148_v60 = vadd.f32 %v4364_v44, %v3974_v31  ;;  %v2113_v19 = vpop.f32.mrb[9].mxu1 }
 0x54a   : > { %v2146_v40 = vadd.f32 %v3974_v31, %v2113_v19  ;;  %v4365_v0 = vpop.f32.mrb[10].mxu1 }
 0x54b   : > { %v2237_v17 = vadd.f32 %v2236_v13, %v2235_v45  ;;  %v2229_v22 = vadd.f32 %v2222_v39, %v2148_v60  ;;  %v2149_v47 = vadd.f32 %v4365_v0, %v3974_v31  ;;  %v2116_v48 = vpop.f32.mrb[11].mxu1 }
 0x54c   : > { %v2227_v27 = vadd.f32 %v2222_v39, %v2146_v40  ;;  %v2147_v10 = vadd.f32 %v3974_v31, %v2116_v48 }
 0x54d   : > { %v2239_v30 = vadd.f32 %v2238_v52, %v2237_v17  ;;  %v2230_v55 = vadd.f32 %v2222_v39, %v2149_v47  ;;  %v2244_v34 = vsel %vm529_vm1, %v2229_v22, 0.0 }
 0x54e   : > { %v2240_v42 = vsel %vm529_vm1, %v2227_v27, 0.0  ;;  %v2228_v20 = vadd.f32 %v2222_v39, %v2147_v10 }
 0x54f   : > { %v2241_v32 = vadd.f32 %v2240_v42, %v2239_v30  ;;  %v2246_v5 = vsel %vm529_vm1, %v2230_v55, 0.0 }
 0x550   : > { %v2242_v46 = vsel %vm529_vm1, %v2228_v20, 0.0 }
 0x551   : > { %v2243_v33 = vadd.f32 %v2242_v46, %v2241_v32 }
 0x553   : > { %v2245_v54 = vadd.f32 %v2244_v34, %v2243_v33 }
 0x555   : > { %v2247_v62 = vadd.f32 %v2246_v5, %v2245_v54 }
 0x557   : > { %v2248_v1 = vrot.slane %v2247_v62, 4 }
 0x559   : > { %v2249_v63 = vadd.f32 %v2248_v1, %v2247_v62 }
 0x55b   : > { %v2250_v23 = vrot.slane %v2249_v63, 2 }
 0x55d   : > { %v2251_v24 = vadd.f32 %v2250_v23, %v2249_v63 }
 0x55f   : > { %v2252_v31 = vrot.slane %v2251_v24, 1 }
 0x561   : > { %v2253_v50 = vadd.f32 %v2252_v31, %v2251_v24 }
 0x563   : > { %4383 = vmatmul.mubr.msk.f32.vlgmr.msra.gmra.mrb[8].mxu0 %vm529_vm1, %v2253_v50 }
 0x564   : > { %4386 = vmatpush3.msra.mxu0 %v5119_v37  ;;  %4387 = vmatprep.mubr.msk.f32.mxu0 %vm4900_vm0, %v4901_v6 }
 0x565   : > { %4532 = vmatprep.subr.bf16.mxu0 %v4899_v3 }
 0x636   : > { %v2323_v39 = vpop.f32.mrb[8].mxu0 }
 0x637   : > { %v2327_v28 = vmul.f32 0.00390625, %v2323_v39  ;;  %v4384_v29 = vpop.f32.mrb[9].mxu0 }
 0x639   : > { %4388 = vmatmul.mubr.msk.f32.vlgmr.msra.gmra.mrb[10].mxu0 %vm639_vm2, %v2327_v28  ;;  %v4826_v28 = vld [vmem:[%s6044_s4] sm:$0xff] }
 0x63a   : > { %4534 = vmatpush3.bf16.msra.mxu0 %v5045_v4  ;;  %4398 = vmatprep.mubr.msk.f32.mxu0 %vm4900_vm0, %v4901_v6 }
 0x63b   : > { %4535 = vmatprep.subr.bf16.mxu0 %v4899_v3 }
 0x63e   : > { %4537 = vmatpush3.bf16.msra.mxu0 %v5081_v7 }
 0x63f   : > { %4401 = vmatprep.subr.mxu0 %v4901_v6 }
 0x70c   : > { %v2397_v37 = vpop.f32.mrb[10].mxu0 }
 0x70d   : > { %v2404_v44 = vrot.slane %v2397_v37, %v5131_v43  ;;  %v4389_v45 = vpop.f32.mrb[11].mxu0 }
 0x70e   : > { %v4736_v45 = vld [vmem:[%s6053_s13 + $0x10] sm:$0xff]  }
 0x70f   : > { %v5590_v60 = vsub.f32 %v2223_v9, %v2404_v44  ;;  %v5592_v19 = vsub.f32 %v2224_v51, %v2404_v44  ;;  %v5594_v13 = vsub.f32 %v2225_v58, %v2404_v44  ;;  %v5596_v4 = vsub.f32 %v2226_v11, %v2404_v44  ;;  %4406 = vmatprep.subr.bf16.mxu1 %v4736_v45 }
 0x710   : > { %v5598_v40 = vsub.f32 %v2227_v27, %v2404_v44  ;;  %v5606_v17 = vsub.f32 %v2228_v20, %v2404_v44  ;;  %v2411_v47 = vsub.f32 %v2229_v22, %v2404_v44  ;;  %v2412_v10 = vsub.f32 %v2230_v55, %v2404_v44  ;;  %4407 = vmatpush3.bf16.msra.mxu1 %v4736_v45 }
 0x711   : > { %v2413_v3 = vmul.f32 %v5590_v60, %v5590_v60  ;;  %v2414_v7 = vmul.f32 %v5592_v19, %v5592_v19  ;;  %v2415_v0 = vmul.f32 %v5594_v13, %v5594_v13  ;;  %v2416_v9 = vmul.f32 %v5596_v4, %v5596_v4 }
 0x712   : > { %v2417_v48 = vmul.f32 %v5598_v40, %v5598_v40  ;;  %v2418_v30 = vmul.f32 %v5606_v17, %v5606_v17  ;;  %v2419_v32 = vmul.f32 %v2411_v47, %v2411_v47  ;;  %v2420_v34 = vmul.f32 %v2412_v10, %v2412_v10 }
 0x713   : > { %v2421_v58 = vsel %vm529_vm1, %v2413_v3, 0.0  ;;  %v2422_v11 = vsel %vm529_vm1, %v2414_v7, 0.0  ;;  %v2424_v52 = vsel %vm529_vm1, %v2415_v0, 0.0  ;;  %v2426_v42 = vsel %vm529_vm1, %v2416_v9, 0.0  ;;  %v4737_v3 = vld [vmem:[%s6053_s13] sm:$0xff]   ;;  %v4738_v7 = vld [vmem:[%s6053_s13 + $0x18] sm:$0xff]  }
 0x714   : > { %v2423_v51 = vadd.f32 %v2422_v11, %v2421_v58  ;;  %v2428_v46 = vsel %vm529_vm1, %v2417_v48, 0.0  ;;  %v2430_v22 = vsel %vm529_vm1, %v2418_v30, 0.0  ;;  %v2432_v5 = vsel %vm529_vm1, %v2419_v32, 0.0  ;;  %4408 = vmatprep.subr.bf16.mxu1 %v4738_v7  ;;  %v5644_v0 = vld [vmem:[%s6053_s13 + $0x20] sm:$0xff]  }
 0x715   : > { %v2434_v1 = vsel %vm529_vm1, %v2420_v34, 0.0  ;;  %4409 = vmatpush3.bf16.msra.mxu1 %v4738_v7  ;;  %v3984_v32 = vld [vmem:[%s6052_s12] ss:$0 sm:$0xff] }
 0x716   : > { %v2425_v27 = vadd.f32 %v2424_v52, %v2423_v51  ;;  %v3983_v52 = vld [vmem:[%s6051_s11] ss:$0 sm:$0xff] }
 0x718   : > { %v2427_v20 = vadd.f32 %v2426_v42, %v2425_v27 }
 0x71a   : > { %v2429_v33 = vadd.f32 %v2428_v46, %v2427_v20 }
 0x71c   : > { %v2431_v54 = vadd.f32 %v2430_v22, %v2429_v33 }
 0x71e   : > { %v2433_v62 = vadd.f32 %v2432_v5, %v2431_v54 }
 0x720   : > { %v2435_v55 = vadd.f32 %v2434_v1, %v2433_v62 }
 0x722   : > { %v2436_v63 = vrot.slane %v2435_v55, 4 }
 0x724   : > { %v2437_v23 = vadd.f32 %v2436_v63, %v2435_v55 }
 0x726   : > { %v2438_v24 = vrot.slane %v2437_v23, 2 }
 0x728   : > { %v2439_v31 = vadd.f32 %v2438_v24, %v2437_v23 }
 0x72a   : > { %v2440_v50 = vrot.slane %v2439_v31, 1 }
 0x72c   : > { %v2441_v39 = vadd.f32 %v2440_v50, %v2439_v31 }
 0x72e   : > { %4399 = vmatmul.mubr.msk.f32.vlgmr.msra.gmra.mrb[12].mxu0 %vm529_vm1, %v2441_v39 }
 0x72f   : > { %4402 = vmatpush3.msra.mxu0 %v4826_v28  ;;  %4403 = vmatprep.mubr.msk.f32.mxu0 %vm4900_vm0, %v4901_v6  ;;  %v4739_v6 = vld [vmem:[%s6053_s13 + $0x8] sm:$0xff]  }
 0x730   : > { %4418 = vmatprep.subr.bf16.mxu0 %v4737_v3 }
 0x801   : > { %v2511_v29 = vpop.f32.mrb[12].mxu0 }
 0x802   : > { %v2515_v37 = vmul.f32 0.00390625, %v2511_v29  ;;  %v4400_v44 = vpop.f32.mrb[13].mxu0 }
 0x804   : > { %4404 = vmatmul.mubr.msk.f32.vlgmr.msra.gmra.mrb[14].mxu0 %vm639_vm2, %v2515_v37 }
 0x805   : > { %4419 = vmatpush3.bf16.msra.mxu0 %v4737_v3 }
 0x806   : > { %4420 = vmatprep.subr.bf16.mxu0 %v4739_v6 }
 0x809   : > { %4421 = vmatpush3.bf16.msra.mxu0 %v4739_v6 }
 0x80a   : > { %4430 = vmatprep.subr.bf16.mxu0 %v5644_v0 }
 0x8d7   : > { %v2585_v9 = vpop.f32.mrb[14].mxu0 }
 0x8d8   : > { %v2586_v58 = vadd.f32 1e-06, %v2585_v9  ;;  %v4405_v11 = vpop.f32.mrb[15].mxu0 }
 0x8da   : > { %4792 = vrsqrt.f32 %v2586_v58 }
 0x8e4   : > { %v4793_v51 = vpop.eup %4792 }
 0x8e5   : > { %v2593_v48 = vrot.slane %v4793_v51, %v5131_v43 }
 0x8e7   : > { %v2594_v27 = vmul.f32 %v2593_v48, %v5590_v60  ;;  %v2595_v30 = vmul.f32 %v2593_v48, %v5592_v19  ;;  %v2596_v42 = vmul.f32 %v2593_v48, %v5594_v13  ;;  %v2597_v20 = vmul.f32 %v2593_v48, %v5596_v4 }
 0x8e8   : > { %v2598_v46 = vmul.f32 %v2593_v48, %v5598_v40  ;;  %v2599_v43 = vmul.f32 %v2593_v48, %v5606_v17  ;;  %v2600_v33 = vmul.f32 %v2593_v48, %v2411_v47  ;;  %v2601_v34 = vmul.f32 %v2593_v48, %v2412_v10 }
 0x8e9   : > { %v2608_v22 = vmul.f32 %v3983_v52, %v2594_v27  ;;  %v2609_v54 = vmul.f32 %v3983_v52, %v2595_v30  ;;  %v2610_v5 = vmul.f32 %v3983_v52, %v2596_v42  ;;  %v2611_v60 = vmul.f32 %v3983_v52, %v2597_v20 }
 0x8ea   : > { %v2612_v62 = vmul.f32 %v3983_v52, %v2598_v46  ;;  %v2613_v19 = vmul.f32 %v3983_v52, %v2599_v43  ;;  %v2614_v1 = vmul.f32 %v3983_v52, %v2600_v33  ;;  %v2615_v13 = vmul.f32 %v3983_v52, %v2601_v34 }
 0x8eb   : > { %v2622_v55 = vadd.f32 %v3984_v32, %v2608_v22  ;;  %v2623_v4 = vadd.f32 %v3984_v32, %v2609_v54  ;;  %v2624_v63 = vadd.f32 %v3984_v32, %v2610_v5  ;;  %v2625_v23 = vadd.f32 %v3984_v32, %v2611_v60 }
 0x8ec   : > { %v2626_v24 = vadd.f32 %v3984_v32, %v2612_v62  ;;  %v2627_v31 = vadd.f32 %v3984_v32, %v2613_v19  ;;  %v2628_v50 = vadd.f32 %v3984_v32, %v2614_v1  ;;  %v2629_v47 = vadd.f32 %v3984_v32, %v2615_v13 }
 0x8ed   : > { %v3985_v40 = vmul.f32 -1.442695, %v2622_v55  ;;  %v3986_v39 = vmul.f32 -1.442695, %v2623_v4  ;;  %v3987_v17 = vmul.f32 -1.442695, %v2624_v63 }
 0x8ee   : > { %v3988_v10 = vmul.f32 -1.442695, %v2625_v23  ;;  %v3989_v28 = vmul.f32 -1.442695, %v2626_v24  ;;  %v3990_v29 = vmul.f32 -1.442695, %v2627_v31 }
 0x8ef   : > { %4794 = vpow2.f32 %v3985_v40  ;;  %v3991_v37 = vmul.f32 -1.442695, %v2628_v50  ;;  %v3992_v44 = vmul.f32 -1.442695, %v2629_v47 }
 0x8f0   : > { %4796 = vpow2.f32 %v3986_v39 }
 0x8f1   : > { %4798 = vpow2.f32 %v3987_v17 }
 0x8f2   : > { %4800 = vpow2.f32 %v3988_v10 }
 0x8f3   : > { %4802 = vpow2.f32 %v3989_v28 }
 0x8f4   : > { %4804 = vpow2.f32 %v3990_v29 }
 0x8f5   : > { %4806 = vpow2.f32 %v3991_v37 }
 0x8f6   : > { %4808 = vpow2.f32 %v3992_v44 }
 0x8f9   : > { %v4795_v45 = vpop.eup %4794 }
 0x8fa   : > { %v4797_v3 = vpop.eup %4796  ;;  %v2654_v7 = vadd.f32 1.0, %v4795_v45 }
 0x8fb   : > { %v4799_v6 = vpop.eup %4798  ;;  %v2655_v9 = vadd.f32 1.0, %v4797_v3 }
 0x8fc   : > { %v4801_v58 = vpop.eup %4800  ;;  %v2656_v11 = vadd.f32 1.0, %v4799_v6  ;;  %4810 = vrcp.f32 %v2654_v7 }
 0x8fd   : > { %v4803_v51 = vpop.eup %4802  ;;  %v2657_v48 = vadd.f32 1.0, %v4801_v58  ;;  %4812 = vrcp.f32 %v2655_v9 }
 0x8fe   : > { %v4805_v52 = vpop.eup %4804  ;;  %v2658_v27 = vadd.f32 1.0, %v4803_v51  ;;  %4814 = vrcp.f32 %v2656_v11  ;;  %v4741_v51 = vld [vmem:[%s6053_s13 + $0x28] sm:$0xff]  }
 0x8ff   : > { %v4807_v30 = vpop.eup %4806  ;;  %v2659_v42 = vadd.f32 1.0, %v4805_v52  ;;  %4816 = vrcp.f32 %v2657_v48 }
 0x900   : > { %v4809_v20 = vpop.eup %4808  ;;  %v2660_v32 = vadd.f32 1.0, %v4807_v30  ;;  %4818 = vrcp.f32 %v2658_v27 }
 0x901   : > { %v2661_v46 = vadd.f32 1.0, %v4809_v20  ;;  %4820 = vrcp.f32 %v2659_v42 }
 0x902   : > { %4822 = vrcp.f32 %v2660_v32 }
 0x903   : > { %4824 = vrcp.f32 %v2661_v46 }
 0x906   : > { %v4811_v43 = vpop.eup %4810 }
 0x907   : > { %v4813_v33 = vpop.eup %4812  ;;  %v2678_v34 = vmul.f32 %v4811_v43, %v2622_v55 }
 0x908   : > { %v4815_v22 = vpop.eup %4814  ;;  %v2679_v54 = vmul.f32 %v4813_v33, %v2623_v4  ;;  %v4742_v33 = vld [vmem:[%s6053_s13 + $0x30] sm:$0xff]  }
 0x909   : > { %v4817_v5 = vpop.eup %4816  ;;  %v2680_v60 = vmul.f32 %v4815_v22, %v2624_v63  ;;  %2687 = vst.msk [vmem:[#allocation2 + $0x10] sm:$0xff] %vm529_vm1, %v2678_v34 }
 0x90a   : > { %v4819_v62 = vpop.eup %4818  ;;  %v2681_v19 = vmul.f32 %v4817_v5, %v2625_v23  ;;  %2688 = vst.msk [vmem:[#allocation2 + $0x18] sm:$0xff] %vm529_vm1, %v2679_v54 }
 0x90b   : > { %v4821_v1 = vpop.eup %4820  ;;  %v2682_v13 = vmul.f32 %v4819_v62, %v2626_v24  ;;  %2689 = vst.msk [vmem:[#allocation2 + $0x20] sm:$0xff] %vm529_vm1, %v2680_v60 }
 0x90c   : > { %v4823_v40 = vpop.eup %4822  ;;  %v2683_v39 = vmul.f32 %v4821_v1, %v2627_v31  ;;  %2690 = vst.msk [vmem:[#allocation2 + $0x28] sm:$0xff] %vm529_vm1, %v2681_v19 }
 0x90d   : > { %v4825_v17 = vpop.eup %4824  ;;  %v2684_v55 = vmul.f32 %v4823_v40, %v2628_v50  ;;  %2691 = vst.msk [vmem:[#allocation2 + $0x30] sm:$0xff] %vm529_vm1, %v2682_v13 }
 0x90e   : > { %v2685_v4 = vmul.f32 %v4825_v17, %v2629_v47  ;;  %2692 = vst.msk [vmem:[#allocation2 + $0x38] sm:$0xff] %vm529_vm1, %v2683_v39 }
 0x90f   : > { %2693 = vst.msk [vmem:[#allocation2 + $0x40] sm:$0xff] %vm529_vm1, %v2684_v55 }
 0x910   : > { %2694 = vst.msk [vmem:[#allocation2 + $0x48] sm:$0xff] %vm529_vm1, %v2685_v4  ;;  %v5668_v63 = vld [vmem:[#allocation2 + $0x10] sm:$0xff] }
 0x911   : > { %v5670_v23 = vld [vmem:[#allocation2 + $0xf] sm:$0xff]  ;;  %v2727_v24 = vpack.c.bf16 %v5668_v63, %v5259_v2  ;;  %v5674_v31 = vld [vmem:[#allocation2 + $0x18] sm:$0xff] }
 0x912   : > { %v2704_v50 = vmul.f32 %v5670_v23, %v5269_v8  ;;  %v5678_v10 = vld [vmem:[#allocation2 + $0x17] sm:$0xff]  ;;  %v5680_v47 = vld [vmem:[#allocation2 + $0x20] sm:$0xff]  ;;  %v2914_v30 = vld [vmem:[#allocation2 + $0x9] sm:$0xff] }
 0x913   : > { %v5682_v28 = vld [vmem:[#allocation2 + $0x1f] sm:$0xff]  ;;  %v2705_v29 = vmul.f32 %v5678_v10, %v5243_v56  ;;  %4410 = vmatprep.mubr.msk.bf16.mxu1 %vm529_vm1, %v2727_v24  ;;  %v5689_v37 = vpack.c.bf16 %v5680_v47, %v5674_v31  ;;  %v5691_v2 = vld [vmem:[#allocation2 + $0x28] sm:$0xff]  ;;  %v5723_v42 = vld [vmem:[#allocation2 + $0x11] sm:$0xff]  ;;  %v2922_v34 = vmul.f32 %v2914_v30, %v5351_v36  ;;  %v5758_v13 = vmul.f32 %v5678_v10, %v5245_v57 }
 0x914   : > { %v2711_v44 = vpack.c.bf16 %v2704_v50, %v5317_v21  ;;  %v2706_v45 = vmul.f32 %v5682_v28, %v5267_v49  ;;  %v5696_v3 = vld [vmem:[#allocation2 + $0x27] sm:$0xff]  ;;  %v5698_v7 = vld [vmem:[#allocation2 + $0x30] sm:$0xff]  ;;  %v5747_v5 = vld [vmem:[#allocation2 + $0x19] sm:$0xff]  ;;  %v5762_v40 = vmul.f32 %v5682_v28, %v5269_v8 }
 0x915   : > { %v5700_v6 = vld [vmem:[#allocation2 + $0x2f] sm:$0xff]  ;;  %v2707_v9 = vmul.f32 %v5696_v3, %v5300_v16  ;;  %4411 = vmatmul.mubr.msk.bf16.vlgmr.msra.gmra.mrb[12].mxu1 %vm529_vm1, %v5689_v37  ;;  %v5708_v58 = vpack.c.bf16 %v5698_v7, %v5691_v2  ;;  %v5716_v48 = vld [vmem:[#allocation2 + $0x37] sm:$0xff]  ;;  %v5749_v62 = vld [vmem:[#allocation2 + $0x21] sm:$0xff]  ;;  %v5766_v39 = vmul.f32 %v5696_v3, %v5243_v56  ;;  %v2924_v17 = vmul.f32 %v5747_v5, %v5371_v59 }
 0x916   : > { %4422 = vmatprep.mubr.msk.bf16.mxu0 %vm529_vm1, %v2711_v44  ;;  %v2712_v21 = vpack.c.bf16 %v2706_v45, %v2705_v29  ;;  %v2708_v11 = vmul.f32 %v5700_v6, %v5298_v15  ;;  %v5718_v52 = vld [vmem:[#allocation2 + $0x3f] sm:$0xff]  ;;  %v2709_v46 = vmul.f32 %v5716_v48, %v5331_v26  ;;  %v5751_v19 = vld [vmem:[#allocation2 + $0x29] sm:$0xff]  ;;  %v5754_v1 = vld [vmem:[#allocation2 + $0x31] sm:$0xff]  ;;  %v5773_v55 = vmul.f32 %v5700_v6, %v5267_v49 }
 0x917   : > { %4414 = vmatprep.mubr.msk.bf16.mxu1 %vm529_vm1, %v5708_v58  ;;  %v5726_v20 = vld [vmem:[#allocation2 + $0x38] sm:$0xff]  ;;  %v5728_v32 = vld [vmem:[#allocation2 + $0x40] sm:$0xff]  ;;  %v2710_v43 = vmul.f32 %v5718_v52, %v5329_v25  ;;  %v5777_v4 = vmul.f32 %v5716_v48, %v5300_v16  ;;  %v2925_v24 = vmul.f32 %v5749_v62, %v5373_v61  ;;  %v2926_v50 = vmul.f32 %v5751_v19, %v5387_v14 }
 0x918   : > { %4423 = vmatmul.mubr.msk.bf16.vlgmr.msra.gmra.mrb[16].mxu0 %vm529_vm1, %v2712_v21  ;;  %v2713_v27 = vpack.c.bf16 %v2708_v11, %v2707_v9  ;;  %v5743_v22 = vpack.c.bf16 %v5728_v32, %v5726_v20  ;;  %v5783_v29 = vld [vmem:[#allocation2 + $0x39] sm:$0xff]  ;;  %v5785_v44 = vld [vmem:[#allocation2 + $0x41] sm:$0xff]  ;;  %v5791_v9 = vmul.f32 %v5718_v52, %v5298_v15  ;;  %v2927_v21 = vmul.f32 %v5754_v1, %v5389_v18 }
 0x919   : > { %4431 = vmatpush3.bf16.msra.mxu0 %v5644_v0  ;;  %v2923_v0 = vmul.f32 %v5723_v42, %v5349_v35  ;;  %v2714_v54 = vpack.c.bf16 %v2710_v43, %v2709_v46  ;;  %v5809_v46 = vmul.f32 %v5751_v19, %v5371_v59  ;;  %v5813_v43 = vmul.f32 %v5754_v1, %v5373_v61  ;;  %v4743_v30 = vld [vmem:[%s6053_s13 + $0x38] sm:$0xff]   ;;  %v4744_v11 = vld [vmem:[%s6053_s13 + $0x40] sm:$0xff]  }
 0x91a   : > { %4426 = vmatprep.mubr.msk.bf16.mxu0 %vm529_vm1, %v2713_v27  ;;  %4432 = vmatprep.subr.bf16.mxu0 %v4741_v51  ;;  %v5803_v27 = vmul.f32 %v5749_v62, %v5349_v35  ;;  %v2932_v45 = vpack.c.bf16 %v2927_v21, %v2926_v50  ;;  %v3044_v50 = vmul.f32 %v5670_v23, %v5245_v57 }
 0x91b   : > { %v2930_v60 = vpack.c.bf16 %v2923_v0, %v2922_v34  ;;  %v5819_v0 = vmul.f32 %v5783_v29, %v5387_v14  ;;  %v3045_v21 = vmul.f32 %v5678_v10, %v5269_v8  ;;  %v3047_v34 = vmul.f32 %v5696_v3, %v5267_v49  ;;  %v4745_v10 = vld [vmem:[%s6053_s13 + $0x48] sm:$0xff]  }
 0x91c   : > { %v3048_v57 = vmul.f32 %v5700_v6, %v5300_v16  ;;  %v3049_v8 = vmul.f32 %v5716_v48, %v5298_v15  ;;  %v4746_v15 = vld [vmem:[%s6053_s13 + $0x50] sm:$0xff]   ;;  %v3167_v3 = vpack.c.bf16 %v5691_v2, %v5680_v47  ;;  %v4747_v6 = vld [vmem:[%s6053_s13 + $0x58] sm:$0xff]   ;;  %v3168_v48 = vpack.c.bf16 %v5726_v20, %v5698_v7 }
 0x91d   : > { %4433 = vmatpush3.bf16.msra.mxu0 %v4741_v51  ;;  %4415 = vmatmul.mubr.msk.bf16.gmra.mrb[16].mxu1 %vm529_vm1, %v5743_v22  ;;  %v5799_v51 = vmul.f32 %v5747_v5, %v5351_v36  ;;  %v3280_v47 = vmul.f32 %v5723_v42, %v5351_v36  ;;  %v3281_v2 = vmul.f32 %v5747_v5, %v5349_v35 }
 0x91e   : > { %4442 = vmatprep.subr.bf16.mxu0 %v4742_v33  ;;  %v3282_v20 = vmul.f32 %v5749_v62, %v5371_v59  ;;  %v3284_v36 = vmul.f32 %v5754_v1, %v5387_v14  ;;  %v3285_v35 = vmul.f32 %v5783_v29, %v5389_v18  ;;  %v3286_v59 = vmul.f32 %v5785_v44, %v5404_v41  ;;  %v4750_v14 = vld [vmem:[%s6053_s13 + $0x70] sm:$0xff]  }
 0x91f   : > { %v6070_v62 = vpack.c.bf16 %v5762_v40, %v5758_v13  ;;  %v3401_v1 = vld [vmem:[#allocation2 + $0x4f] sm:$0xff] }
 0x920   : > { %4427 = vmatmul.mubr.msk.bf16.gmra.mrb[20].mxu0 %vm529_vm1, %v2714_v54  ;;  %v5823_v54 = vmul.f32 %v5785_v44, %v5389_v18  ;;  %v3290_v5 = vpack.c.bf16 %v3285_v35, %v3284_v36  ;;  %v3409_v40 = vmul.f32 %v3401_v1, %v5329_v25  ;;  %v4831_v35 = vld [vmem:[%s5093_s17 + $0x30] sm:$0xff] }
 0x921   : > { %4434 = vmatprep.mubr.msk.bf16.mxu0 %vm529_vm1, %v2930_v60  ;;  %v2931_v60 = vpack.c.bf16 %v2925_v24, %v2924_v17  ;;  %v2928_v17 = vmul.f32 %v5783_v29, %v5404_v41  ;;  %v2929_v24 = vmul.f32 %v5785_v44, %v5410_v53  ;;  %v6072_v29 = vpack.c.bf16 %v5791_v9, %v5777_v4  ;;  %v4752_v44 = vld [vmem:[%s6053_s13 + $0x80] sm:$0xff]  }
 0x928   : > { %4435 = vmatmul.mubr.msk.bf16.vlgmr.msra.gmra.mrb[16].mxu0 %vm529_vm1, %v2931_v60  ;;  %v3046_v60 = vmul.f32 %v5682_v28, %v5243_v56  ;;  %v3050_v56 = vmul.f32 %v5718_v52, %v5331_v26  ;;  %v3166_v28 = vpack.c.bf16 %v5674_v31, %v5668_v63  ;;  %v4748_v63 = vld [vmem:[%s6053_s13 + $0x60] sm:$0xff]   ;;  %v3165_v31 = vld [vmem:[#allocation2 + $0x48] sm:$0xff]  ;;  %v3288_v52 = vpack.c.bf16 %v3281_v2, %v3280_v47 }
 0x929   : > { %4443 = vmatpush3.bf16.msra.mxu0 %v4742_v33  ;;  %4438 = vmatprep.mubr.msk.bf16.mxu0 %vm529_vm1, %v2932_v45  ;;  %v2933_v33 = vpack.c.bf16 %v2929_v24, %v2928_v17  ;;  %v3052_v45 = vpack.c.bf16 %v3045_v21, %v3044_v50  ;;  %v3043_v17 = vld [vmem:[#allocation2 + $0x47] sm:$0xff]  ;;  %v3169_v7 = vpack.c.bf16 %v3165_v31, %v5728_v32 }
 0x92a   : > { %4444 = vmatprep.subr.bf16.mxu0 %v4743_v30  ;;  %v3053_v23 = vpack.c.bf16 %v3047_v34, %v3046_v60  ;;  %v3051_v49 = vmul.f32 %v3043_v17, %v5329_v25  ;;  %v4749_v32 = vld [vmem:[%s6053_s13 + $0x68] sm:$0xff]   ;;  %v3408_v13 = vmul.f32 %v3043_v17, %v5331_v26  ;;  %v3527_v25 = vpack.c.bf16 %v5536_v38, %v3165_v31 }
 0x92b   : > { %v3279_v34 = vld [vmem:[#allocation2 + $0x49] sm:$0xff]  ;;  %v6073_v26 = vpack.c.bf16 %v5803_v27, %v5799_v51 }
 0x92c   : > { %v3055_v16 = vpack.c.bf16 %v3051_v49, %v3050_v56  ;;  %v3413_v24 = vpack.c.bf16 %v3409_v40, %v3408_v13  ;;  %v3644_v38 = vmul.f32 %v3279_v34, %v5404_v41  ;;  %v4828_v56 = vld [vmem:[%s5093_s17] sm:$0xff] }
 0x92d   : > { %4445 = vmatpush3.bf16.msra.mxu0 %v4743_v30  ;;  %v3054_v30 = vpack.c.bf16 %v3049_v8, %v3048_v57 }
 0x92e   : > { %4454 = vmatprep.subr.bf16.mxu0 %v4744_v11 }
 0x930   : > { %4439 = vmatmul.mubr.msk.bf16.gmra.mrb[20].mxu0 %vm529_vm1, %v2933_v33 }
 0x931   : > { %4446 = vmatprep.mubr.msk.bf16.mxu0 %vm529_vm1, %v3052_v45 }
 0x938   : > { %4447 = vmatmul.mubr.msk.bf16.vlgmr.msra.gmra.mrb[16].mxu0 %vm529_vm1, %v3053_v23 }
 0x939   : > { %4455 = vmatpush3.bf16.msra.mxu0 %v4744_v11  ;;  %4450 = vmatprep.mubr.msk.bf16.mxu0 %vm529_vm1, %v3054_v30  ;;  %v3283_v11 = vmul.f32 %v5751_v19, %v5373_v61  ;;  %v3287_v61 = vmul.f32 %v3279_v34, %v5410_v53  ;;  %v4751_v19 = vld [vmem:[%s6053_s13 + $0x78] sm:$0xff]   ;;  %v6071_v53 = vpack.c.bf16 %v5773_v55, %v5766_v39  ;;  %v4753_v39 = vld [vmem:[%s6053_s13 + $0x88] sm:$0xff]  }
 0x93a   : > { %4456 = vmatprep.subr.bf16.mxu0 %v4745_v10 }
 0x93b   : > { %v3289_v42 = vpack.c.bf16 %v3283_v11, %v3282_v20  ;;  %v3291_v18 = vpack.c.bf16 %v3287_v61, %v3286_v59  ;;  %v4833_v61 = vld [vmem:[%s5093_s17 + $0x38] sm:$0xff] }
 0x93d   : > { %4457 = vmatpush3.bf16.msra.mxu0 %v4745_v10  ;;  %v4827_v10 = vld [vmem:[%s5093_s17 + $0x10] sm:$0xff] }
 0x93e   : > { %4466 = vmatprep.subr.bf16.mxu0 %v4746_v15 }
 0x940   : > { %4451 = vmatmul.mubr.msk.bf16.gmra.mrb[20].mxu0 %vm529_vm1, %v3055_v16  ;;  %v4829_v16 = vld [vmem:[%s5093_s17 + $0x18] sm:$0xff] }
 0x941   : > { %4458 = vmatprep.mubr.msk.bf16.mxu0 %vm529_vm1, %v3166_v28 }
 0x948   : > { %4459 = vmatmul.mubr.msk.bf16.vlgmr.msra.gmra.mrb[16].mxu0 %vm529_vm1, %v3167_v3  ;;  %v4830_v3 = vld [vmem:[%s5093_s17 + $0x8] sm:$0xff] }
 0x949   : > { %4467 = vmatpush3.bf16.msra.mxu0 %v4746_v15  ;;  %4462 = vmatprep.mubr.msk.bf16.mxu0 %vm529_vm1, %v3168_v48 }
 0x94a   : > { %4468 = vmatprep.subr.bf16.mxu0 %v4747_v6 }
 0x94d   : > { %4469 = vmatpush3.bf16.msra.mxu0 %v4747_v6 }
 0x94e   : > { %4478 = vmatprep.subr.bf16.mxu0 %v4748_v63 }
 0x950   : > { %4463 = vmatmul.mubr.msk.bf16.gmra.mrb[20].mxu0 %vm529_vm1, %v3169_v7 }
 0x951   : > { %4470 = vmatprep.mubr.msk.bf16.mxu0 %vm529_vm1, %v3288_v52 }
 0x958   : > { %4471 = vmatmul.mubr.msk.bf16.vlgmr.msra.gmra.mrb[16].mxu0 %vm529_vm1, %v3289_v42 }
 0x959   : > { %4479 = vmatpush3.bf16.msra.mxu0 %v4748_v63  ;;  %4474 = vmatprep.mubr.msk.bf16.mxu0 %vm529_vm1, %v3290_v5  ;;  %v4832_v5 = vld [vmem:[%s5093_s17 + $0x20] sm:$0xff] }
 0x95a   : > { %4480 = vmatprep.subr.bf16.mxu0 %v4749_v32 }
 0x95d   : > { %4481 = vmatpush3.bf16.msra.mxu0 %v4749_v32 }
 0x95e   : > { %4490 = vmatprep.subr.bf16.mxu0 %v4750_v14 }
 0x960   : > { %4475 = vmatmul.mubr.msk.bf16.gmra.mrb[20].mxu0 %vm529_vm1, %v3291_v18  ;;  %v4834_v18 = vld [vmem:[%s5093_s17 + $0x28] sm:$0xff] }
 0x961   : > { %4482 = vmatprep.mubr.msk.bf16.mxu0 %vm529_vm1, %v6070_v62 }
 0x968   : > { %4483 = vmatmul.mubr.msk.bf16.vlgmr.msra.gmra.mrb[16].mxu0 %vm529_vm1, %v6071_v53 }
 0x969   : > { %4491 = vmatpush3.bf16.msra.mxu0 %v4750_v14  ;;  %4486 = vmatprep.mubr.msk.bf16.mxu0 %vm529_vm1, %v6072_v29 }
 0x96a   : > { %4492 = vmatprep.subr.bf16.mxu0 %v4751_v19 }
 0x96d   : > { %4493 = vmatpush3.bf16.msra.mxu0 %v4751_v19 }
 0x96e   : > { %4502 = vmatprep.subr.bf16.mxu0 %v4752_v44 }
 0x970   : > { %4487 = vmatmul.mubr.msk.bf16.gmra.mrb[20].mxu0 %vm529_vm1, %v3413_v24 }
 0x971   : > { %4494 = vmatprep.mubr.msk.bf16.mxu0 %vm529_vm1, %v5689_v37  ;;  %v6074_v37 = vpack.c.bf16 %v5813_v43, %v5809_v46 }
 0x978   : > { %4495 = vmatmul.mubr.msk.bf16.vlgmr.msra.gmra.mrb[16].mxu0 %vm529_vm1, %v5708_v58  ;;  %v6075_v58 = vpack.c.bf16 %v5823_v54, %v5819_v0  ;;  %v4079_v0 = vld [vmem:[%s6054_s14] ss:$0 sm:$0xff] }
 0x979   : > { %4503 = vmatpush3.bf16.msra.mxu0 %v4752_v44  ;;  %4498 = vmatprep.mubr.msk.bf16.mxu0 %vm529_vm1, %v5743_v22  ;;  %v3649_v22 = vpack.c.bf16 %v5558_v12, %v3644_v38 }
 0x97a   : > { %4504 = vmatprep.subr.bf16.mxu0 %v4753_v39 }
 0x97d   : > { %4505 = vmatpush3.bf16.msra.mxu0 %v4753_v39 }
 0x980   : > { %4499 = vmatmul.mubr.msk.bf16.gmra.mrb[20].mxu0 %vm529_vm1, %v3527_v25 }
 0x981   : > { %4506 = vmatprep.mubr.msk.bf16.mxu0 %vm529_vm1, %v6073_v26 }
 0x988   : > { %4507 = vmatmul.mubr.msk.bf16.vlgmr.msra.gmra.mrb[16].mxu0 %vm529_vm1, %v6074_v37 }
 0x989   : > { %4510 = vmatprep.mubr.msk.bf16.mxu0 %vm529_vm1, %v6075_v58 }
 0x990   : > { %4511 = vmatmul.mubr.msk.bf16.gmra.mrb[20].mxu0 %vm529_vm1, %v3649_v22 }
 0x9e8   : > { %v4412_v55 = vpop.f32.mrb[12].mxu1 }
 0x9e9   : > { %v2794_v4 = vpop.f32.mrb[13].mxu1 }
 0x9ea   : > { %v4413_v9 = vpop.f32.mrb[14].mxu1 }
 0x9eb   : > { %v2797_v51 = vpop.f32.mrb[15].mxu1 }
 0x9f0   : > { %v4416_v27 = vpop.f32.mrb[16].mxu1 }
 0x9f1   : > { %v2810_v46 = vpop.f32.mrb[17].mxu1 }
 0x9f2   : > { %v4417_v43 = vpop.f32.mrb[18].mxu1 }
 0x9f3   : > { %v2813_v50 = vpop.f32.mrb[19].mxu1 }
 0xa5b   : > { %v4508_v41 = vpop.f32.mrb[16].mxu0 }
 0xa5c   : > { %v4538_v12 = vadd.f32 %v4508_v41, %v4412_v55  ;;  %v3713_v54 = vpop.f32.mrb[17].mxu0 }
 0xa5d   : > { %v4539_v21 = vadd.f32 %v3713_v54, %v2794_v4  ;;  %v4509_v33 = vpop.f32.mrb[18].mxu0 }
 0xa5e   : > { %v3760_v45 = vadd.f32 %v4538_v12, %v4079_v0  ;;  %v4540_v60 = vadd.f32 %v4509_v33, %v4413_v9  ;;  %v3716_v57 = vpop.f32.mrb[19].mxu0 }
 0xa5f   : > { %v3758_v8 = vadd.f32 %v4539_v21, %v4079_v0  ;;  %v4541_v23 = vadd.f32 %v3716_v57, %v2797_v51 }
 0xa60   : > { %v3768_v30 = vadd.f32 %v4827_v10, %v3760_v45  ;;  %v3761_v17 = vadd.f32 %v4540_v60, %v4079_v0 }
 0xa61   : > { %v3766_v49 = vadd.f32 %v4828_v56, %v3758_v8  ;;  %v3759_v15 = vadd.f32 %v4541_v23, %v4079_v0 }
 0xa62   : > { %3776 = vst.msk [vmem:[%s5964_s25 + $0x10] sm:$0xff] %vm529_vm1, %v3768_v30  ;;  %v3769_v28 = vadd.f32 %v4829_v16, %v3761_v17 }
 0xa63   : > { %3774 = vst.msk [vmem:[%s5964_s25] sm:$0xff] %vm529_vm1, %v3766_v49  ;;  %v3767_v6 = vadd.f32 %v4830_v3, %v3759_v15  ;;  %v4512_v48 = vpop.f32.mrb[20].mxu0 }
 0xa64   : > { %3777 = vst.msk [vmem:[%s5964_s25 + $0x18] sm:$0xff] %vm529_vm1, %v3769_v28  ;;  %v4542_v63 = vadd.f32 %v4512_v48, %v4416_v27  ;;  %v3729_v31 = vpop.f32.mrb[21].mxu0 }
 0xa65   : > { %3775 = vst.msk [vmem:[%s5964_s25 + $0x8] sm:$0xff] %vm529_vm1, %v3767_v6  ;;  %v4543_v47 = vadd.f32 %v3729_v31, %v2810_v46  ;;  %v4513_v2 = vpop.f32.mrb[22].mxu0 }
 0xa66   : > { %v3764_v7 = vadd.f32 %v4542_v63, %v4079_v0  ;;  %v4544_v52 = vadd.f32 %v4513_v2, %v4417_v43  ;;  %v3732_v20 = vpop.f32.mrb[23].mxu0 }
 0xa67   : > { %v3762_v11 = vadd.f32 %v4543_v47, %v4079_v0  ;;  %v4545_v36 = vadd.f32 %v3732_v20, %v2813_v50 }
 0xa68   : > { %v3772_v42 = vadd.f32 %v4831_v35, %v3764_v7  ;;  %v3765_v32 = vadd.f32 %v4544_v52, %v4079_v0 }
 0xa69   : > { %v3770_v34 = vadd.f32 %v4832_v5, %v3762_v11  ;;  %v3763_v59 = vadd.f32 %v4545_v36, %v4079_v0 }
 0xa6a   : > { %3780 = vst.msk [vmem:[%s5964_s25 + $0x30] sm:$0xff] %vm529_vm1, %v3772_v42  ;;  %v3773_v14 = vadd.f32 %v4833_v61, %v3765_v32 }
 0xa6b   : > { %3778 = vst.msk [vmem:[%s5964_s25 + $0x20] sm:$0xff] %vm529_vm1, %v3770_v34  ;;  %v3771_v62 = vadd.f32 %v4834_v18, %v3763_v59 }
 0xa6c   : > { %3781 = vst.msk [vmem:[%s5964_s25 + $0x38] sm:$0xff] %vm529_vm1, %v3773_v14 }
 0xa6d   : > { %3779 = vst.msk [vmem:[%s5964_s25 + $0x28] sm:$0xff] %vm529_vm1, %v3771_v62 }
 0xa6e   : > { %4848 = shalt.err (!%p4845_p3)
}
 0xa6f   : > { %s4849_s17 = scalar_lea.hbm %s5986_s26, 1024  ;;  %s4853_s0 = scalar_lea.hbm %s6055_s15, 2048 }
 0xa70   : > { %p4850_p4 = scmp.ne.s32.totalorder %s5986_s26, %s4849_s17  ;;  %p4854_p9 = scmp.lt.u32.totalorder %s5986_s26, %s6055_s15 }
 0xa71   : > { %p4855_p10 = scmp.lt.u32.totalorder %s4853_s0, %s4849_s17  ;;  %p4857_p12 = scmp.lt.u32.totalorder %s4849_s17, %s5986_s26 }
 0xa72   : > { %p4851_p7 = pnand %p4850_p4, %p5025_p5 }
 0xa73   : > { %p4856_p11 = por %p4855_p10, %p4854_p9 }
 0xa74   : > { %p4852_p8 = pneg %p4851_p7 }
 0xa75   : > { %p4858_p13 = por %p4857_p12, %p4856_p11 }
 0xa77   : > { %p4859_p0 = pnand %p4858_p13, %p4852_p8 }
 0xa79   : > { %4862 = shalt.err (!%p4859_p0)
}
 0xa7a   : > { %s4905_s27 = smov 128   ;;  %s4906_s20 = smov 8  }
 0xa7b   : > { %4666 = dma.vmem_to_hbm [thread:$0]  (%p5025_p5), %s5988_s3, 1024, %s5986_s26, %s5999_s22, %s4905_s27, %s4905_s27, %s4906_s20  }
 0xa7c PF: > { %p4672_p1 = scmp.ge.s32.totalorder %s4897_s21, 2  ;;  %s3811_s23 = sand.u32 1, %s4885_s18  }
 0xa7d   : > { %s3812_s17 = scalar_lea.sflag [#allocation4], %s3811_s23 }
 0xa7e   : > { %p4669_p2 = pnand %p4672_p1, %p5029_p6 }
 0xa80   : > { %4880 = dma.done.wait (!%p4669_p2), %s3812_s17, 1024  }
 0xa81   : > { %4882 = vsyncadd (!%p4669_p2), %s3812_s17, 4294966272  ;;  %s6077_s21 = sld [smem:[#allocation7_spill]]  ;;  %s6078_s30 = sld [smem:[#allocation6_spill]] }
 0xa82   : > { %s6079_s20 = sld [smem:[#allocation8_spill]]  ;;  %s6080_s18 = smov %s4889_s19 }
 0xa87   : > { %p25_p3 = scmp.ge.s32.totalorder %s6077_s21, 4   ;;  %s6081_s19 = smov %s6078_s30 }
 0xa89   :  { %27 = sbr.rel (!%p25_p3) target bundleno = 6 (0x6), region = 134 }
 0xa90   :  { %3817 = vsyncpa [#allocation4], 1 }
 0xa91   :  { %3819 = vsyncpa [#allocation4 + $0x1], 1 }

</bundles_post_ra>
